<compile_context>
chip_gen: v5e
topology: v5e:2x2
jax: 0.10.0
libtpu: 0.0.40
codegen_flags: <defaults>
</compile_context>

<pallas_src>
import math
import functools

import jax
import jax.numpy as jnp
from jax.experimental import pallas as pl
from jax.experimental.pallas import tpu as pltpu


# ----------------------------- in-kernel helpers -----------------------------

def _layer_norm(x, gamma, beta, eps=1e-5):
    # x: (rows, E) f32; gamma/beta: (1, E) f32
    mu = jnp.mean(x, axis=-1, keepdims=True)
    xc = x - mu
    var = jnp.mean(xc * xc, axis=-1, keepdims=True)
    return xc * jax.lax.rsqrt(var + eps) * gamma + beta


# ------------------------------ fused stack kernel ----------------------------

def _decoder_stack_kernel(
    # data blocks (constant across the layer axis -> DMA'd once per batch block)
    tgt_ref, mem_ref, memk_ref, qpos_ref,
    # self-attention (stacked per layer, pre-transposed; 1/sqrt(dh) folded into wq/bq)
    sa_wq, sa_wk, sa_wv, sa_bq, sa_bk, sa_bv, sa_ow, sa_ob,
    # cross-attention
    ca_wq, ca_wk, ca_wv, ca_bq, ca_bk, ca_bv, ca_ow, ca_ob,
    # FFN (pre-transposed)
    l1_w, l1_b, l2_w, l2_b,
    # layer norms
    n1_g, n1_b, n2_g, n2_b, n3_g, n3_b,
    # decoder final norm (applied at the last layer only)
    fn_g, fn_b,
    out_ref,
    act_ref,                       # f32 VMEM scratch: resident activation
    *, nhead, matmul_dtype, approx_recip,
):
    layer = pl.program_id(1)
    Nb, L, E = tgt_ref.shape
    S = mem_ref.shape[1]
    dh = E // nhead
    mdt = matmul_dtype

    @pl.when(layer == 0)
    def _():
        # Load the incoming activation once per batch block; it stays f32-resident in
        # VMEM for the whole layer stack.
        act_ref[...] = tgt_ref[...].reshape(Nb * L, E).astype(jnp.float32)

    # Upcast once: LN / softmax / residual math stays in f32 (v5e VPU has no bf16).
    tgt = act_ref[...]
    qpos = qpos_ref[...].reshape(Nb * L, E).astype(jnp.float32)
    mem = mem_ref[...].reshape(Nb * S, E).astype(jnp.float32)
    memk = memk_ref[...].reshape(Nb * S, E).astype(jnp.float32)

    def split_heads(x, T):
        # (Nb*T, E) -> (H*Nb, T, dh): lane slice per head + leading-dim concat.
        parts = [x[:, h * dh:(h + 1) * dh].reshape(Nb, T, dh) for h in range(nhead)]
        out = parts[0] if nhead == 1 else jnp.concatenate(parts, axis=0)
        return out.astype(mdt)

    def merge_heads(o, T):
        # (H*Nb, T, dh) -> (Nb*T, E) with heads lane-concatenated in head order.
        parts = [o[h * Nb:(h + 1) * Nb].reshape(Nb * T, dh) for h in range(nhead)]
        return parts[0] if nhead == 1 else jnp.concatenate(parts, axis=-1)

    def mha(x_q, x_k, x_v, wq, wk, wv, bq, bk, bv, ow, ob, Lq, Lk):
        # Packed lane-dense projections: one (rows,E)@(E,E) dot per Q/K/V.
        q = jnp.dot(x_q.astype(mdt), wq[...], preferred_element_type=jnp.float32) + bq[...]
        k = jnp.dot(x_k.astype(mdt), wk[...], preferred_element_type=jnp.float32) + bk[...]
        v = jnp.dot(x_v.astype(mdt), wv[...], preferred_element_type=jnp.float32) + bv[...]
        qh, kh, vh = split_heads(q, Lq), split_heads(k, Lk), split_heads(v, Lk)
        # Head-batched score / softmax / PV (single einsum + single softmax over H*Nb).
        s = jnp.einsum('bqd,bkd->bqk', qh, kh, preferred_element_type=jnp.float32)
        m = jnp.max(s, axis=-1, keepdims=True)
        e = jnp.exp(s - m)
        p = e * pl.reciprocal(jnp.sum(e, axis=-1, keepdims=True), approx=approx_recip)
        o = jnp.einsum('bqk,bkd->bqd', p.astype(mdt), vh,
                       preferred_element_type=jnp.float32)          # (H*Nb, Lq, dh)
        # Single full-K output projection on the lane-concatenated head outputs.
        return jnp.dot(merge_heads(o, Lq).astype(mdt), ow[...],
                       preferred_element_type=jnp.float32) + ob[...]

    # ----- self attention block (pre-norm); dropout1 == identity -----
    t2 = _layer_norm(tgt, n1_g[...], n1_b[...])
    qk = t2 + qpos
    tgt = tgt + mha(qk, qk, t2,
                    sa_wq, sa_wk, sa_wv, sa_bq, sa_bk, sa_bv, sa_ow, sa_ob, L, L)

    # ----- cross attention block (pre-norm); dropout2 == identity -----
    t2 = _layer_norm(tgt, n2_g[...], n2_b[...])
    tgt = tgt + mha(t2 + qpos, memk, mem,
                    ca_wq, ca_wk, ca_wv, ca_bq, ca_bk, ca_bv, ca_ow, ca_ob, L, S)

    # ----- feed-forward block (pre-norm, relu); dropout/dropout3 == identity -----
    t2 = _layer_norm(tgt, n3_g[...], n3_b[...])
    hdn = jnp.maximum(
        jnp.dot(t2.astype(mdt), l1_w[...], preferred_element_type=jnp.float32)
        + l1_b[...], 0.0)
    tgt = tgt + jnp.dot(hdn.astype(mdt), l2_w[...],
                        preferred_element_type=jnp.float32) + l2_b[...]

    act_ref[...] = tgt

    @pl.when(layer == pl.num_programs(1) - 1)
    def _():
        # TransformerDecoder final LayerNorm fused into the last layer step.
        out_ref[...] = _layer_norm(tgt, fn_g[...], fn_b[...]) \
            .reshape(Nb, L, E).astype(out_ref.dtype)


# --------------------------- one-time weight preparation ----------------------

def prepare_decoder_params(layers_raw, final_norm_raw, *, nhead,
                           matmul_dtype=jnp.bfloat16):
    """PyTorch-convention raw params -> stacked, pre-transposed kernel params.

    Call once and cache; do NOT re-run per forward step.
    """
    E = layers_raw[0][2].shape[0]
    assert E % nhead == 0
    dh = E // nhead
    scale = 1.0 / math.sqrt(dh)
    mdt = matmul_dtype

    def attn(in_w, in_b, out_w, out_b):
        wq, wk, wv = in_w[0:E], in_w[E:2 * E], in_w[2 * E:3 * E]
        bq, bk, bv = in_b[0:E], in_b[E:2 * E], in_b[2 * E:3 * E]
        return (
            (wq.T * scale).astype(mdt),                     # (E, E), scale folded
            wk.T.astype(mdt),
            wv.T.astype(mdt),
            (bq * scale).reshape(1, E).astype(jnp.float32),
            bk.reshape(1, E).astype(jnp.float32),
            bv.reshape(1, E).astype(jnp.float32),
            out_w.T.astype(mdt),                            # (E, E)
            out_b.reshape(1, E).astype(jnp.float32),
        )

    per_layer = []
    for raw in layers_raw:
        (sa_w, sa_b, sa_ow, sa_ob, ca_w, ca_b, ca_ow, ca_ob,
         l1_w, l1_b, l2_w, l2_b, n1_g, n1_b, n2_g, n2_b, n3_g, n3_b) = raw
        sa = attn(sa_w, sa_b, sa_ow, sa_ob)
        ca = attn(ca_w, ca_b, ca_ow, ca_ob)
        ffn = (l1_w.T.astype(mdt), l1_b.reshape(1, -1).astype(jnp.float32),
               l2_w.T.astype(mdt), l2_b.reshape(1, -1).astype(jnp.float32))
        norms = tuple(a.reshape(1, E).astype(jnp.float32)
                      for a in (n1_g, n1_b, n2_g, n2_b, n3_g, n3_b))
        per_layer.append(sa + ca + ffn + norms)

    stacked = tuple(jnp.stack([lp[i] for lp in per_layer], axis=0)
                    for i in range(len(per_layer[0])))       # 26 arrays, leading NL axis
    fn = (final_norm_raw[0].reshape(1, E).astype(jnp.float32),
          final_norm_raw[1].reshape(1, E).astype(jnp.float32))
    return stacked + fn                                      # 28 arrays total


# --------------------------------- forward wrapper ----------------------------

def _stacked_spec(p):
    zeros = (0,) * (p.ndim - 1)
    return pl.BlockSpec((None,) + tuple(p.shape[1:]),
                        lambda b, l, _z=zeros: (l,) + _z)


def _const_spec(p):
    zeros = (0,) * p.ndim
    return pl.BlockSpec(tuple(p.shape), lambda b, l, _z=zeros: _z)


def decoder_catr_forward(tgt, memory, query_pos, pos, params, *, nhead,
                         approx_softmax_recip=True, block_n=None,
                         vmem_limit_bytes=None):
    """DecoderCATR.decoder forward (return_intermediate=False, no masks).

    tgt/query_pos: (L, N, E); memory/pos: (S, N, E) — PyTorch seq-major convention.
    `params` comes from prepare_decoder_params (cached, not rebuilt per call).
    """
    L, N, E = tgt.shape
    S = memory.shape[0]
    num_layers = params[0].shape[0]
    mdt = params[0].dtype
    F = params[16].shape[-1]                       # dim_feedforward (stacked l1_w)

    # Batch-major for the kernel.  TODO(synk): feed batch-major at production.
    tgt_b = jnp.transpose(tgt, (1, 0, 2))
    mem_b = jnp.transpose(memory, (1, 0, 2))
    qpos_b = jnp.transpose(query_pos, (1, 0, 2))
    memk_b = mem_b + jnp.transpose(pos, (1, 0, 2))  # layer-invariant K input, once

    if vmem_limit_bytes is None:
        vmem_limit_bytes = 48 * 1024 * 1024         # v7x-safe; raise on v5e/v6e (128 MiB)

    if block_n is None:
        in_bytes = jnp.dtype(tgt.dtype).itemsize
        w_bytes = jnp.dtype(mdt).itemsize

        def est(bn):                                # rough VMEM bytes per grid step
            data = 2 * bn * (3 * L + 2 * S) * E * in_bytes          # blocks x2 buffers
            weights = 2 * (8 * E * E + 2 * E * F) * w_bytes         # layer weights x2
            act = bn * L * E * 4                                    # resident scratch
            inter = 4 * bn * (L * F + nhead * L * max(L, S) + 4 * (L + S) * E)
            return data + weights + act + inter

        budget = int(0.7 * vmem_limit_bytes)
        block_n = 1
        for bn in range(1, N + 1):
            if N % bn == 0 and est(bn) <= budget and (N // bn >= 2 or N <= 1):
                block_n = bn                        # keep >=2 parallel programs (v7x)
    assert N % block_n == 0

    grid = (N // block_n, num_layers)               # batch parallel, layers arbitrary

    data_specs = [
        pl.BlockSpec((block_n, L, E), lambda b, l: (b, 0, 0)),   # tgt
        pl.BlockSpec((block_n, S, E), lambda b, l: (b, 0, 0)),   # memory (V)
        pl.BlockSpec((block_n, S, E), lambda b, l: (b, 0, 0)),   # memory + pos (K)
        pl.BlockSpec((block_n, L, E), lambda b, l: (b, 0, 0)),   # query_pos
    ]
    stacked, fn_params = params[:-2], params[-2:]
    param_specs = [_stacked_spec(p) for p in stacked] + [_const_spec(p) for p in fn_params]

    kernel = functools.partial(_decoder_stack_kernel, nhead=nhead,
                               matmul_dtype=mdt, approx_recip=approx_softmax_recip)

    out = pl.pallas_call(
        kernel,
        out_shape=jax.ShapeDtypeStruct((N, L, E), tgt.dtype),
        grid_spec=pltpu.PrefetchScalarGridSpec(
            num_scalar_prefetch=0,
            grid=grid,
            in_specs=data_specs + param_specs,
            out_specs=pl.BlockSpec((block_n, L, E), lambda b, l: (b, 0, 0)),
            scratch_shapes=[pltpu.VMEM((block_n * L, E), jnp.float32)],
        ),
        compiler_params=pltpu.CompilerParams(
            dimension_semantics=("parallel", "arbitrary"),
            vmem_limit_bytes=vmem_limit_bytes,
        ),
    )(tgt_b, mem_b, memk_b, qpos_b, *params)

    return jnp.transpose(out, (1, 0, 2))            # back to (L, N, E)


# ----------------------------- pure-JAX reference ------------------------------

def _reference(tgt, memory, query_pos, pos, layers_raw, final_norm_raw, *, nhead):
    def ln(x, g, b, eps=1e-5):
        mu = jnp.mean(x, -1, keepdims=True)
        var = jnp.mean((x - mu) ** 2, -1, keepdims=True)
        return (x - mu) / jnp.sqrt(var + eps) * g + b

    def mha(q_in, k_in, v_in, w, b, ow, ob):
        E = q_in.shape[-1]
        dh = E // nhead
        q = q_in @ w[:E].T + b[:E]
        k = k_in @ w[E:2 * E].T + b[E:2 * E]
        v = v_in @ w[2 * E:].T + b[2 * E:]

        def split(x):  # (T, N, E) -> (N*H, T, dh)
            T, Nn, _ = x.shape
            return x.reshape(T, Nn * nhead, dh).transpose(1, 0, 2)

        qh, kh, vh = split(q) / math.sqrt(dh), split(k), split(v)
        s = jnp.einsum('btd,bsd->bts', qh, kh)
        p = jax.nn.softmax(s, axis=-1)
        o = jnp.einsum('bts,bsd->btd', p, vh)
        T = q_in.shape[0]
        o = o.transpose(1, 0, 2).reshape(T, -1, E)
        return o @ ow.T + ob

    x = tgt
    for (sa_w, sa_b, sa_ow, sa_ob, ca_w, ca_b, ca_ow, ca_ob,
         l1_w, l1_b, l2_w, l2_b, n1_g, n1_b, n2_g, n2_b, n3_g, n3_b) in layers_raw:
        t2 = ln(x, n1_g, n1_b)
        q = t2 + query_pos
        x = x + mha(q, q, t2, sa_w, sa_b, sa_ow, sa_ob)
        t2 = ln(x, n2_g, n2_b)
        x = x + mha(t2 + query_pos, memory + pos, memory, ca_w, ca_b, ca_ow, ca_ob)
        t2 = ln(x, n3_g, n3_b)
        h = jnp.maximum(t2 @ l1_w.T + l1_b, 0.0)
        x = x + h @ l2_w.T + l2_b
    fg, fb = final_norm_raw
    return ln(x, fg, fb)


# ----------------------------------- main --------------------------------------

if __name__ == "__main__":
    # d_model / dim_ff chosen as multiples of 128 so all loads/stores are lane-dense.
    d_model, nhead, dim_ff = 128, 4, 256
    L, S, N = 8, 16, 4
    num_layers = 2

    key = jax.random.PRNGKey(0)

    def rnd(k, shape, scale=0.1):
        return (scale * jax.random.normal(k, shape)).astype(jnp.float32)

    def make_layer(k):
        ks = jax.random.split(k, 18)
        return (
            rnd(ks[0], (3 * d_model, d_model)),   # self_attn.in_proj_weight
            rnd(ks[1], (3 * d_model,)),           # self_attn.in_proj_bias
            rnd(ks[2], (d_model, d_model)),       # self_attn.out_proj.weight
            rnd(ks[3], (d_model,)),               # self_attn.out_proj.bias
            rnd(ks[4], (3 * d_model, d_model)),   # multihead_attn.in_proj_weight
            rnd(ks[5], (3 * d_model,)),           # multihead_attn.in_proj_bias
            rnd(ks[6], (d_model, d_model)),       # multihead_attn.out_proj.weight
            rnd(ks[7], (d_model,)),               # multihead_attn.out_proj.bias
            rnd(ks[8], (dim_ff, d_model)),        # linear1.weight
            rnd(ks[9], (dim_ff,)),                # linear1.bias
            rnd(ks[10], (d_model, dim_ff)),       # linear2.weight
            rnd(ks[11], (d_model,)),              # linear2.bias
            1.0 + rnd(ks[12], (d_model,)),        # norm1.weight
            rnd(ks[13], (d_model,)),              # norm1.bias
            1.0 + rnd(ks[14], (d_model,)),        # norm2.weight
            rnd(ks[15], (d_model,)),              # norm2.bias
            1.0 + rnd(ks[16], (d_model,)),        # norm3.weight
            rnd(ks[17], (d_model,)),              # norm3.bias
        )

    kl = jax.random.split(key, num_layers + 6)
    layers_raw = [make_layer(kl[i]) for i in range(num_layers)]
    final_norm_raw = (1.0 + rnd(kl[num_layers], (d_model,)),
                      rnd(kl[num_layers + 1], (d_model,)))

    tgt = rnd(kl[num_layers + 2], (L, N, d_model), scale=1.0)
    memory = rnd(kl[num_layers + 3], (S, N, d_model), scale=1.0)
    query_pos = rnd(kl[num_layers + 4], (L, N, d_model), scale=1.0)
    pos = rnd(kl[num_layers + 5], (S, N, d_model), scale=1.0)

    ref = _reference(tgt, memory, query_pos, pos, layers_raw, final_norm_raw, nhead=nhead)

    # --- strict check: f32 matmul operands, exact softmax reciprocal ---
    params_f32 = prepare_decoder_params(layers_raw, final_norm_raw,
                                        nhead=nhead, matmul_dtype=jnp.float32)
    fwd_f32 = jax.jit(functools.partial(decoder_catr_forward, nhead=nhead,
                                        approx_softmax_recip=False))
    out = jax.block_until_ready(fwd_f32(tgt, memory, query_pos, pos, params_f32))
    assert out.shape == (L, N, d_model)
    assert jnp.allclose(out, ref, rtol=5e-4, atol=5e-4), "f32 kernel mismatch vs reference"

    # --- production path: bf16 MXU operands + approx softmax reciprocal ---
    params_bf16 = prepare_decoder_params(layers_raw, final_norm_raw,
                                         nhead=nhead, matmul_dtype=jnp.bfloat16)
    fwd_prod = jax.jit(functools.partial(decoder_catr_forward, nhead=nhead))
    out_bf16 = jax.block_until_ready(fwd_prod(tgt, memory, query_pos, pos, params_bf16))
    assert jnp.allclose(out_bf16, ref, rtol=1e-1, atol=1e-1), "bf16 kernel sanity check failed"

    print("KERNEL_OK")
</pallas_src>

<mosaic_0001>
module attributes {stable_mosaic.version = 11 : i64} {
  func.func @_decoder_stack_kernel(%arg0: i32, %arg1: i32, %arg2: memref<2x8x128xf32, #tpu.memory_space<vmem>>, %arg3: memref<2x16x128xf32, #tpu.memory_space<vmem>>, %arg4: memref<2x16x128xf32, #tpu.memory_space<vmem>>, %arg5: memref<2x8x128xf32, #tpu.memory_space<vmem>>, %arg6: memref<1x128x128xf32, #tpu.memory_space<vmem>>, %arg7: memref<1x128x128xf32, #tpu.memory_space<vmem>>, %arg8: memref<1x128x128xf32, #tpu.memory_space<vmem>>, %arg9: memref<1x1x128xf32, #tpu.memory_space<vmem>>, %arg10: memref<1x1x128xf32, #tpu.memory_space<vmem>>, %arg11: memref<1x1x128xf32, #tpu.memory_space<vmem>>, %arg12: memref<1x128x128xf32, #tpu.memory_space<vmem>>, %arg13: memref<1x1x128xf32, #tpu.memory_space<vmem>>, %arg14: memref<1x128x128xf32, #tpu.memory_space<vmem>>, %arg15: memref<1x128x128xf32, #tpu.memory_space<vmem>>, %arg16: memref<1x128x128xf32, #tpu.memory_space<vmem>>, %arg17: memref<1x1x128xf32, #tpu.memory_space<vmem>>, %arg18: memref<1x1x128xf32, #tpu.memory_space<vmem>>, %arg19: memref<1x1x128xf32, #tpu.memory_space<vmem>>, %arg20: memref<1x128x128xf32, #tpu.memory_space<vmem>>, %arg21: memref<1x1x128xf32, #tpu.memory_space<vmem>>, %arg22: memref<1x128x256xf32, #tpu.memory_space<vmem>>, %arg23: memref<1x1x256xf32, #tpu.memory_space<vmem>>, %arg24: memref<1x256x128xf32, #tpu.memory_space<vmem>>, %arg25: memref<1x1x128xf32, #tpu.memory_space<vmem>>, %arg26: memref<1x1x128xf32, #tpu.memory_space<vmem>>, %arg27: memref<1x1x128xf32, #tpu.memory_space<vmem>>, %arg28: memref<1x1x128xf32, #tpu.memory_space<vmem>>, %arg29: memref<1x1x128xf32, #tpu.memory_space<vmem>>, %arg30: memref<1x1x128xf32, #tpu.memory_space<vmem>>, %arg31: memref<1x1x128xf32, #tpu.memory_space<vmem>>, %arg32: memref<1x128xf32, #tpu.memory_space<vmem>>, %arg33: memref<1x128xf32, #tpu.memory_space<vmem>>, %arg34: memref<2x8x128xf32, #tpu.memory_space<vmem>>, %arg35: memref<16x128xf32, #tpu.memory_space<vmem>>) attributes {dimension_semantics = [#tpu.dimension_semantics<parallel>, #tpu.dimension_semantics<arbitrary>], iteration_bounds = array<i64: 2, 2>, scalar_prefetch = 0 : i64, scratch_operands = 1 : i64, tpu.core_type = #tpu.core_type<tc>, window_params = [{transform_indices = @transform_0, window_bounds = array<i64: 2, 8, 128>}, {transform_indices = @transform_1, window_bounds = array<i64: 2, 16, 128>}, {transform_indices = @transform_2, window_bounds = array<i64: 2, 16, 128>}, {transform_indices = @transform_3, window_bounds = array<i64: 2, 8, 128>}, {transform_indices = @transform_4, window_bounds = array<i64: 1, 128, 128>}, {transform_indices = @transform_5, window_bounds = array<i64: 1, 128, 128>}, {transform_indices = @transform_6, window_bounds = array<i64: 1, 128, 128>}, {transform_indices = @transform_7, window_bounds = array<i64: 1, 1, 128>}, {transform_indices = @transform_8, window_bounds = array<i64: 1, 1, 128>}, {transform_indices = @transform_9, window_bounds = array<i64: 1, 1, 128>}, {transform_indices = @transform_10, window_bounds = array<i64: 1, 128, 128>}, {transform_indices = @transform_11, window_bounds = array<i64: 1, 1, 128>}, {transform_indices = @transform_12, window_bounds = array<i64: 1, 128, 128>}, {transform_indices = @transform_13, window_bounds = array<i64: 1, 128, 128>}, {transform_indices = @transform_14, window_bounds = array<i64: 1, 128, 128>}, {transform_indices = @transform_15, window_bounds = array<i64: 1, 1, 128>}, {transform_indices = @transform_16, window_bounds = array<i64: 1, 1, 128>}, {transform_indices = @transform_17, window_bounds = array<i64: 1, 1, 128>}, {transform_indices = @transform_18, window_bounds = array<i64: 1, 128, 128>}, {transform_indices = @transform_19, window_bounds = array<i64: 1, 1, 128>}, {transform_indices = @transform_20, window_bounds = array<i64: 1, 128, 256>}, {transform_indices = @transform_21, window_bounds = array<i64: 1, 1, 256>}, {transform_indices = @transform_22, window_bounds = array<i64: 1, 256, 128>}, {transform_indices = @transform_23, window_bounds = array<i64: 1, 1, 128>}, {transform_indices = @transform_24, window_bounds = array<i64: 1, 1, 128>}, {transform_indices = @transform_25, window_bounds = array<i64: 1, 1, 128>}, {transform_indices = @transform_26, window_bounds = array<i64: 1, 1, 128>}, {transform_indices = @transform_27, window_bounds = array<i64: 1, 1, 128>}, {transform_indices = @transform_28, window_bounds = array<i64: 1, 1, 128>}, {transform_indices = @transform_29, window_bounds = array<i64: 1, 1, 128>}, {pipeline_mode = #tpu.pipeline_mode<synchronous>, transform_indices = @transform_30, window_bounds = array<i64: 1, 128>}, {pipeline_mode = #tpu.pipeline_mode<synchronous>, transform_indices = @transform_31, window_bounds = array<i64: 1, 128>}, {transform_indices = @transform_32, window_bounds = array<i64: 2, 8, 128>}]} {
    %c0_i32 = arith.constant 0 : i32
    %0 = arith.cmpi eq, %arg1, %c0_i32 : i32
    %1 = arith.extui %0 : i1 to i32
    %c0_i32_0 = arith.constant 0 : i32
    %2 = arith.cmpi ne, %1, %c0_i32_0 : i32
    scf.if %2 {
      %c0_125 = arith.constant 0 : index
      %c0_126 = arith.constant 0 : index
      %c0_127 = arith.constant 0 : index
      %259 = vector.load %arg2[%c0_125, %c0_126, %c0_127] : memref<2x8x128xf32, #tpu.memory_space<vmem>>, vector<2x8x128xf32>
      %260 = vector.shape_cast %259 : vector<2x8x128xf32> to vector<16x128xf32>
      %c0_128 = arith.constant 0 : index
      %c0_129 = arith.constant 0 : index
      %261 = vector.load %arg35[%c0_128, %c0_129] : memref<16x128xf32, #tpu.memory_space<vmem>>, vector<16x128xf32>
      tpu.vector_store %arg35[%c0_128, %c0_129], %260 {strides = array<i32>} : memref<16x128xf32, #tpu.memory_space<vmem>>, vector<16x128xf32>,
    } else {
    }
    %c0 = arith.constant 0 : index
    %c0_1 = arith.constant 0 : index
    %3 = vector.load %arg35[%c0, %c0_1] : memref<16x128xf32, #tpu.memory_space<vmem>>, vector<16x128xf32>
    %c0_2 = arith.constant 0 : index
    %c0_3 = arith.constant 0 : index
    %c0_4 = arith.constant 0 : index
    %4 = vector.load %arg5[%c0_2, %c0_3, %c0_4] : memref<2x8x128xf32, #tpu.memory_space<vmem>>, vector<2x8x128xf32>
    %5 = vector.shape_cast %4 : vector<2x8x128xf32> to vector<16x128xf32>
    %c0_5 = arith.constant 0 : index
    %c0_6 = arith.constant 0 : index
    %c0_7 = arith.constant 0 : index
    %6 = vector.load %arg3[%c0_5, %c0_6, %c0_7] : memref<2x16x128xf32, #tpu.memory_space<vmem>>, vector<2x16x128xf32>
    %7 = vector.shape_cast %6 : vector<2x16x128xf32> to vector<32x128xf32>
    %c0_8 = arith.constant 0 : index
    %c0_9 = arith.constant 0 : index
    %c0_10 = arith.constant 0 : index
    %8 = vector.load %arg4[%c0_8, %c0_9, %c0_10] : memref<2x16x128xf32, #tpu.memory_space<vmem>>, vector<2x16x128xf32>
    %9 = vector.shape_cast %8 : vector<2x16x128xf32> to vector<32x128xf32>
    %c0_11 = arith.constant 0 : index
    %c0_12 = arith.constant 0 : index
    %c0_13 = arith.constant 0 : index
    %10 = vector.load %arg26[%c0_11, %c0_12, %c0_13] : memref<1x1x128xf32, #tpu.memory_space<vmem>>, vector<1x1x128xf32>
    %11 = vector.shape_cast %10 : vector<1x1x128xf32> to vector<1x128xf32>
    %c0_14 = arith.constant 0 : index
    %c0_15 = arith.constant 0 : index
    %c0_16 = arith.constant 0 : index
    %12 = vector.load %arg27[%c0_14, %c0_15, %c0_16] : memref<1x1x128xf32, #tpu.memory_space<vmem>>, vector<1x1x128xf32>
    %13 = vector.shape_cast %12 : vector<1x1x128xf32> to vector<1x128xf32>
    %cst = arith.constant dense<0.000000e+00> : vector<16xf32>
    %14 = vector.multi_reduction <add>, %3, %cst [1] : vector<16x128xf32> to vector<16xf32>
    %15 = vector.shape_cast %14 : vector<16xf32> to vector<16x1xf32>
    %cst_17 = arith.constant 1.280000e+02 : f32
    %16 = vector.broadcast %cst_17 : f32 to vector<16x1xf32>
    %17 = arith.divf %15, %16 : vector<16x1xf32>
    %18 = vector.broadcast %17 : vector<16x1xf32> to vector<16x128xf32>
    %19 = arith.subf %3, %18 : vector<16x128xf32>
    %20 = arith.mulf %19, %19 : vector<16x128xf32>
    %cst_18 = arith.constant dense<0.000000e+00> : vector<16xf32>
    %21 = vector.multi_reduction <add>, %20, %cst_18 [1] : vector<16x128xf32> to vector<16xf32>
    %22 = vector.shape_cast %21 : vector<16xf32> to vector<16x1xf32>
    %cst_19 = arith.constant 1.280000e+02 : f32
    %23 = vector.broadcast %cst_19 : f32 to vector<16x1xf32>
    %24 = arith.divf %22, %23 : vector<16x1xf32>
    %cst_20 = arith.constant 9.99999974E-6 : f32
    %25 = vector.broadcast %cst_20 : f32 to vector<16x1xf32>
    %26 = arith.addf %24, %25 : vector<16x1xf32>
    %27 = math.rsqrt %26 : vector<16x1xf32>
    %28 = vector.broadcast %27 : vector<16x1xf32> to vector<16x128xf32>
    %29 = arith.mulf %19, %28 : vector<16x128xf32>
    %30 = vector.broadcast %11 : vector<1x128xf32> to vector<16x128xf32>
    %31 = arith.mulf %29, %30 : vector<16x128xf32>
    %32 = vector.broadcast %13 : vector<1x128xf32> to vector<16x128xf32>
    %33 = arith.addf %31, %32 : vector<16x128xf32>
    %34 = arith.addf %33, %5 : vector<16x128xf32>
    %c0_21 = arith.constant 0 : index
    %c0_22 = arith.constant 0 : index
    %c0_23 = arith.constant 0 : index
    %35 = vector.load %arg6[%c0_21, %c0_22, %c0_23] : memref<1x128x128xf32, #tpu.memory_space<vmem>>, vector<1x128x128xf32>
    %36 = vector.shape_cast %35 : vector<1x128x128xf32> to vector<128x128xf32>
    %cst_24 = arith.constant dense<0.000000e+00> : vector<16x128xf32>
    %37 = tpu.matmul %34, %36, %cst_24 {dimension_numbers = #tpu.dot_dimension_numbers<[1], [0], [0], [1], [0, 0, 1, 1], [], []>} : vector<16x128xf32>, vector<128x128xf32>, vector<16x128xf32> -> vector<16x128xf32>
    %c0_25 = arith.constant 0 : index
    %c0_26 = arith.constant 0 : index
    %c0_27 = arith.constant 0 : index
    %38 = vector.load %arg9[%c0_25, %c0_26, %c0_27] : memref<1x1x128xf32, #tpu.memory_space<vmem>>, vector<1x1x128xf32>
    %39 = vector.shape_cast %38 : vector<1x1x128xf32> to vector<1x128xf32>
    %40 = vector.broadcast %39 : vector<1x128xf32> to vector<16x128xf32>
    %41 = arith.addf %37, %40 : vector<16x128xf32>
    %c0_28 = arith.constant 0 : index
    %c0_29 = arith.constant 0 : index
    %c0_30 = arith.constant 0 : index
    %42 = vector.load %arg7[%c0_28, %c0_29, %c0_30] : memref<1x128x128xf32, #tpu.memory_space<vmem>>, vector<1x128x128xf32>
    %43 = vector.shape_cast %42 : vector<1x128x128xf32> to vector<128x128xf32>
    %cst_31 = arith.constant dense<0.000000e+00> : vector<16x128xf32>
    %44 = tpu.matmul %34, %43, %cst_31 {dimension_numbers = #tpu.dot_dimension_numbers<[1], [0], [0], [1], [0, 0, 1, 1], [], []>} : vector<16x128xf32>, vector<128x128xf32>, vector<16x128xf32> -> vector<16x128xf32>
    %c0_32 = arith.constant 0 : index
    %c0_33 = arith.constant 0 : index
    %c0_34 = arith.constant 0 : index
    %45 = vector.load %arg10[%c0_32, %c0_33, %c0_34] : memref<1x1x128xf32, #tpu.memory_space<vmem>>, vector<1x1x128xf32>
    %46 = vector.shape_cast %45 : vector<1x1x128xf32> to vector<1x128xf32>
    %47 = vector.broadcast %46 : vector<1x128xf32> to vector<16x128xf32>
    %48 = arith.addf %44, %47 : vector<16x128xf32>
    %c0_35 = arith.constant 0 : index
    %c0_36 = arith.constant 0 : index
    %c0_37 = arith.constant 0 : index
    %49 = vector.load %arg8[%c0_35, %c0_36, %c0_37] : memref<1x128x128xf32, #tpu.memory_space<vmem>>, vector<1x128x128xf32>
    %50 = vector.shape_cast %49 : vector<1x128x128xf32> to vector<128x128xf32>
    %cst_38 = arith.constant dense<0.000000e+00> : vector<16x128xf32>
    %51 = tpu.matmul %33, %50, %cst_38 {dimension_numbers = #tpu.dot_dimension_numbers<[1], [0], [0], [1], [0, 0, 1, 1], [], []>} : vector<16x128xf32>, vector<128x128xf32>, vector<16x128xf32> -> vector<16x128xf32>
    %c0_39 = arith.constant 0 : index
    %c0_40 = arith.constant 0 : index
    %c0_41 = arith.constant 0 : index
    %52 = vector.load %arg11[%c0_39, %c0_40, %c0_41] : memref<1x1x128xf32, #tpu.memory_space<vmem>>, vector<1x1x128xf32>
    %53 = vector.shape_cast %52 : vector<1x1x128xf32> to vector<1x128xf32>
    %54 = vector.broadcast %53 : vector<1x128xf32> to vector<16x128xf32>
    %55 = arith.addf %51, %54 : vector<16x128xf32>
    %56 = vector.extract_strided_slice %41 {offsets = [0, 0], sizes = [16, 32], strides = [1, 1]} : vector<16x128xf32> to vector<16x32xf32>
    %57 = vector.shape_cast %56 : vector<16x32xf32> to vector<2x8x32xf32>
    %58 = vector.extract_strided_slice %41 {offsets = [0, 32], sizes = [16, 32], strides = [1, 1]} : vector<16x128xf32> to vector<16x32xf32>
    %59 = vector.shape_cast %58 : vector<16x32xf32> to vector<2x8x32xf32>
    %60 = vector.extract_strided_slice %41 {offsets = [0, 64], sizes = [16, 32], strides = [1, 1]} : vector<16x128xf32> to vector<16x32xf32>
    %61 = vector.shape_cast %60 : vector<16x32xf32> to vector<2x8x32xf32>
    %62 = vector.extract_strided_slice %41 {offsets = [0, 96], sizes = [16, 32], strides = [1, 1]} : vector<16x128xf32> to vector<16x32xf32>
    %63 = vector.shape_cast %62 : vector<16x32xf32> to vector<2x8x32xf32>
    %64 = tpu.concatenate %57, %59, %61, %63 in 0 : vector<2x8x32xf32>, vector<2x8x32xf32>, vector<2x8x32xf32>, vector<2x8x32xf32> -> vector<8x8x32xf32>
    %65 = vector.extract_strided_slice %48 {offsets = [0, 0], sizes = [16, 32], strides = [1, 1]} : vector<16x128xf32> to vector<16x32xf32>
    %66 = vector.shape_cast %65 : vector<16x32xf32> to vector<2x8x32xf32>
    %67 = vector.extract_strided_slice %48 {offsets = [0, 32], sizes = [16, 32], strides = [1, 1]} : vector<16x128xf32> to vector<16x32xf32>
    %68 = vector.shape_cast %67 : vector<16x32xf32> to vector<2x8x32xf32>
    %69 = vector.extract_strided_slice %48 {offsets = [0, 64], sizes = [16, 32], strides = [1, 1]} : vector<16x128xf32> to vector<16x32xf32>
    %70 = vector.shape_cast %69 : vector<16x32xf32> to vector<2x8x32xf32>
    %71 = vector.extract_strided_slice %48 {offsets = [0, 96], sizes = [16, 32], strides = [1, 1]} : vector<16x128xf32> to vector<16x32xf32>
    %72 = vector.shape_cast %71 : vector<16x32xf32> to vector<2x8x32xf32>
    %73 = tpu.concatenate %66, %68, %70, %72 in 0 : vector<2x8x32xf32>, vector<2x8x32xf32>, vector<2x8x32xf32>, vector<2x8x32xf32> -> vector<8x8x32xf32>
    %74 = vector.extract_strided_slice %55 {offsets = [0, 0], sizes = [16, 32], strides = [1, 1]} : vector<16x128xf32> to vector<16x32xf32>
    %75 = vector.shape_cast %74 : vector<16x32xf32> to vector<2x8x32xf32>
    %76 = vector.extract_strided_slice %55 {offsets = [0, 32], sizes = [16, 32], strides = [1, 1]} : vector<16x128xf32> to vector<16x32xf32>
    %77 = vector.shape_cast %76 : vector<16x32xf32> to vector<2x8x32xf32>
    %78 = vector.extract_strided_slice %55 {offsets = [0, 64], sizes = [16, 32], strides = [1, 1]} : vector<16x128xf32> to vector<16x32xf32>
    %79 = vector.shape_cast %78 : vector<16x32xf32> to vector<2x8x32xf32>
    %80 = vector.extract_strided_slice %55 {offsets = [0, 96], sizes = [16, 32], strides = [1, 1]} : vector<16x128xf32> to vector<16x32xf32>
    %81 = vector.shape_cast %80 : vector<16x32xf32> to vector<2x8x32xf32>
    %82 = tpu.concatenate %75, %77, %79, %81 in 0 : vector<2x8x32xf32>, vector<2x8x32xf32>, vector<2x8x32xf32>, vector<2x8x32xf32> -> vector<8x8x32xf32>
    "tpu.trace_start"() <{level = 10 : i32, message = "bqd,bkd->bqk"}> : () -> ()
    %cst_42 = arith.constant dense<0.000000e+00> : vector<8x8x8xf32>
    %83 = tpu.matmul %64, %73, %cst_42 {dimension_numbers = #tpu.dot_dimension_numbers<[2], [2], [1], [1], [0, 0, 0, 1, 1, 1], [0], [0]>} : vector<8x8x32xf32>, vector<8x8x32xf32>, vector<8x8x8xf32> -> vector<8x8x8xf32>
    "tpu.trace_stop"() : () -> ()
    %cst_43 = arith.constant dense<0xFF800000> : vector<8x8xf32>
    %84 = vector.multi_reduction <maximumf>, %83, %cst_43 [2] : vector<8x8x8xf32> to vector<8x8xf32>
    %85 = vector.shape_cast %84 : vector<8x8xf32> to vector<8x8x1xf32>
    %86 = vector.broadcast %85 : vector<8x8x1xf32> to vector<8x8x8xf32>
    %87 = arith.subf %83, %86 : vector<8x8x8xf32>
    %88 = math.exp %87 : vector<8x8x8xf32>
    %cst_44 = arith.constant dense<0.000000e+00> : vector<8x8xf32>
    %89 = vector.multi_reduction <add>, %88, %cst_44 [2] : vector<8x8x8xf32> to vector<8x8xf32>
    %90 = vector.shape_cast %89 : vector<8x8xf32> to vector<8x8x1xf32>
    %91 = tpu.reciprocal %90 : vector<8x8x1xf32> -> vector<8x8x1xf32>
    %92 = vector.broadcast %91 : vector<8x8x1xf32> to vector<8x8x8xf32>
    %93 = arith.mulf %88, %92 : vector<8x8x8xf32>
    "tpu.trace_start"() <{level = 10 : i32, message = "bqk,bkd->bqd"}> : () -> ()
    %cst_45 = arith.constant dense<0.000000e+00> : vector<8x8x32xf32>
    %94 = tpu.matmul %93, %82, %cst_45 {dimension_numbers = #tpu.dot_dimension_numbers<[2], [1], [1], [2], [0, 0, 0, 1, 1, 2], [0], [0]>} : vector<8x8x8xf32>, vector<8x8x32xf32>, vector<8x8x32xf32> -> vector<8x8x32xf32>
    "tpu.trace_stop"() : () -> ()
    %95 = vector.extract_strided_slice %94 {offsets = [0, 0, 0], sizes = [2, 8, 32], strides = [1, 1, 1]} : vector<8x8x32xf32> to vector<2x8x32xf32>
    %96 = vector.shape_cast %95 : vector<2x8x32xf32> to vector<16x32xf32>
    %97 = vector.extract_strided_slice %94 {offsets = [2, 0, 0], sizes = [2, 8, 32], strides = [1, 1, 1]} : vector<8x8x32xf32> to vector<2x8x32xf32>
    %98 = vector.shape_cast %97 : vector<2x8x32xf32> to vector<16x32xf32>
    %99 = vector.extract_strided_slice %94 {offsets = [4, 0, 0], sizes = [2, 8, 32], strides = [1, 1, 1]} : vector<8x8x32xf32> to vector<2x8x32xf32>
    %100 = vector.shape_cast %99 : vector<2x8x32xf32> to vector<16x32xf32>
    %101 = vector.extract_strided_slice %94 {offsets = [6, 0, 0], sizes = [2, 8, 32], strides = [1, 1, 1]} : vector<8x8x32xf32> to vector<2x8x32xf32>
    %102 = vector.shape_cast %101 : vector<2x8x32xf32> to vector<16x32xf32>
    %103 = tpu.concatenate %96, %98, %100, %102 in 1 : vector<16x32xf32>, vector<16x32xf32>, vector<16x32xf32>, vector<16x32xf32> -> vector<16x128xf32>
    %c0_46 = arith.constant 0 : index
    %c0_47 = arith.constant 0 : index
    %c0_48 = arith.constant 0 : index
    %104 = vector.load %arg12[%c0_46, %c0_47, %c0_48] : memref<1x128x128xf32, #tpu.memory_space<vmem>>, vector<1x128x128xf32>
    %105 = vector.shape_cast %104 : vector<1x128x128xf32> to vector<128x128xf32>
    %cst_49 = arith.constant dense<0.000000e+00> : vector<16x128xf32>
    %106 = tpu.matmul %103, %105, %cst_49 {dimension_numbers = #tpu.dot_dimension_numbers<[1], [0], [0], [1], [0, 0, 1, 1], [], []>} : vector<16x128xf32>, vector<128x128xf32>, vector<16x128xf32> -> vector<16x128xf32>
    %c0_50 = arith.constant 0 : index
    %c0_51 = arith.constant 0 : index
    %c0_52 = arith.constant 0 : index
    %107 = vector.load %arg13[%c0_50, %c0_51, %c0_52] : memref<1x1x128xf32, #tpu.memory_space<vmem>>, vector<1x1x128xf32>
    %108 = vector.shape_cast %107 : vector<1x1x128xf32> to vector<1x128xf32>
    %109 = vector.broadcast %108 : vector<1x128xf32> to vector<16x128xf32>
    %110 = arith.addf %106, %109 : vector<16x128xf32>
    %111 = arith.addf %3, %110 : vector<16x128xf32>
    %c0_53 = arith.constant 0 : index
    %c0_54 = arith.constant 0 : index
    %c0_55 = arith.constant 0 : index
    %112 = vector.load %arg28[%c0_53, %c0_54, %c0_55] : memref<1x1x128xf32, #tpu.memory_space<vmem>>, vector<1x1x128xf32>
    %113 = vector.shape_cast %112 : vector<1x1x128xf32> to vector<1x128xf32>
    %c0_56 = arith.constant 0 : index
    %c0_57 = arith.constant 0 : index
    %c0_58 = arith.constant 0 : index
    %114 = vector.load %arg29[%c0_56, %c0_57, %c0_58] : memref<1x1x128xf32, #tpu.memory_space<vmem>>, vector<1x1x128xf32>
    %115 = vector.shape_cast %114 : vector<1x1x128xf32> to vector<1x128xf32>
    %cst_59 = arith.constant dense<0.000000e+00> : vector<16xf32>
    %116 = vector.multi_reduction <add>, %111, %cst_59 [1] : vector<16x128xf32> to vector<16xf32>
    %117 = vector.shape_cast %116 : vector<16xf32> to vector<16x1xf32>
    %cst_60 = arith.constant 1.280000e+02 : f32
    %118 = vector.broadcast %cst_60 : f32 to vector<16x1xf32>
    %119 = arith.divf %117, %118 : vector<16x1xf32>
    %120 = vector.broadcast %119 : vector<16x1xf32> to vector<16x128xf32>
    %121 = arith.subf %111, %120 : vector<16x128xf32>
    %122 = arith.mulf %121, %121 : vector<16x128xf32>
    %cst_61 = arith.constant dense<0.000000e+00> : vector<16xf32>
    %123 = vector.multi_reduction <add>, %122, %cst_61 [1] : vector<16x128xf32> to vector<16xf32>
    %124 = vector.shape_cast %123 : vector<16xf32> to vector<16x1xf32>
    %cst_62 = arith.constant 1.280000e+02 : f32
    %125 = vector.broadcast %cst_62 : f32 to vector<16x1xf32>
    %126 = arith.divf %124, %125 : vector<16x1xf32>
    %cst_63 = arith.constant 9.99999974E-6 : f32
    %127 = vector.broadcast %cst_63 : f32 to vector<16x1xf32>
    %128 = arith.addf %126, %127 : vector<16x1xf32>
    %129 = math.rsqrt %128 : vector<16x1xf32>
    %130 = vector.broadcast %129 : vector<16x1xf32> to vector<16x128xf32>
    %131 = arith.mulf %121, %130 : vector<16x128xf32>
    %132 = vector.broadcast %113 : vector<1x128xf32> to vector<16x128xf32>
    %133 = arith.mulf %131, %132 : vector<16x128xf32>
    %134 = vector.broadcast %115 : vector<1x128xf32> to vector<16x128xf32>
    %135 = arith.addf %133, %134 : vector<16x128xf32>
    %136 = arith.addf %135, %5 : vector<16x128xf32>
    %c0_64 = arith.constant 0 : index
    %c0_65 = arith.constant 0 : index
    %c0_66 = arith.constant 0 : index
    %137 = vector.load %arg14[%c0_64, %c0_65, %c0_66] : memref<1x128x128xf32, #tpu.memory_space<vmem>>, vector<1x128x128xf32>
    %138 = vector.shape_cast %137 : vector<1x128x128xf32> to vector<128x128xf32>
    %cst_67 = arith.constant dense<0.000000e+00> : vector<16x128xf32>
    %139 = tpu.matmul %136, %138, %cst_67 {dimension_numbers = #tpu.dot_dimension_numbers<[1], [0], [0], [1], [0, 0, 1, 1], [], []>} : vector<16x128xf32>, vector<128x128xf32>, vector<16x128xf32> -> vector<16x128xf32>
    %c0_68 = arith.constant 0 : index
    %c0_69 = arith.constant 0 : index
    %c0_70 = arith.constant 0 : index
    %140 = vector.load %arg17[%c0_68, %c0_69, %c0_70] : memref<1x1x128xf32, #tpu.memory_space<vmem>>, vector<1x1x128xf32>
    %141 = vector.shape_cast %140 : vector<1x1x128xf32> to vector<1x128xf32>
    %142 = vector.broadcast %141 : vector<1x128xf32> to vector<16x128xf32>
    %143 = arith.addf %139, %142 : vector<16x128xf32>
    %c0_71 = arith.constant 0 : index
    %c0_72 = arith.constant 0 : index
    %c0_73 = arith.constant 0 : index
    %144 = vector.load %arg15[%c0_71, %c0_72, %c0_73] : memref<1x128x128xf32, #tpu.memory_space<vmem>>, vector<1x128x128xf32>
    %145 = vector.shape_cast %144 : vector<1x128x128xf32> to vector<128x128xf32>
    %cst_74 = arith.constant dense<0.000000e+00> : vector<32x128xf32>
    %146 = tpu.matmul %9, %145, %cst_74 {dimension_numbers = #tpu.dot_dimension_numbers<[1], [0], [0], [1], [0, 0, 1, 1], [], []>} : vector<32x128xf32>, vector<128x128xf32>, vector<32x128xf32> -> vector<32x128xf32>
    %c0_75 = arith.constant 0 : index
    %c0_76 = arith.constant 0 : index
    %c0_77 = arith.constant 0 : index
    %147 = vector.load %arg18[%c0_75, %c0_76, %c0_77] : memref<1x1x128xf32, #tpu.memory_space<vmem>>, vector<1x1x128xf32>
    %148 = vector.shape_cast %147 : vector<1x1x128xf32> to vector<1x128xf32>
    %149 = vector.broadcast %148 : vector<1x128xf32> to vector<32x128xf32>
    %150 = arith.addf %146, %149 : vector<32x128xf32>
    %c0_78 = arith.constant 0 : index
    %c0_79 = arith.constant 0 : index
    %c0_80 = arith.constant 0 : index
    %151 = vector.load %arg16[%c0_78, %c0_79, %c0_80] : memref<1x128x128xf32, #tpu.memory_space<vmem>>, vector<1x128x128xf32>
    %152 = vector.shape_cast %151 : vector<1x128x128xf32> to vector<128x128xf32>
    %cst_81 = arith.constant dense<0.000000e+00> : vector<32x128xf32>
    %153 = tpu.matmul %7, %152, %cst_81 {dimension_numbers = #tpu.dot_dimension_numbers<[1], [0], [0], [1], [0, 0, 1, 1], [], []>} : vector<32x128xf32>, vector<128x128xf32>, vector<32x128xf32> -> vector<32x128xf32>
    %c0_82 = arith.constant 0 : index
    %c0_83 = arith.constant 0 : index
    %c0_84 = arith.constant 0 : index
    %154 = vector.load %arg19[%c0_82, %c0_83, %c0_84] : memref<1x1x128xf32, #tpu.memory_space<vmem>>, vector<1x1x128xf32>
    %155 = vector.shape_cast %154 : vector<1x1x128xf32> to vector<1x128xf32>
    %156 = vector.broadcast %155 : vector<1x128xf32> to vector<32x128xf32>
    %157 = arith.addf %153, %156 : vector<32x128xf32>
    %158 = vector.extract_strided_slice %143 {offsets = [0, 0], sizes = [16, 32], strides = [1, 1]} : vector<16x128xf32> to vector<16x32xf32>
    %159 = vector.shape_cast %158 : vector<16x32xf32> to vector<2x8x32xf32>
    %160 = vector.extract_strided_slice %143 {offsets = [0, 32], sizes = [16, 32], strides = [1, 1]} : vector<16x128xf32> to vector<16x32xf32>
    %161 = vector.shape_cast %160 : vector<16x32xf32> to vector<2x8x32xf32>
    %162 = vector.extract_strided_slice %143 {offsets = [0, 64], sizes = [16, 32], strides = [1, 1]} : vector<16x128xf32> to vector<16x32xf32>
    %163 = vector.shape_cast %162 : vector<16x32xf32> to vector<2x8x32xf32>
    %164 = vector.extract_strided_slice %143 {offsets = [0, 96], sizes = [16, 32], strides = [1, 1]} : vector<16x128xf32> to vector<16x32xf32>
    %165 = vector.shape_cast %164 : vector<16x32xf32> to vector<2x8x32xf32>
    %166 = tpu.concatenate %159, %161, %163, %165 in 0 : vector<2x8x32xf32>, vector<2x8x32xf32>, vector<2x8x32xf32>, vector<2x8x32xf32> -> vector<8x8x32xf32>
    %167 = vector.extract_strided_slice %150 {offsets = [0, 0], sizes = [32, 32], strides = [1, 1]} : vector<32x128xf32> to vector<32x32xf32>
    %168 = vector.shape_cast %167 : vector<32x32xf32> to vector<2x16x32xf32>
    %169 = vector.extract_strided_slice %150 {offsets = [0, 32], sizes = [32, 32], strides = [1, 1]} : vector<32x128xf32> to vector<32x32xf32>
    %170 = vector.shape_cast %169 : vector<32x32xf32> to vector<2x16x32xf32>
    %171 = vector.extract_strided_slice %150 {offsets = [0, 64], sizes = [32, 32], strides = [1, 1]} : vector<32x128xf32> to vector<32x32xf32>
    %172 = vector.shape_cast %171 : vector<32x32xf32> to vector<2x16x32xf32>
    %173 = vector.extract_strided_slice %150 {offsets = [0, 96], sizes = [32, 32], strides = [1, 1]} : vector<32x128xf32> to vector<32x32xf32>
    %174 = vector.shape_cast %173 : vector<32x32xf32> to vector<2x16x32xf32>
    %175 = tpu.concatenate %168, %170, %172, %174 in 0 : vector<2x16x32xf32>, vector<2x16x32xf32>, vector<2x16x32xf32>, vector<2x16x32xf32> -> vector<8x16x32xf32>
    %176 = vector.extract_strided_slice %157 {offsets = [0, 0], sizes = [32, 32], strides = [1, 1]} : vector<32x128xf32> to vector<32x32xf32>
    %177 = vector.shape_cast %176 : vector<32x32xf32> to vector<2x16x32xf32>
    %178 = vector.extract_strided_slice %157 {offsets = [0, 32], sizes = [32, 32], strides = [1, 1]} : vector<32x128xf32> to vector<32x32xf32>
    %179 = vector.shape_cast %178 : vector<32x32xf32> to vector<2x16x32xf32>
    %180 = vector.extract_strided_slice %157 {offsets = [0, 64], sizes = [32, 32], strides = [1, 1]} : vector<32x128xf32> to vector<32x32xf32>
    %181 = vector.shape_cast %180 : vector<32x32xf32> to vector<2x16x32xf32>
    %182 = vector.extract_strided_slice %157 {offsets = [0, 96], sizes = [32, 32], strides = [1, 1]} : vector<32x128xf32> to vector<32x32xf32>
    %183 = vector.shape_cast %182 : vector<32x32xf32> to vector<2x16x32xf32>
    %184 = tpu.concatenate %177, %179, %181, %183 in 0 : vector<2x16x32xf32>, vector<2x16x32xf32>, vector<2x16x32xf32>, vector<2x16x32xf32> -> vector<8x16x32xf32>
    "tpu.trace_start"() <{level = 10 : i32, message = "bqd,bkd->bqk"}> : () -> ()
    %cst_85 = arith.constant dense<0.000000e+00> : vector<8x8x16xf32>
    %185 = tpu.matmul %166, %175, %cst_85 {dimension_numbers = #tpu.dot_dimension_numbers<[2], [2], [1], [1], [0, 0, 0, 1, 1, 1], [0], [0]>} : vector<8x8x32xf32>, vector<8x16x32xf32>, vector<8x8x16xf32> -> vector<8x8x16xf32>
    "tpu.trace_stop"() : () -> ()
    %cst_86 = arith.constant dense<0xFF800000> : vector<8x8xf32>
    %186 = vector.multi_reduction <maximumf>, %185, %cst_86 [2] : vector<8x8x16xf32> to vector<8x8xf32>
    %187 = vector.shape_cast %186 : vector<8x8xf32> to vector<8x8x1xf32>
    %188 = vector.broadcast %187 : vector<8x8x1xf32> to vector<8x8x16xf32>
    %189 = arith.subf %185, %188 : vector<8x8x16xf32>
    %190 = math.exp %189 : vector<8x8x16xf32>
    %cst_87 = arith.constant dense<0.000000e+00> : vector<8x8xf32>
    %191 = vector.multi_reduction <add>, %190, %cst_87 [2] : vector<8x8x16xf32> to vector<8x8xf32>
    %192 = vector.shape_cast %191 : vector<8x8xf32> to vector<8x8x1xf32>
    %193 = tpu.reciprocal %192 : vector<8x8x1xf32> -> vector<8x8x1xf32>
    %194 = vector.broadcast %193 : vector<8x8x1xf32> to vector<8x8x16xf32>
    %195 = arith.mulf %190, %194 : vector<8x8x16xf32>
    "tpu.trace_start"() <{level = 10 : i32, message = "bqk,bkd->bqd"}> : () -> ()
    %cst_88 = arith.constant dense<0.000000e+00> : vector<8x8x32xf32>
    %196 = tpu.matmul %195, %184, %cst_88 {dimension_numbers = #tpu.dot_dimension_numbers<[2], [1], [1], [2], [0, 0, 0, 1, 1, 2], [0], [0]>} : vector<8x8x16xf32>, vector<8x16x32xf32>, vector<8x8x32xf32> -> vector<8x8x32xf32>
    "tpu.trace_stop"() : () -> ()
    %197 = vector.extract_strided_slice %196 {offsets = [0, 0, 0], sizes = [2, 8, 32], strides = [1, 1, 1]} : vector<8x8x32xf32> to vector<2x8x32xf32>
    %198 = vector.shape_cast %197 : vector<2x8x32xf32> to vector<16x32xf32>
    %199 = vector.extract_strided_slice %196 {offsets = [2, 0, 0], sizes = [2, 8, 32], strides = [1, 1, 1]} : vector<8x8x32xf32> to vector<2x8x32xf32>
    %200 = vector.shape_cast %199 : vector<2x8x32xf32> to vector<16x32xf32>
    %201 = vector.extract_strided_slice %196 {offsets = [4, 0, 0], sizes = [2, 8, 32], strides = [1, 1, 1]} : vector<8x8x32xf32> to vector<2x8x32xf32>
    %202 = vector.shape_cast %201 : vector<2x8x32xf32> to vector<16x32xf32>
    %203 = vector.extract_strided_slice %196 {offsets = [6, 0, 0], sizes = [2, 8, 32], strides = [1, 1, 1]} : vector<8x8x32xf32> to vector<2x8x32xf32>
    %204 = vector.shape_cast %203 : vector<2x8x32xf32> to vector<16x32xf32>
    %205 = tpu.concatenate %198, %200, %202, %204 in 1 : vector<16x32xf32>, vector<16x32xf32>, vector<16x32xf32>, vector<16x32xf32> -> vector<16x128xf32>
    %c0_89 = arith.constant 0 : index
    %c0_90 = arith.constant 0 : index
    %c0_91 = arith.constant 0 : index
    %206 = vector.load %arg20[%c0_89, %c0_90, %c0_91] : memref<1x128x128xf32, #tpu.memory_space<vmem>>, vector<1x128x128xf32>
    %207 = vector.shape_cast %206 : vector<1x128x128xf32> to vector<128x128xf32>
    %cst_92 = arith.constant dense<0.000000e+00> : vector<16x128xf32>
    %208 = tpu.matmul %205, %207, %cst_92 {dimension_numbers = #tpu.dot_dimension_numbers<[1], [0], [0], [1], [0, 0, 1, 1], [], []>} : vector<16x128xf32>, vector<128x128xf32>, vector<16x128xf32> -> vector<16x128xf32>
    %c0_93 = arith.constant 0 : index
    %c0_94 = arith.constant 0 : index
    %c0_95 = arith.constant 0 : index
    %209 = vector.load %arg21[%c0_93, %c0_94, %c0_95] : memref<1x1x128xf32, #tpu.memory_space<vmem>>, vector<1x1x128xf32>
    %210 = vector.shape_cast %209 : vector<1x1x128xf32> to vector<1x128xf32>
    %211 = vector.broadcast %210 : vector<1x128xf32> to vector<16x128xf32>
    %212 = arith.addf %208, %211 : vector<16x128xf32>
    %213 = arith.addf %111, %212 : vector<16x128xf32>
    %c0_96 = arith.constant 0 : index
    %c0_97 = arith.constant 0 : index
    %c0_98 = arith.constant 0 : index
    %214 = vector.load %arg30[%c0_96, %c0_97, %c0_98] : memref<1x1x128xf32, #tpu.memory_space<vmem>>, vector<1x1x128xf32>
    %215 = vector.shape_cast %214 : vector<1x1x128xf32> to vector<1x128xf32>
    %c0_99 = arith.constant 0 : index
    %c0_100 = arith.constant 0 : index
    %c0_101 = arith.constant 0 : index
    %216 = vector.load %arg31[%c0_99, %c0_100, %c0_101] : memref<1x1x128xf32, #tpu.memory_space<vmem>>, vector<1x1x128xf32>
    %217 = vector.shape_cast %216 : vector<1x1x128xf32> to vector<1x128xf32>
    %cst_102 = arith.constant dense<0.000000e+00> : vector<16xf32>
    %218 = vector.multi_reduction <add>, %213, %cst_102 [1] : vector<16x128xf32> to vector<16xf32>
    %219 = vector.shape_cast %218 : vector<16xf32> to vector<16x1xf32>
    %cst_103 = arith.constant 1.280000e+02 : f32
    %220 = vector.broadcast %cst_103 : f32 to vector<16x1xf32>
    %221 = arith.divf %219, %220 : vector<16x1xf32>
    %222 = vector.broadcast %221 : vector<16x1xf32> to vector<16x128xf32>
    %223 = arith.subf %213, %222 : vector<16x128xf32>
    %224 = arith.mulf %223, %223 : vector<16x128xf32>
    %cst_104 = arith.constant dense<0.000000e+00> : vector<16xf32>
    %225 = vector.multi_reduction <add>, %224, %cst_104 [1] : vector<16x128xf32> to vector<16xf32>
    %226 = vector.shape_cast %225 : vector<16xf32> to vector<16x1xf32>
    %cst_105 = arith.constant 1.280000e+02 : f32
    %227 = vector.broadcast %cst_105 : f32 to vector<16x1xf32>
    %228 = arith.divf %226, %227 : vector<16x1xf32>
    %cst_106 = arith.constant 9.99999974E-6 : f32
    %229 = vector.broadcast %cst_106 : f32 to vector<16x1xf32>
    %230 = arith.addf %228, %229 : vector<16x1xf32>
    %231 = math.rsqrt %230 : vector<16x1xf32>
    %232 = vector.broadcast %231 : vector<16x1xf32> to vector<16x128xf32>
    %233 = arith.mulf %223, %232 : vector<16x128xf32>
    %234 = vector.broadcast %215 : vector<1x128xf32> to vector<16x128xf32>
    %235 = arith.mulf %233, %234 : vector<16x128xf32>
    %236 = vector.broadcast %217 : vector<1x128xf32> to vector<16x128xf32>
    %237 = arith.addf %235, %236 : vector<16x128xf32>
    %c0_107 = arith.constant 0 : index
    %c0_108 = arith.constant 0 : index
    %c0_109 = arith.constant 0 : index
    %238 = vector.load %arg22[%c0_107, %c0_108, %c0_109] : memref<1x128x256xf32, #tpu.memory_space<vmem>>, vector<1x128x256xf32>
    %239 = vector.shape_cast %238 : vector<1x128x256xf32> to vector<128x256xf32>
    %cst_110 = arith.constant dense<0.000000e+00> : vector<16x256xf32>
    %240 = tpu.matmul %237, %239, %cst_110 {dimension_numbers = #tpu.dot_dimension_numbers<[1], [0], [0], [1], [0, 0, 1, 1], [], []>} : vector<16x128xf32>, vector<128x256xf32>, vector<16x256xf32> -> vector<16x256xf32>
    %c0_111 = arith.constant 0 : index
    %c0_112 = arith.constant 0 : index
    %c0_113 = arith.constant 0 : index
    %241 = vector.load %arg23[%c0_111, %c0_112, %c0_113] : memref<1x1x256xf32, #tpu.memory_space<vmem>>, vector<1x1x256xf32>
    %242 = vector.shape_cast %241 : vector<1x1x256xf32> to vector<1x256xf32>
    %243 = vector.broadcast %242 : vector<1x256xf32> to vector<16x256xf32>
    %244 = arith.addf %240, %243 : vector<16x256xf32>
    %cst_114 = arith.constant 0.000000e+00 : f32
    %245 = vector.broadcast %cst_114 : f32 to vector<16x256xf32>
    %246 = arith.maximumf %244, %245 : vector<16x256xf32>
    %c0_115 = arith.constant 0 : index
    %c0_116 = arith.constant 0 : index
    %c0_117 = arith.constant 0 : index
    %247 = vector.load %arg24[%c0_115, %c0_116, %c0_117] : memref<1x256x128xf32, #tpu.memory_space<vmem>>, vector<1x256x128xf32>
    %248 = vector.shape_cast %247 : vector<1x256x128xf32> to vector<256x128xf32>
    %cst_118 = arith.constant dense<0.000000e+00> : vector<16x128xf32>
    %249 = tpu.matmul %246, %248, %cst_118 {dimension_numbers = #tpu.dot_dimension_numbers<[1], [0], [0], [1], [0, 0, 1, 1], [], []>} : vector<16x256xf32>, vector<256x128xf32>, vector<16x128xf32> -> vector<16x128xf32>
    %250 = arith.addf %213, %249 : vector<16x128xf32>
    %c0_119 = arith.constant 0 : index
    %c0_120 = arith.constant 0 : index
    %c0_121 = arith.constant 0 : index
    %251 = vector.load %arg25[%c0_119, %c0_120, %c0_121] : memref<1x1x128xf32, #tpu.memory_space<vmem>>, vector<1x1x128xf32>
    %252 = vector.shape_cast %251 : vector<1x1x128xf32> to vector<1x128xf32>
    %253 = vector.broadcast %252 : vector<1x128xf32> to vector<16x128xf32>
    %254 = arith.addf %250, %253 : vector<16x128xf32>
    %c0_122 = arith.constant 0 : index
    %c0_123 = arith.constant 0 : index
    %255 = vector.load %arg35[%c0_122, %c0_123] : memref<16x128xf32, #tpu.memory_space<vmem>>, vector<16x128xf32>
    tpu.vector_store %arg35[%c0_122, %c0_123], %254 {strides = array<i32>} : memref<16x128xf32, #tpu.memory_space<vmem>>, vector<16x128xf32>,
    %c1_i32 = arith.constant 1 : i32
    %256 = arith.cmpi eq, %arg1, %c1_i32 : i32
    %257 = arith.extui %256 : i1 to i32
    %c0_i32_124 = arith.constant 0 : i32
    %258 = arith.cmpi ne, %257, %c0_i32_124 : i32
    scf.if %258 {
      %c0_125 = arith.constant 0 : index
      %c0_126 = arith.constant 0 : index
      %259 = vector.load %arg32[%c0_125, %c0_126] : memref<1x128xf32, #tpu.memory_space<vmem>>, vector<1x128xf32>
      %c0_127 = arith.constant 0 : index
      %c0_128 = arith.constant 0 : index
      %260 = vector.load %arg33[%c0_127, %c0_128] : memref<1x128xf32, #tpu.memory_space<vmem>>, vector<1x128xf32>
      %cst_129 = arith.constant dense<0.000000e+00> : vector<16xf32>
      %261 = vector.multi_reduction <add>, %254, %cst_129 [1] : vector<16x128xf32> to vector<16xf32>
      %262 = vector.shape_cast %261 : vector<16xf32> to vector<16x1xf32>
      %cst_130 = arith.constant 1.280000e+02 : f32
      %263 = vector.broadcast %cst_130 : f32 to vector<16x1xf32>
      %264 = arith.divf %262, %263 : vector<16x1xf32>
      %265 = vector.broadcast %264 : vector<16x1xf32> to vector<16x128xf32>
      %266 = arith.subf %254, %265 : vector<16x128xf32>
      %267 = arith.mulf %266, %266 : vector<16x128xf32>
      %cst_131 = arith.constant dense<0.000000e+00> : vector<16xf32>
      %268 = vector.multi_reduction <add>, %267, %cst_131 [1] : vector<16x128xf32> to vector<16xf32>
      %269 = vector.shape_cast %268 : vector<16xf32> to vector<16x1xf32>
      %cst_132 = arith.constant 1.280000e+02 : f32
      %270 = vector.broadcast %cst_132 : f32 to vector<16x1xf32>
      %271 = arith.divf %269, %270 : vector<16x1xf32>
      %cst_133 = arith.constant 9.99999974E-6 : f32
      %272 = vector.broadcast %cst_133 : f32 to vector<16x1xf32>
      %273 = arith.addf %271, %272 : vector<16x1xf32>
      %274 = math.rsqrt %273 : vector<16x1xf32>
      %275 = vector.broadcast %274 : vector<16x1xf32> to vector<16x128xf32>
      %276 = arith.mulf %266, %275 : vector<16x128xf32>
      %277 = vector.broadcast %259 : vector<1x128xf32> to vector<16x128xf32>
      %278 = arith.mulf %276, %277 : vector<16x128xf32>
      %279 = vector.broadcast %260 : vector<1x128xf32> to vector<16x128xf32>
      %280 = arith.addf %278, %279 : vector<16x128xf32>
      %281 = vector.shape_cast %280 : vector<16x128xf32> to vector<2x8x128xf32>
      %c0_134 = arith.constant 0 : index
      %c0_135 = arith.constant 0 : index
      %c0_136 = arith.constant 0 : index
      %282 = vector.load %arg34[%c0_134, %c0_135, %c0_136] : memref<2x8x128xf32, #tpu.memory_space<vmem>>, vector<2x8x128xf32>
      tpu.vector_store %arg34[%c0_134, %c0_135, %c0_136], %281 {strides = array<i32>} : memref<2x8x128xf32, #tpu.memory_space<vmem>>, vector<2x8x128xf32>,
    } else {
    }
    return
  }
  func.func @transform_0(%arg0: i32, %arg1: i32) -> (i32, i32, i32) {
    %c0_i32 = arith.constant 0 : i32
    %c0_i32_0 = arith.constant 0 : i32
    %c0_i32_1 = arith.constant 0 : i32
    return %arg0, %c0_i32, %c0_i32_0 : i32, i32, i32
  }
  func.func @transform_1(%arg0: i32, %arg1: i32) -> (i32, i32, i32) {
    %c0_i32 = arith.constant 0 : i32
    %c0_i32_0 = arith.constant 0 : i32
    %c0_i32_1 = arith.constant 0 : i32
    return %arg0, %c0_i32, %c0_i32_0 : i32, i32, i32
  }
  func.func @transform_2(%arg0: i32, %arg1: i32) -> (i32, i32, i32) {
    %c0_i32 = arith.constant 0 : i32
    %c0_i32_0 = arith.constant 0 : i32
    %c0_i32_1 = arith.constant 0 : i32
    return %arg0, %c0_i32, %c0_i32_0 : i32, i32, i32
  }
  func.func @transform_3(%arg0: i32, %arg1: i32) -> (i32, i32, i32) {
    %c0_i32 = arith.constant 0 : i32
    %c0_i32_0 = arith.constant 0 : i32
    %c0_i32_1 = arith.constant 0 : i32
    return %arg0, %c0_i32, %c0_i32_0 : i32, i32, i32
  }
  func.func @transform_4(%arg0: i32, %arg1: i32) -> (i32, i32, i32) {
    %c0_i32 = arith.constant 0 : i32
    %c0_i32_0 = arith.constant 0 : i32
    %c0_i32_1 = arith.constant 0 : i32
    return %arg1, %c0_i32, %c0_i32_0 : i32, i32, i32
  }
  func.func @transform_5(%arg0: i32, %arg1: i32) -> (i32, i32, i32) {
    %c0_i32 = arith.constant 0 : i32
    %c0_i32_0 = arith.constant 0 : i32
    %c0_i32_1 = arith.constant 0 : i32
    return %arg1, %c0_i32, %c0_i32_0 : i32, i32, i32
  }
  func.func @transform_6(%arg0: i32, %arg1: i32) -> (i32, i32, i32) {
    %c0_i32 = arith.constant 0 : i32
    %c0_i32_0 = arith.constant 0 : i32
    %c0_i32_1 = arith.constant 0 : i32
    return %arg1, %c0_i32, %c0_i32_0 : i32, i32, i32
  }
  func.func @transform_7(%arg0: i32, %arg1: i32) -> (i32, i32, i32) {
    %c0_i32 = arith.constant 0 : i32
    %c0_i32_0 = arith.constant 0 : i32
    %c0_i32_1 = arith.constant 0 : i32
    return %arg1, %c0_i32, %c0_i32_0 : i32, i32, i32
  }
  func.func @transform_8(%arg0: i32, %arg1: i32) -> (i32, i32, i32) {
    %c0_i32 = arith.constant 0 : i32
    %c0_i32_0 = arith.constant 0 : i32
    %c0_i32_1 = arith.constant 0 : i32
    return %arg1, %c0_i32, %c0_i32_0 : i32, i32, i32
  }
  func.func @transform_9(%arg0: i32, %arg1: i32) -> (i32, i32, i32) {
    %c0_i32 = arith.constant 0 : i32
    %c0_i32_0 = arith.constant 0 : i32
    %c0_i32_1 = arith.constant 0 : i32
    return %arg1, %c0_i32, %c0_i32_0 : i32, i32, i32
  }
  func.func @transform_10(%arg0: i32, %arg1: i32) -> (i32, i32, i32) {
    %c0_i32 = arith.constant 0 : i32
    %c0_i32_0 = arith.constant 0 : i32
    %c0_i32_1 = arith.constant 0 : i32
    return %arg1, %c0_i32, %c0_i32_0 : i32, i32, i32
  }
  func.func @transform_11(%arg0: i32, %arg1: i32) -> (i32, i32, i32) {
    %c0_i32 = arith.constant 0 : i32
    %c0_i32_0 = arith.constant 0 : i32
    %c0_i32_1 = arith.constant 0 : i32
    return %arg1, %c0_i32, %c0_i32_0 : i32, i32, i32
  }
  func.func @transform_12(%arg0: i32, %arg1: i32) -> (i32, i32, i32) {
    %c0_i32 = arith.constant 0 : i32
    %c0_i32_0 = arith.constant 0 : i32
    %c0_i32_1 = arith.constant 0 : i32
    return %arg1, %c0_i32, %c0_i32_0 : i32, i32, i32
  }
  func.func @transform_13(%arg0: i32, %arg1: i32) -> (i32, i32, i32) {
    %c0_i32 = arith.constant 0 : i32
    %c0_i32_0 = arith.constant 0 : i32
    %c0_i32_1 = arith.constant 0 : i32
    return %arg1, %c0_i32, %c0_i32_0 : i32, i32, i32
  }
  func.func @transform_14(%arg0: i32, %arg1: i32) -> (i32, i32, i32) {
    %c0_i32 = arith.constant 0 : i32
    %c0_i32_0 = arith.constant 0 : i32
    %c0_i32_1 = arith.constant 0 : i32
    return %arg1, %c0_i32, %c0_i32_0 : i32, i32, i32
  }
  func.func @transform_15(%arg0: i32, %arg1: i32) -> (i32, i32, i32) {
    %c0_i32 = arith.constant 0 : i32
    %c0_i32_0 = arith.constant 0 : i32
    %c0_i32_1 = arith.constant 0 : i32
    return %arg1, %c0_i32, %c0_i32_0 : i32, i32, i32
  }
  func.func @transform_16(%arg0: i32, %arg1: i32) -> (i32, i32, i32) {
    %c0_i32 = arith.constant 0 : i32
    %c0_i32_0 = arith.constant 0 : i32
    %c0_i32_1 = arith.constant 0 : i32
    return %arg1, %c0_i32, %c0_i32_0 : i32, i32, i32
  }
  func.func @transform_17(%arg0: i32, %arg1: i32) -> (i32, i32, i32) {
    %c0_i32 = arith.constant 0 : i32
    %c0_i32_0 = arith.constant 0 : i32
    %c0_i32_1 = arith.constant 0 : i32
    return %arg1, %c0_i32, %c0_i32_0 : i32, i32, i32
  }
  func.func @transform_18(%arg0: i32, %arg1: i32) -> (i32, i32, i32) {
    %c0_i32 = arith.constant 0 : i32
    %c0_i32_0 = arith.constant 0 : i32
    %c0_i32_1 = arith.constant 0 : i32
    return %arg1, %c0_i32, %c0_i32_0 : i32, i32, i32
  }
  func.func @transform_19(%arg0: i32, %arg1: i32) -> (i32, i32, i32) {
    %c0_i32 = arith.constant 0 : i32
    %c0_i32_0 = arith.constant 0 : i32
    %c0_i32_1 = arith.constant 0 : i32
    return %arg1, %c0_i32, %c0_i32_0 : i32, i32, i32
  }
  func.func @transform_20(%arg0: i32, %arg1: i32) -> (i32, i32, i32) {
    %c0_i32 = arith.constant 0 : i32
    %c0_i32_0 = arith.constant 0 : i32
    %c0_i32_1 = arith.constant 0 : i32
    return %arg1, %c0_i32, %c0_i32_0 : i32, i32, i32
  }
  func.func @transform_21(%arg0: i32, %arg1: i32) -> (i32, i32, i32) {
    %c0_i32 = arith.constant 0 : i32
    %c0_i32_0 = arith.constant 0 : i32
    %c0_i32_1 = arith.constant 0 : i32
    return %arg1, %c0_i32, %c0_i32_0 : i32, i32, i32
  }
  func.func @transform_22(%arg0: i32, %arg1: i32) -> (i32, i32, i32) {
    %c0_i32 = arith.constant 0 : i32
    %c0_i32_0 = arith.constant 0 : i32
    %c0_i32_1 = arith.constant 0 : i32
    return %arg1, %c0_i32, %c0_i32_0 : i32, i32, i32
  }
  func.func @transform_23(%arg0: i32, %arg1: i32) -> (i32, i32, i32) {
    %c0_i32 = arith.constant 0 : i32
    %c0_i32_0 = arith.constant 0 : i32
    %c0_i32_1 = arith.constant 0 : i32
    return %arg1, %c0_i32, %c0_i32_0 : i32, i32, i32
  }
  func.func @transform_24(%arg0: i32, %arg1: i32) -> (i32, i32, i32) {
    %c0_i32 = arith.constant 0 : i32
    %c0_i32_0 = arith.constant 0 : i32
    %c0_i32_1 = arith.constant 0 : i32
    return %arg1, %c0_i32, %c0_i32_0 : i32, i32, i32
  }
  func.func @transform_25(%arg0: i32, %arg1: i32) -> (i32, i32, i32) {
    %c0_i32 = arith.constant 0 : i32
    %c0_i32_0 = arith.constant 0 : i32
    %c0_i32_1 = arith.constant 0 : i32
    return %arg1, %c0_i32, %c0_i32_0 : i32, i32, i32
  }
  func.func @transform_26(%arg0: i32, %arg1: i32) -> (i32, i32, i32) {
    %c0_i32 = arith.constant 0 : i32
    %c0_i32_0 = arith.constant 0 : i32
    %c0_i32_1 = arith.constant 0 : i32
    return %arg1, %c0_i32, %c0_i32_0 : i32, i32, i32
  }
  func.func @transform_27(%arg0: i32, %arg1: i32) -> (i32, i32, i32) {
    %c0_i32 = arith.constant 0 : i32
    %c0_i32_0 = arith.constant 0 : i32
    %c0_i32_1 = arith.constant 0 : i32
    return %arg1, %c0_i32, %c0_i32_0 : i32, i32, i32
  }
  func.func @transform_28(%arg0: i32, %arg1: i32) -> (i32, i32, i32) {
    %c0_i32 = arith.constant 0 : i32
    %c0_i32_0 = arith.constant 0 : i32
    %c0_i32_1 = arith.constant 0 : i32
    return %arg1, %c0_i32, %c0_i32_0 : i32, i32, i32
  }
  func.func @transform_29(%arg0: i32, %arg1: i32) -> (i32, i32, i32) {
    %c0_i32 = arith.constant 0 : i32
    %c0_i32_0 = arith.constant 0 : i32
    %c0_i32_1 = arith.constant 0 : i32
    return %arg1, %c0_i32, %c0_i32_0 : i32, i32, i32
  }
  func.func @transform_30(%arg0: i32, %arg1: i32) -> (i32, i32) {
    %c0_i32 = arith.constant 0 : i32
    %c0_i32_0 = arith.constant 0 : i32
    %c0_i32_1 = arith.constant 0 : i32
    return %c0_i32, %c0_i32_0 : i32, i32
  }
  func.func @transform_31(%arg0: i32, %arg1: i32) -> (i32, i32) {
    %c0_i32 = arith.constant 0 : i32
    %c0_i32_0 = arith.constant 0 : i32
    %c0_i32_1 = arith.constant 0 : i32
    return %c0_i32, %c0_i32_0 : i32, i32
  }
  func.func @transform_32(%arg0: i32, %arg1: i32) -> (i32, i32, i32) {
    %c0_i32 = arith.constant 0 : i32
    %c0_i32_0 = arith.constant 0 : i32
    %c0_i32_1 = arith.constant 0 : i32
    return %arg0, %c0_i32, %c0_i32_0 : i32, i32, i32
  }
}

</mosaic_0001>

<bundles_post_ra>
// kernel: decoder_catr_forward.1
= control target key start
LH: loop header
LB: loop body
LE: loop exit
PB: predicated region body
PF: predicated region fallthrough
CT: control target
= control target key end

     0   :  { %s5071_s6 = smov 1   ;;  %s5072_s10 = smov 2   ;;  %s6290_s0 = inlined_call_operand.smem [shape: u32[33], index: -1, kind: input, shape index: {}] }
   0x1   :  { %s5119_s5 = sld [smem:[%s6290_s0]]   ;;  %s5073_s14 = smov 3  }
   0x2   :  { %s5124_s9 = sld [smem:[%s6290_s0 + %s5071_s6]]   ;;  %s5074_s18 = smov 4  }
   0x3   :  { %s5129_s13 = sld [smem:[%s6290_s0 + %s5072_s10]]   ;;  %s5075_s22 = smov 5  }
   0x4   :  { %s5134_s17 = sld [smem:[%s6290_s0 + %s5073_s14]]   ;;  %s5076_s26 = smov 6  }
   0x5   :  { %s5139_s21 = sld [smem:[%s6290_s0 + %s5074_s18]]   ;;  %s5077_s30 = smov 7  }
   0x6   :  { %s5144_s25 = sld [smem:[%s6290_s0 + %s5075_s22]]   ;;  %s5078_s4 = smov 8  }
   0x7   :  { %6328 = sst [smem:[#allocation22_spill]] %s5119_s5  ;;  %s5079_s10 = smov 9  }
   0x8   :  { %6329 = sst [smem:[#allocation23_spill]] %s5124_s9  ;;  %s5080_s15 = smov 10  }
   0x9   :  { %6330 = sst [smem:[#allocation24_spill]] %s5129_s13  ;;  %s5081_s20 = smov 11  }
   0xa   :  { %6331 = sst [smem:[#allocation25_spill]] %s5134_s17  ;;  %s5083_s1 = smov 13  }
   0xb   :  { %6332 = sst [smem:[#allocation26_spill]] %s5139_s21  ;;  %s5084_s7 = smov 14  }
   0xc   :  { %6333 = sst [smem:[#allocation27_spill]] %s5144_s25  ;;  %s5086_s22 = smov 16  }
   0xd   :  { %s5149_s29 = sld [smem:[%s6290_s0 + %s5076_s26]]   ;;  %s5082_s26 = smov 12  }
   0xe   :  { %s5154_s3 = sld [smem:[%s6290_s0 + %s5077_s30]]   ;;  %s5087_s28 = smov 17  }
   0xf   :  { %s5159_s8 = sld [smem:[%s6290_s0 + %s5078_s4]]  }
  0x10   :  { %s5164_s14 = sld [smem:[%s6290_s0 + %s5079_s10]]  }
  0x11   :  { %s5169_s19 = sld [smem:[%s6290_s0 + %s5080_s15]]   ;;  %s5085_s15 = smov 15  }
  0x12   :  { %s5174_s24 = sld [smem:[%s6290_s0 + %s5081_s20]]  }
  0x13   :  { %6334 = sst [smem:[#allocation28_spill]] %s5149_s29 }
  0x14   :  { %6335 = sst [smem:[#allocation29_spill]] %s5154_s3 }
  0x15   :  { %6336 = sst [smem:[#allocation30_spill]] %s5159_s8 }
  0x16   :  { %6337 = sst [smem:[#allocation31_spill]] %s5164_s14 }
  0x17   :  { %6338 = sst [smem:[#allocation32_spill]] %s5169_s19 }
  0x18   :  { %6339 = sst [smem:[#allocation33_spill]] %s5174_s24 }
  0x19   :  { %s5179_s30 = sld [smem:[%s6290_s0 + %s5082_s26]]  }
  0x1a   :  { %s5184_s6 = sld [smem:[%s6290_s0 + %s5083_s1]]  }
  0x1b   :  { %s5189_s12 = sld [smem:[%s6290_s0 + %s5084_s7]]   ;;  %s5088_s7 = smov 18  }
  0x1c   :  { %s5194_s20 = sld [smem:[%s6290_s0 + %s5085_s15]]   ;;  %s5089_s15 = smov 19  }
  0x1d   :  { %s5199_s27 = sld [smem:[%s6290_s0 + %s5086_s22]]   ;;  %s5090_s22 = smov 20  }
  0x1e   :  { %s5204_s4 = sld [smem:[%s6290_s0 + %s5087_s28]]   ;;  %s5091_s28 = smov 21  }
  0x1f   :  { %6340 = sst [smem:[#allocation34_spill]] %s5179_s30 }
  0x20   :  { %6341 = sst [smem:[#allocation35_spill]] %s5184_s6 }
  0x21   :  { %6342 = sst [smem:[#allocation36_spill]] %s5189_s12 }
  0x22   :  { %6343 = sst [smem:[#allocation37_spill]] %s5194_s20 }
  0x23   :  { %6344 = sst [smem:[#allocation38_spill]] %s5199_s27 }
  0x24   :  { %6345 = sst [smem:[#allocation39_spill]] %s5204_s4 }
  0x25   :  { %s5209_s24 = sld [smem:[%s6290_s0 + %s5088_s7]]   ;;  %s5092_s7 = smov 22  }
  0x26   :  { %s5214_s20 = sld [smem:[%s6290_s0 + %s5089_s15]]   ;;  %s5093_s15 = smov 23  }
  0x27   :  { %s5219_s27 = sld [smem:[%s6290_s0 + %s5090_s22]]   ;;  %s5094_s22 = smov 24  }
  0x28   :  { %s5224_s4 = sld [smem:[%s6290_s0 + %s5091_s28]]   ;;  %s5095_s28 = smov 25  }
  0x29   :  { %s5229_s14 = sld [smem:[%s6290_s0 + %s5092_s7]]   ;;  %s5096_s7 = smov 26  }
  0x2a   :  { %s5239_s8 = sld [smem:[%s6290_s0 + %s5094_s22]]   ;;  %s5098_s22 = smov 28  }
  0x2b   :  { %6346 = sst [smem:[#allocation40_spill]] %s5209_s24 }
  0x2c   :  { %6347 = sst [smem:[#allocation41_spill]] %s5214_s20 }
  0x2d   :  { %6348 = sst [smem:[#allocation42_spill]] %s5219_s27 }
  0x2e   :  { %6349 = sst [smem:[#allocation43_spill]] %s5224_s4 }
  0x2f   :  { %6350 = sst [smem:[#allocation44_spill]] %s5229_s14 }
  0x30   :  { %s5234_s20 = sld [smem:[%s6290_s0 + %s5093_s15]]   ;;  %s5097_s15 = smov 27  }
  0x31   :  { %6352 = sst [smem:[#allocation46_spill]] %s5239_s8 }
  0x32   :  { %s5244_s4 = sld [smem:[%s6290_s0 + %s5095_s28]]   ;;  %s5099_s28 = smov 29  }
  0x33   :  { %s5249_s21 = sld [smem:[%s6290_s0 + %s5096_s7]]   ;;  %s5100_s7 = smov 30  }
  0x34   :  { %s5259_s8 = sld [smem:[%s6290_s0 + %s5098_s22]]   ;;  %s5102_s22 = smov 32  }
  0x36   :  { %6351 = sst [smem:[#allocation45_spill]] %s5234_s20 }
  0x37   :  { %s5254_s20 = sld [smem:[%s6290_s0 + %s5097_s15]]   ;;  %s5101_s15 = smov 31  }
  0x38   :  { %6353 = sst [smem:[#allocation47_spill]] %s5244_s4 }
  0x39   :  { %6354 = sst [smem:[#allocation48_spill]] %s5249_s21 }
  0x3a   :  { %6356 = sst [smem:[#allocation50_spill]] %s5259_s8 }
  0x3b   :  { %s5264_s4 = sld [smem:[%s6290_s0 + %s5099_s28]]  }
  0x3c   :  { %s5269_s21 = sld [smem:[%s6290_s0 + %s5100_s7]]  }
  0x3d   :  { %6355 = sst [smem:[#allocation49_spill]] %s5254_s20 }
  0x3e   :  { %s5274_s20 = sld [smem:[%s6290_s0 + %s5101_s15]]  }
  0x3f   :  { %s5279_s8 = sld [smem:[%s6290_s0 + %s5102_s22]]  }
  0x41   :  { %6357 = sst [smem:[#allocation51_spill]] %s5264_s4 }
  0x42   :  { %6358 = sst [smem:[#allocation52_spill]] %s5269_s21 }
  0x44   :  { %6359 = sst [smem:[#allocation53_spill]] %s5274_s20 }
  0x45   :  { %6360 = sst [smem:[#allocation54_spill]] %s5279_s8 }
  0x46   :  { %70 = vsyncpa [#allocation4], 0 }
  0x47   :  { %72 = vsyncpa [#allocation4 + $0x1], 0 }
  0x48   :  { %73 = vsyncpa [#allocation6], 0 }
  0x49   :  { %75 = vsyncpa [#allocation6 + $0x1], 0 }
  0x4a   :  { %76 = vsyncpa [#allocation9], 0 }
  0x4b   :  { %78 = vsyncpa [#allocation9 + $0x1], 0 }
  0x4c   :  { %79 = vsyncpa [#allocation12], 0 }
  0x4d   :  { %81 = vsyncpa [#allocation12 + $0x1], 0 }
  0x4e   :  { %82 = vsyncpa [#allocation15], 0 }
  0x4f   :  { %84 = vsyncpa [#allocation15 + $0x1], 0  ;;  %s5281_s28 = smov 0   ;;  %s5283_s1 = smov 0  }
  0x50   :  { %s5285_s2 = smov 0   ;;  %s5287_s7 = smov 0  }
  0x51   :  { %s5289_s0 = smov 0   ;;  %s5291_s10 = smov 0  }
  0x52   :  { %s5293_s11 = smov 0   ;;  %s5295_s15 = smov 0  }
  0x53 LB: > { %s6361_s25 = sld [smem:[#allocation27_spill]]  ;;  %s99_s18 = sadd.s32 1, %s5061_s10  ;;  %s5041_s28 = sphi %s5281_s28, %s6473_s28   ;;  %s5069_s15 = sphi %s5295_s15, %s90_s15   ;;  %s5065_s11 = sphi %s5293_s11, %s6479_s11   ;;  %s5061_s10 = sphi %s5291_s10, %s6478_s10   ;;  %s5057_s0 = sphi %s5289_s0, %s6477_s0   ;;  %s5053_s7 = sphi %s5287_s7, %s6476_s7   ;;  %s5049_s2 = sphi %s5285_s2, %s6475_s2   ;;  %s5045_s1 = sphi %s5283_s1, %s6474_s1  }
  0x54   : > { %s6362_s24 = sld [smem:[#allocation40_spill]]  ;;  %p100_p0 = scmp.ge.s32.totalorder %s99_s18, 2 }
  0x55   : > { %s6363_s19 = sld [smem:[#allocation32_spill]]  ;;  %s102_s22 = sadd.s32 1, %s5065_s11 }
  0x56   : > { %s6364_s14 = sld [smem:[#allocation44_spill]]  ;;  %s239_s23 = sadd.s32 1, %s5049_s2 }
  0x57   : > { %s6365_s6 = sld [smem:[#allocation35_spill]]  ;;  %p246_p1 = scmp.ne.s32.totalorder %s5049_s2, %s5045_s1 }
  0x58   : > { %s6366_s27 = sld [smem:[#allocation42_spill]]  ;;  %s6481_s18 = smov (%p100_p0, %s99_s18), 0 }
  0x59   : > { %s6367_s12 = sld [smem:[#allocation36_spill]]  ;;  %s6483_s22 = smov (!%p100_p0, %s102_s22), %s5065_s11 }
  0x5a   : > { %s6368_s30 = sld [smem:[#allocation34_spill]]  ;;  %s236_s26 = ssub.s32 %s5061_s10, %s6481_s18 }
  0x5b   : > { %s6369_s29 = sld [smem:[#allocation28_spill]]  ;;  %p247_p2 = scmp.eq.s32.totalorder %s5069_s15, 0 }
  0x5c   : > { %6370 = sst [smem:[#allocation55_spill]] %s5045_s1  ;;  %p104_p3 = scmp.ge.s32.totalorder %s6483_s22, 2 }
  0x5d   : > { %6371 = sst [smem:[#allocation56_spill]] %s5049_s2  ;;  %p237_p4 = scmp.eq.s32.totalorder %s236_s26, 0 }
  0x5e   : > { %6372 = sst [smem:[#allocation57_spill]] %s5053_s7  ;;  %p248_p5 = por %p247_p2, %p246_p1 }
  0x5f   : > { %6373 = sst [smem:[#allocation58_spill]] %s5057_s0  ;;  %p252_p6 = scmp.ne.s32.totalorder %s5045_s1, %s5041_s28 }
  0x60   : > { %6374 = sst [smem:[#allocation59_spill]] %s5061_s10  ;;  %s6485_s22 = smov (%p104_p3, %s6483_s22), 0 }
  0x61   : > { %6375 = sst [smem:[#allocation60_spill]] %s5065_s11  ;;  %s6380_s20 = sadd.s32 4294967295, %s5069_s15  }
  0x62   : > { %6376 = sst [smem:[#allocation61_spill]] %s5069_s15  ;;  %p253_p7 = scmp.eq.s32.totalorder %s6380_s20, 0 }
  0x63   : > { %6377 = sst [smem:[#allocation62_spill]] %s6481_s18  ;;  %p4479_p8 = scmp.lt.s32.totalorder %s5069_s15, 4 }
  0x64   : > { %6378 = sst [smem:[#allocation63_spill]] %s6485_s22  ;;  %s5341_s21 = sand.u32 1, %s5049_s2  }
  0x65   : > { %s5335_s16 = scalar_select %p237_p4, %s5049_s2, %s239_s23  }
  0x66   : > { %p5343_p9 = por %p253_p7, %p252_p6  ;;  %s5348_s18 = sshll.u32 %s5341_s21, 7 }
  0x67   : > { %6379 = sst [smem:[#allocation64_spill]] %s5335_s16  ;;  %s5351_s26 = sshll.u32 %s5061_s10, 7 }
  0x68   : > { %p5353_p10 = pnand %p4479_p8, %p248_p5  ;;  %s5358_s20 = sand.u32 1, %s5069_s15  }
  0x69   : > { %s1051_s23 = scalar_lea.hbm %s6369_s29, %s5351_s26  ;;  %s1046_s22 = scalar_lea.vmem [#allocation5], %s5348_s18 }
  0x6a   : > { %s1054_s16 = sshll.u32 %s1046_s22, 4  ;;  %s1052_s2 = sshll.u32 %s1051_s23, 4  ;;  %s1055_s16 = int_to_ptr.vmem [resolvable:$true] %s1054_s16  ;;  %s1053_s2 = int_to_ptr.hbm [resolvable:$true] %s1052_s2 }
  0x6b   : > { %p4336_p11 = scmp.ge.s32.totalorder %s5069_s15, 1  ;;  %s6296_s8 = scalar_lea.sflag [#allocation6], %s5358_s20 }
  0x6c   : > { %s4717_s4 = sshra.s32 %s1053_s2, 4  ;;  %p5367_p13 = pneg %p5353_p10  ;;  %s4718_s4 = int_to_ptr.hbm [resolvable:$true] %s4717_s4 }
  0x6d   : > { %s4719_s3 = scalar_lea.hbm %s4718_s4, 128  ;;  %s4724_s13 = scalar_lea.hbm %s6369_s29, 256 }
  0x6e   : > { %p4720_p12 = scmp.ne.s32.totalorder %s4718_s4, %s4719_s3  ;;  %p4725_p2 = scmp.lt.s32.totalorder %s4718_s4, %s6369_s29 }
  0x6f   : > { %p4726_p3 = scmp.lt.s32.totalorder %s4724_s13, %s4719_s3 }
  0x70   : > { %p4722_p0 = pnand %p5367_p13, %p4720_p12 }
  0x71   : > { %p4727_p4 = por %p4726_p3, %p4725_p2 }
  0x72   : > { %p4723_p1 = pneg %p4722_p0 }
  0x74   : > { %p4728_p5 = pnand %p4727_p4, %p4723_p1 }
  0x76   : > { %4731 = shalt.err (!%p4728_p5)
}
  0x77   : > { %s6302_s22 = smov 128   ;;  %s6304_s23 = smov 8  }
  0x78   : > { %4457 = dma.hbm_to_vmem [thread:$0]  (!%p5353_p10), %s1053_s2, 2048, %s1055_s16, %s6296_s8, %s6302_s22, %s6302_s22, %s6304_s23  }
  0x79   : > { %p1313_p6 = scmp.lt.s32.totalorder %s5069_s15, 5  ;;  %s1119_s13 = scalar_lea.hbm %s6368_s30, %s5351_s26 }
  0x7a   : > { %s1120_s4 = sshll.u32 %s1119_s13, 4  ;;  %s1114_s29 = scalar_lea.vmem [#allocation8], %s5348_s18  ;;  %s1121_s4 = int_to_ptr.hbm [resolvable:$true] %s1120_s4 }
  0x7b   : > { %p5387_p7 = pnand %p4336_p11, %p1313_p6  ;;  %s1122_s9 = sshll.u32 %s1114_s29, 4  ;;  %s1123_s9 = int_to_ptr.vmem [resolvable:$true] %s1122_s9 }
  0x7c   : > { %s6298_s5 = scalar_lea.sflag [#allocation9], %s5358_s20  ;;  %s4747_s7 = sshra.s32 %s1121_s4, 4  ;;  %s4748_s7 = int_to_ptr.hbm [resolvable:$true] %s4747_s7 }
  0x7d   : > { %s4749_s0 = scalar_lea.hbm %s4748_s7, 128  ;;  %s4754_s2 = scalar_lea.hbm %s6368_s30, 256 }
  0x7e   : > { %p4750_p8 = scmp.ne.s32.totalorder %s4748_s7, %s4749_s0  ;;  %p4755_p1 = scmp.lt.s32.totalorder %s4748_s7, %s6368_s30 }
  0x7f   : > { %p4756_p2 = scmp.lt.s32.totalorder %s4754_s2, %s4749_s0 }
  0x80   : > { %p4752_p12 = pnand %p4750_p8, %p5367_p13 }
  0x81   : > { %p4757_p11 = por %p4756_p2, %p4755_p1 }
  0x82   : > { %p4753_p0 = pneg %p4752_p12 }
  0x84   : > { %p4758_p3 = pnand %p4757_p11, %p4753_p0 }
  0x86   : > { %4761 = shalt.err (!%p4758_p3)
}
  0x87   : > { %4463 = dma.hbm_to_vmem [thread:$0]  (!%p5353_p10), %s1121_s4, 2048, %s1123_s9, %s6298_s5, %s6302_s22, %s6302_s22, %s6304_s23  }
  0x88   : > { %s1163_s29 = scalar_lea.hbm %s6367_s12, %s5351_s26  ;;  %s1158_s0 = scalar_lea.vmem [#allocation11], %s5348_s18 }
  0x89   : > { %s1164_s7 = sshll.u32 %s1163_s29, 4  ;;  %s1166_s16 = sshll.u32 %s1158_s0, 4  ;;  %s1165_s7 = int_to_ptr.hbm [resolvable:$true] %s1164_s7  ;;  %s1167_s16 = int_to_ptr.vmem [resolvable:$true] %s1166_s16 }
  0x8a   : > { %s6301_s13 = scalar_lea.sflag [#allocation12], %s5358_s20  ;;  %s4777_s2 = sshra.s32 %s1165_s7, 4  ;;  %s4778_s2 = int_to_ptr.hbm [resolvable:$true] %s4777_s2 }
  0x8b   : > { %s4779_s8 = scalar_lea.hbm %s4778_s2, 128  ;;  %s4784_s30 = scalar_lea.hbm %s6367_s12, 256 }
  0x8c   : > { %p4780_p4 = scmp.ne.s32.totalorder %s4778_s2, %s4779_s8  ;;  %p4785_p8 = scmp.lt.s32.totalorder %s4778_s2, %s6367_s12 }
  0x8d   : > { %p4786_p12 = scmp.lt.s32.totalorder %s4784_s30, %s4779_s8 }
  0x8e   : > { %p4782_p5 = pnand %p4780_p4, %p5367_p13 }
  0x8f   : > { %p4787_p0 = por %p4786_p12, %p4785_p8 }
  0x90   : > { %p4783_p6 = pneg %p4782_p5 }
  0x92   : > { %p4788_p1 = pnand %p4787_p0, %p4783_p6 }
  0x94   : > { %4791 = shalt.err (!%p4788_p1)
}
  0x95   : > { %4469 = dma.hbm_to_vmem [thread:$0]  (!%p5353_p10), %s1165_s7, 2048, %s1167_s16, %s6301_s13, %s6302_s22, %s6302_s22, %s6304_s23  }
  0x96   : > { %s4330_s9 = sshll.u32 %s5341_s21, 8  ;;  %s4428_s8 = sshll.u32 %s5061_s10, 8 }
  0x97   : > { %s1231_s30 = scalar_lea.hbm %s6366_s27, %s4428_s8  ;;  %s1226_s4 = scalar_lea.vmem [#allocation14], %s4330_s9 }
  0x98   : > { %s1234_s29 = sshll.u32 %s1226_s4, 4  ;;  %s1232_s0 = sshll.u32 %s1231_s30, 4  ;;  %s1235_s29 = int_to_ptr.vmem [resolvable:$true] %s1234_s29  ;;  %s1233_s0 = int_to_ptr.hbm [resolvable:$true] %s1232_s0 }
  0x99   : > { %s1223_s2 = scalar_lea.sflag [#allocation15], %s5358_s20  ;;  %s4807_s5 = sshra.s32 %s1233_s0, 4  ;;  %s4808_s5 = int_to_ptr.hbm [resolvable:$true] %s4807_s5 }
  0x9a   : > { %s4809_s12 = scalar_lea.hbm %s4808_s5, 256  ;;  %s4814_s15 = scalar_lea.hbm %s6366_s27, 512 }
  0x9b   : > { %p4810_p2 = scmp.ne.s32.totalorder %s4808_s5, %s4809_s12  ;;  %p4815_p4 = scmp.lt.s32.totalorder %s4808_s5, %s6366_s27 }
  0x9c   : > { %p4816_p5 = scmp.lt.s32.totalorder %s4814_s15, %s4809_s12 }
  0x9d   : > { %p4812_p11 = pnand %p4810_p2, %p5367_p13 }
  0x9e   : > { %p4817_p6 = por %p4816_p5, %p4815_p4 }
  0x9f   : > { %p4813_p3 = pneg %p4812_p11 }
  0xa1   : > { %p4818_p8 = pnand %p4817_p6, %p4813_p3 }
  0xa3   : > { %4821 = shalt.err (!%p4818_p8)
}
  0xa4   : > { %s5105_s7 = smov 256   ;;  %s5106_s16 = smov 16  }
  0xa5   : > { %4475 = dma.hbm_to_vmem [thread:$0]  (!%p5353_p10), %s1233_s0, 4096, %s1235_s29, %s1223_s2, %s5105_s7, %s5105_s7, %s5106_s16  }
  0xa6   : > { %s1260_s30 = scalar_lea.hbm %s6364_s14, %s4428_s8  ;;  %s1255_s4 = scalar_lea.vmem [#allocation16], %s4330_s9 }
  0xa7   : > { %s1263_s5 = sshll.u32 %s1255_s4, 4  ;;  %s1261_s12 = sshll.u32 %s1260_s30, 4  ;;  %s5432_s5 = int_to_ptr.vmem [resolvable:$true] %s1263_s5  ;;  %s5434_s12 = int_to_ptr.hbm [resolvable:$true] %s1261_s12 }
  0xa8   : > { %s1029_s15 = scalar_lea.hbm %s6361_s25, %s5351_s26  ;;  %s1024_s22 = scalar_lea.vmem [#allocation3], %s5348_s18 }
  0xa9   : > { %s1030_s13 = sshll.u32 %s1029_s15, 4  ;;  %s1032_s23 = sshll.u32 %s1024_s22, 4  ;;  %s1031_s13 = int_to_ptr.hbm [resolvable:$true] %s1030_s13  ;;  %s1033_s23 = int_to_ptr.vmem [resolvable:$true] %s1032_s23 }
  0xaa   : > { %s1021_s27 = scalar_lea.sflag [#allocation4], %s5341_s21  ;;  %s4837_s10 = sshra.s32 %s1031_s13, 4  ;;  %s4838_s10 = int_to_ptr.hbm [resolvable:$true] %s4837_s10 }
  0xab   : > { %s4839_s8 = scalar_lea.hbm %s4838_s10, 128  ;;  %s4844_s9 = scalar_lea.hbm %s6361_s25, 256 }
  0xac   : > { %p4840_p12 = scmp.ne.s32.totalorder %s4838_s10, %s4839_s8  ;;  %p4845_p2 = scmp.lt.s32.totalorder %s4838_s10, %s6361_s25 }
  0xad   : > { %p4846_p11 = scmp.lt.s32.totalorder %s4844_s9, %s4839_s8 }
  0xae   : > { %p4842_p0 = pnand %p4840_p12, %p5367_p13 }
  0xaf   : > { %p4847_p3 = por %p4846_p11, %p4845_p2 }
  0xb0   : > { %p4843_p1 = pneg %p4842_p0 }
  0xb2   : > { %p4848_p4 = pnand %p4847_p3, %p4843_p1 }
  0xb4   : > { %4851 = shalt.err (!%p4848_p4)
}
  0xb5   : > { %s6385_s29 = smov 8   ;;  %s6386_s22 = smov 128  }
  0xb6   : > { %4454 = dma.hbm_to_vmem [thread:$0]  (!%p5353_p10), %s1031_s13, 2048, %s1033_s23, %s1021_s27, %s6386_s22, %s6386_s22, %s6385_s29  }
  0xb7   : > { %s1091_s21 = scalar_lea.hbm %s6363_s19, %s5351_s26  ;;  %s1086_s7 = scalar_lea.vmem [#allocation7], %s5348_s18 }
  0xb8   : > { %s1092_s0 = sshll.u32 %s1091_s21, 4  ;;  %s1094_s10 = sshll.u32 %s1086_s7, 4  ;;  %s1093_s0 = int_to_ptr.hbm [resolvable:$true] %s1092_s0  ;;  %s1095_s10 = int_to_ptr.vmem [resolvable:$true] %s1094_s10 }
  0xb9   : > { %s4867_s16 = sshra.s32 %s1093_s0, 4  ;;  %s4874_s4 = scalar_lea.hbm %s6363_s19, 256  ;;  %s4868_s16 = int_to_ptr.hbm [resolvable:$true] %s4867_s16 }
  0xba   : > { %s4869_s30 = scalar_lea.hbm %s4868_s16, 128  ;;  %p4875_p12 = scmp.lt.s32.totalorder %s4868_s16, %s6363_s19 }
  0xbb   : > { %p4870_p5 = scmp.ne.s32.totalorder %s4868_s16, %s4869_s30  ;;  %p4876_p0 = scmp.lt.s32.totalorder %s4874_s4, %s4869_s30 }
  0xbd   : > { %p4872_p6 = pnand %p4870_p5, %p5367_p13  ;;  %p4877_p1 = por %p4876_p0, %p4875_p12 }
  0xbf   : > { %p4873_p8 = pneg %p4872_p6 }
  0xc1   : > { %p4878_p2 = pnand %p4877_p1, %p4873_p8 }
  0xc3   : > { %4881 = shalt.err (!%p4878_p2)
}
  0xc4   : > { %s6387_s27 = scalar_lea.sflag [#allocation6], %s5358_s20  ;;  %s1141_s23 = scalar_lea.hbm %s6365_s6, %s5351_s26 }
  0xc5   : > { %4460 = dma.hbm_to_vmem [thread:$0]  (!%p5353_p10), %s1093_s0, 2048, %s1095_s10, %s6387_s27, %s6386_s22, %s6386_s22, %s6385_s29  }
  0xc6   : > { %s1142_s13 = sshll.u32 %s1141_s23, 4  ;;  %s1136_s15 = scalar_lea.vmem [#allocation10], %s5348_s18  ;;  %s1143_s13 = int_to_ptr.hbm [resolvable:$true] %s1142_s13 }
  0xc7   : > { %s1144_s8 = sshll.u32 %s1136_s15, 4  ;;  %s4897_s9 = sshra.s32 %s1143_s13, 4  ;;  %s1145_s8 = int_to_ptr.vmem [resolvable:$true] %s1144_s8  ;;  %s4898_s9 = int_to_ptr.hbm [resolvable:$true] %s4897_s9 }
  0xc8   : > { %s4899_s21 = scalar_lea.hbm %s4898_s9, 128  ;;  %s4904_s7 = scalar_lea.hbm %s6365_s6, 256 }
  0xc9   : > { %p4900_p11 = scmp.ne.s32.totalorder %s4898_s9, %s4899_s21  ;;  %p4905_p5 = scmp.lt.s32.totalorder %s4898_s9, %s6365_s6 }
  0xca   : > { %p4906_p6 = scmp.lt.s32.totalorder %s4904_s7, %s4899_s21 }
  0xcb   : > { %p4902_p3 = pnand %p4900_p11, %p5367_p13 }
  0xcc   : > { %p4907_p8 = por %p4906_p6, %p4905_p5 }
  0xcd   : > { %p4903_p4 = pneg %p4902_p3 }
  0xcf   : > { %p4908_p12 = pnand %p4907_p8, %p4903_p4 }
  0xd1   : > { %4911 = shalt.err (!%p4908_p12)
}
  0xd2   : > { %s6388_s0 = scalar_lea.sflag [#allocation9], %s5358_s20  ;;  %s1203_s10 = scalar_lea.hbm %s6362_s24, %s5351_s26 }
  0xd3   : > { %4466 = dma.hbm_to_vmem [thread:$0]  (!%p5353_p10), %s1143_s13, 2048, %s1145_s8, %s6388_s0, %s6386_s22, %s6386_s22, %s6385_s29  }
  0xd4   : > { %s1204_s16 = sshll.u32 %s1203_s10, 4  ;;  %s1198_s30 = scalar_lea.vmem [#allocation13], %s5348_s18  ;;  %s1205_s16 = int_to_ptr.hbm [resolvable:$true] %s1204_s16 }
  0xd5   : > { %s1206_s4 = sshll.u32 %s1198_s30, 4  ;;  %s4927_s27 = sshra.s32 %s1205_s16, 4  ;;  %s1207_s4 = int_to_ptr.vmem [resolvable:$true] %s1206_s4  ;;  %s4928_s27 = int_to_ptr.hbm [resolvable:$true] %s4927_s27 }
  0xd6   : > { %s4929_s23 = scalar_lea.hbm %s4928_s27, 128  ;;  %s4934_s15 = scalar_lea.hbm %s6362_s24, 256 }
  0xd7   : > { %p4930_p0 = scmp.ne.s32.totalorder %s4928_s27, %s4929_s23  ;;  %p4935_p11 = scmp.lt.s32.totalorder %s4928_s27, %s6362_s24 }
  0xd8   : > { %p4936_p3 = scmp.lt.s32.totalorder %s4934_s15, %s4929_s23 }
  0xd9   : > { %p4932_p1 = pnand %p4930_p0, %p5367_p13 }
  0xda   : > { %p4937_p4 = por %p4936_p3, %p4935_p11 }
  0xdb   : > { %p4933_p2 = pneg %p4932_p1 }
  0xdd   : > { %p4938_p5 = pnand %p4937_p4, %p4933_p2 }
  0xdf   : > { %4941 = shalt.err (!%p4938_p5)
}
  0xe0   : > { %s6389_s18 = scalar_lea.sflag [#allocation12], %s5358_s20  ;;  %s4957_s26 = sshra.s32 %s5434_s12, 4  ;;  %s4958_s26 = int_to_ptr.hbm [resolvable:$true] %s4957_s26 }
  0xe1   : > { %4472 = dma.hbm_to_vmem [thread:$0]  (!%p5353_p10), %s1205_s16, 2048, %s1207_s4, %s6389_s18, %s6386_s22, %s6386_s22, %s6385_s29  }
  0xe2   : > { %s4959_s13 = scalar_lea.hbm %s4958_s26, 256  ;;  %s4964_s8 = scalar_lea.hbm %s6364_s14, 512 }
  0xe3   : > { %p4960_p6 = scmp.ne.s32.totalorder %s4958_s26, %s4959_s13  ;;  %p4965_p0 = scmp.lt.s32.totalorder %s4958_s26, %s6364_s14 }
  0xe4   : > { %p4966_p1 = scmp.lt.s32.totalorder %s4964_s8, %s4959_s13 }
  0xe5   : > { %p4962_p8 = pnand %p4960_p6, %p5367_p13 }
  0xe6   : > { %p4967_p2 = por %p4966_p1, %p4965_p0 }
  0xe7   : > { %p4963_p12 = pneg %p4962_p8 }
  0xe9   : > { %p4968_p11 = pnand %p4967_p2, %p4963_p12 }
  0xeb   : > { %4971 = shalt.err (!%p4968_p11)
}
  0xec   : > { %4478 = dma.hbm_to_vmem [thread:$0]  (!%p5353_p10), %s5434_s12, 4096, %s5432_s5, %s1223_s2, %s6386_s22, %s6386_s22, %s6385_s29  }
  0xed   : > { %1317 = sbr.rel (%p5387_p7) target bundleno = 3787 (0xecb), region = 148 }
  0xf2   : > { %s5508_s17 = sand.u32 1, %s5045_s1  }
  0xf3   : > { %s4337_s9 = sshll.u32 %s5508_s17, 7  ;;  %s1320_s21 = scalar_lea.sflag [#allocation4], %s5508_s17 }
  0xf4   : > { %s5512_s28 = scalar_lea.vmem [#allocation3], %s4337_s9 }
  0xf5   : > { %6390 = sst [smem:[#allocation65_spill]] %s5512_s28 }
  0xf6   : > { %5020 = dma.done.wait (%p5343_p9), %s1320_s21, 2048  }
  0xf7   : > { %5022 = vsyncadd (%p5343_p9), %s1320_s21, 4294965248  ;;  %s6391_s20 = sld [smem:[#allocation61_spill]]  ;;  %s5520_s12 = scalar_lea.vmem [#allocation5], %s4337_s9 }
  0xf8   : > { %6393 = sst [smem:[#allocation66_spill]] %s5520_s12 }
  0xfd   : > { %s6392_s2 = sadd.s32 4294967295, %s6391_s20  }
  0xfe   : > { %s1329_s3 = sand.u32 1, %s6392_s2  }
  0xff   : > { %s1330_s5 = scalar_lea.sflag [#allocation6], %s1329_s3 }
 0x100   : > { %5024 = dma.done.wait (%p5343_p9), %s1330_s5, 4096  }
 0x101   : > { %5026 = vsyncadd (%p5343_p9), %s1330_s5, 4294963200  ;;  %s5526_s29 = scalar_lea.vmem [#allocation7], %s4337_s9  ;;  %s1350_s22 = scalar_lea.sflag [#allocation9], %s1329_s3 }
 0x102   : > { %6394 = sst [smem:[#allocation67_spill]] %s5526_s29  ;;  %s5528_s7 = scalar_lea.vmem [#allocation8], %s4337_s9 }
 0x103   : > { %6395 = sst [smem:[#allocation68_spill]] %s5528_s7 }
 0x104   : > { %5028 = dma.done.wait (%p5343_p9), %s1350_s22, 4096  }
 0x105   : > { %5030 = vsyncadd (%p5343_p9), %s1350_s22, 4294963200  ;;  %s5534_s0 = scalar_lea.vmem [#allocation10], %s4337_s9  ;;  %s1370_s10 = scalar_lea.sflag [#allocation12], %s1329_s3 }
 0x106   : > { %6396 = sst [smem:[#allocation69_spill]] %s5534_s0  ;;  %s5536_s16 = scalar_lea.vmem [#allocation11], %s4337_s9 }
 0x107   : > { %6397 = sst [smem:[#allocation70_spill]] %s5536_s16 }
 0x108   : > { %5032 = dma.done.wait (%p5343_p9), %s1370_s10, 4096  }
 0x109   : > { %5034 = vsyncadd (%p5343_p9), %s1370_s10, 4294963200  ;;  %s6308_s30 = sshll.u32 %s5508_s17, 8  ;;  %s5543_s4 = scalar_lea.vmem [#allocation13], %s4337_s9 }
 0x10a   : > { %6398 = sst [smem:[#allocation71_spill]] %s5543_s4  ;;  %s1390_s27 = scalar_lea.sflag [#allocation15], %s1329_s3 }
 0x10b   : > { %s5547_s23 = scalar_lea.vmem [#allocation14], %s6308_s30 }
 0x10c   : > { %6399 = sst [smem:[#allocation72_spill]] %s5547_s23 }
 0x10d   : > { %5036 = dma.done.wait (%p5343_p9), %s1390_s27, 8192  }
 0x10e   : > { %5038 = vsyncadd (%p5343_p9), %s1390_s27, 4294959104  ;;  %s6400_s15 = sld [smem:[#allocation58_spill]]  ;;  %s6428_s10 = sshll.u32 %s5508_s17, 8 }
 0x10f   : > { %s6401_s18 = sld [smem:[#allocation57_spill]] }
 0x110   : > { %s6402_s26 = sld [smem:[#allocation22_spill]] }
 0x111   : > { %s6403_s13 = sld [smem:[#allocation23_spill]] }
 0x112   : > { %s6404_s8 = sld [smem:[#allocation24_spill]] }
 0x113   : > { %s6405_s21 = sld [smem:[#allocation25_spill]] }
 0x114   : > { %s6407_s2 = sld [smem:[#allocation26_spill]]  ;;  %s4346_s3 = sshll.u32 %s6400_s15, 1 }
 0x115   : > { %p1602_p10 = scmp.lt.s32.totalorder %s4346_s3, 3  ;;  %p1627_p13 = scmp.lt.s32.totalorder %s6401_s18, 1 }
 0x116   : > { %s6413_s11 = sld [smem:[#allocation39_spill]] }
 0x117   : > { %s6487_s3 = smov (!%p1602_p10, %s4346_s3), 3  ;;  %s6414_s6 = sld [smem:[#allocation41_spill]] }
 0x118   : > { %s5556_s27 = scalar_select %p1627_p13, %s6401_s18, 1 }
 0x119   : > { %s4347_s15 = sshll.u32 %s6487_s3, 3  ;;  %s4430_s14 = sshll.u32 %s6487_s3, 4 }
 0x11a   : > { %s6415_s19 = sld [smem:[#allocation45_spill]]  ;;  %s1605_s24 = scalar_lea.vmem %s6402_s26, %s4347_s15 }
 0x11b   : > { %s6416_s25 = sld [smem:[#allocation43_spill]]  ;;  %s5560_s1 = scalar_lea.vmem %s6403_s13, %s4430_s14 }
 0x11c   : > { %6417 = sst [smem:[#allocation73_spill]] %s5560_s1  ;;  %s5563_s4 = scalar_lea.vmem %s6404_s8, %s4430_s14 }
 0x11d   : > { %s6418_s23 = sld [smem:[#allocation46_spill]]  ;;  %s5566_s16 = scalar_lea.vmem %s6405_s21, %s4347_s15 }
 0x11e   : > { %6419 = sst [smem:[#allocation74_spill]] %s5563_s4  ;;  %s4432_s0 = sshll.u32 %s5556_s27, 7 }
 0x11f   : > { %6420 = sst [smem:[#allocation75_spill]] %s5566_s16  ;;  %s5572_s3 = scalar_lea.vmem %s6407_s2, %s4432_s0 }
 0x120   : > { %s6421_s7 = sld [smem:[#allocation47_spill]]  ;;  %s1652_s16 = scalar_lea.vmem %s6413_s11, %s5556_s27 }
 0x121   : > { %s6422_s29 = sld [smem:[#allocation48_spill]]  ;;  %s1655_s20 = scalar_lea.vmem %s6414_s6, %s5556_s27 }
 0x122   : > { %6423 = sst [smem:[#allocation76_spill]] %s5572_s3  ;;  %s4358_s28 = sshll.u32 %s5556_s27, 1 }
 0x123   : > { %s6424_s12 = sld [smem:[#allocation49_spill]]  ;;  %s1662_s0 = scalar_lea.vmem %s6415_s19, %s5556_s27 }
 0x124   : > { %s6425_s13 = sld [smem:[#allocation50_spill]]  ;;  %s5592_s2 = scalar_lea.vmem %s6416_s25, %s4358_s28 }
 0x125   : > { %s6426_s18 = sld [smem:[#allocation51_spill]]  ;;  %s1665_s3 = scalar_lea.vmem %s6418_s23, %s5556_s27 }
 0x126   : > { %s6427_s14 = sld [smem:[#allocation54_spill]]  ;;  %s1668_s9 = scalar_lea.vmem %s6421_s7, %s5556_s27 }
 0x127   : > { %s1671_s26 = scalar_lea.vmem %s6422_s29, %s5556_s27  ;;  %s5611_s21 = scalar_lea.vmem [#allocation16], %s6428_s10 }
 0x128   : > { %s6429_s4 = sld [smem:[#allocation57_spill]] }
 0x129   : > { %s1674_s1 = scalar_lea.vmem %s6424_s12, %s5556_s27 }
 0x12a   : > { %s1677_s5 = scalar_lea.vmem %s6425_s13, %s5556_s27 }
 0x12b   : > { %s1680_s8 = scalar_lea.vmem %s6426_s18, %s5556_s27 }
 0x12c   : > { %s5607_s22 = scalar_lea.vmem %s6427_s14, %s4347_s15 }
 0x12e   : > { %p4361_p9 = scmp.ne.s32.totalorder %s6429_s4, 0 }
 0x130   : > { %1690 = sbr.rel (%p4361_p9) target bundleno = 312 (0x138), region = 188 }
 0x135   : > { %v1691_v0 = vld [vmem:[%s1605_s24] sm:$0xff]  ;;  %v1692_v1 = vld [vmem:[%s1605_s24 + $0x8] sm:$0xff] }
 0x136   : > { %1693 = vst [vmem:[#allocation2] sm:$0xff] %v1691_v0 }
 0x137   : > { %1694 = vst [vmem:[#allocation2 + $0x8] sm:$0xff] %v1692_v1 }
 0x138 PF: > { %s6430_s25 = sld [smem:[#allocation66_spill]]  ;;  %v5107_v4 = vmov 128.0   ;;  %vm1945_vm7 = vcmask 261120   ;;  %s5108_s4 = smov 96   ;;  %vm2138_vm8 = vcmask 64512  }
 0x139   : > { %s6431_s19 = sld [smem:[#allocation76_spill]]  ;;  %4629 = vrcp.f32 %v5107_v4  ;;  %s5109_s23 = smov 64  }
 0x13a   : > { %s6432_s6 = sld [smem:[#allocation65_spill]]  ;;  %s5110_s18 = smov 32  }
 0x13b   : > { %s6435_s28 = sld [smem:[#allocation75_spill]] }
 0x13c   : > { %s6436_s12 = sld [smem:[#allocation30_spill]] }
 0x13d   : > { %v1695_v2 = vld [vmem:[#allocation2] sm:$0xff]  ;;  %s6437_s29 = sld [smem:[#allocation29_spill]] }
 0x13e   : > { %1709 = vadd.xlane.f32.xlu0 %v1695_v2  ;;  %v1696_v3 = vld [vmem:[#allocation2 + $0x8] sm:$0xff]  ;;  %v1869_v7 = vld [vmem:[%s6430_s25 + $0x78] sm:$0xff]  ;;  %v1868_v10 = vld [vmem:[%s6430_s25 + $0x70] sm:$0xff]  ;;  %s6440_s11 = sld [smem:[#allocation31_spill]] }
 0x13f   : > { %v4630_v5 = vpop.eup %4629  ;;  %v1783_v8 = vld [vmem:[%s6431_s19 + $0x78] sm:$0xff]  ;;  %1874 = vmatpush.msra.mxu2 %v1869_v7  ;;  %v1782_v23 = vld [vmem:[%s6431_s19 + $0x70] sm:$0xff]  ;;  %v1867_v25 = vld [vmem:[%s6430_s25 + $0x68] sm:$0xff]  ;;  %s6447_s13 = sld [smem:[#allocation33_spill]] }
 0x140   : > { %v1714_v6 = vmul.f32 128.0, %v4630_v5  ;;  %v1826_v9 = vld [vmem:[%s6432_s6 + $0x78] sm:$0xff]  ;;  %1788 = vmatpush.msra.mxu0 %v1783_v8  ;;  %vm1718_vm0 = vweird.f32 %v4630_v5  ;;  %v1825_v24 = vld [vmem:[%s6432_s6 + $0x70] sm:$0xff]  ;;  %v1781_v26 = vld [vmem:[%s6431_s19 + $0x68] sm:$0xff]  ;;  %s6448_s14 = sld [smem:[#allocation69_spill]] }
 0x141   : > { %1831 = vmatpush.msra.mxu1 %v1826_v9  ;;  %1875 = vmatpush.msra.mxu2 %v1868_v10  ;;  %v1824_v27 = vld [vmem:[%s6432_s6 + $0x68] sm:$0xff]  ;;  %v1866_v28 = vld [vmem:[%s6430_s25 + $0x60] sm:$0xff]  ;;  %v1865_v31 = vld [vmem:[%s6430_s25 + $0x58] sm:$0xff]  ;;  %s6450_s10 = sld [smem:[#allocation68_spill]] }
 0x142   : > { %v1715_v11 = vsub.f32 1.0, %v1714_v6  ;;  %1789 = vmatpush.msra.mxu0 %v1782_v23  ;;  %v1780_v29 = vld [vmem:[%s6431_s19 + $0x60] sm:$0xff]  ;;  %v1779_v32 = vld [vmem:[%s6431_s19 + $0x58] sm:$0xff]  ;;  %v1864_v34 = vld [vmem:[%s6430_s25 + $0x50] sm:$0xff]  ;;  %s6438_s7 = scalar_lea.vmem %s6436_s12, %s5556_s27  ;;  %s6459_s12 = sld [smem:[#allocation73_spill]] }
 0x143   : > { %1832 = vmatpush.msra.mxu1 %v1825_v24  ;;  %1876 = vmatpush.msra.mxu2 %v1867_v25  ;;  %v1823_v30 = vld [vmem:[%s6432_s6 + $0x60] sm:$0xff]  ;;  %v1822_v33 = vld [vmem:[%s6432_s6 + $0x58] sm:$0xff]  ;;  %v1778_v35 = vld [vmem:[%s6431_s19 + $0x50] sm:$0xff]  ;;  %s6439_s30 = scalar_lea.vmem %s6437_s29, %s5556_s27 }
 0x144   : > { %v1716_v12 = vmul.f32 %v4630_v5, %v1715_v11  ;;  %1790 = vmatpush.msra.mxu0 %v1781_v26  ;;  %v1821_v36 = vld [vmem:[%s6432_s6 + $0x50] sm:$0xff]  ;;  %v1863_v37 = vld [vmem:[%s6430_s25 + $0x48] sm:$0xff]  ;;  %v1862_v40 = vld [vmem:[%s6430_s25 + $0x40] sm:$0xff]  ;;  %s6441_s15 = scalar_lea.vmem %s6440_s11, %s5556_s27 }
 0x145   : > { %1833 = vmatpush.msra.mxu1 %v1824_v27  ;;  %1877 = vmatpush.msra.mxu2 %v1866_v28  ;;  %v1777_v38 = vld [vmem:[%s6431_s19 + $0x48] sm:$0xff]  ;;  %v1776_v41 = vld [vmem:[%s6431_s19 + $0x40] sm:$0xff]  ;;  %v1861_v43 = vld [vmem:[%s6430_s25 + $0x38] sm:$0xff] }
 0x146   : > { %1711 = vadd.xlane.f32.xlu0 %v1696_v3  ;;  %v1717_v13 = vadd.f32 %v4630_v5, %v1716_v12  ;;  %1791 = vmatpush.msra.mxu0 %v1780_v29  ;;  %v1820_v39 = vld [vmem:[%s6432_s6 + $0x48] sm:$0xff]  ;;  %v1819_v42 = vld [vmem:[%s6432_s6 + $0x40] sm:$0xff]  ;;  %v1775_v44 = vld [vmem:[%s6431_s19 + $0x38] sm:$0xff] }
 0x147   : > { %1834 = vmatpush.msra.mxu1 %v1823_v30  ;;  %1878 = vmatpush.msra.mxu2 %v1865_v31  ;;  %v1818_v45 = vld [vmem:[%s6432_s6 + $0x38] sm:$0xff]  ;;  %v1860_v46 = vld [vmem:[%s6430_s25 + $0x30] sm:$0xff]  ;;  %v1859_v49 = vld [vmem:[%s6430_s25 + $0x28] sm:$0xff] }
 0x148   : > { %v5618_v14 = vsel %vm1718_vm0, %v4630_v5, %v1717_v13  ;;  %1792 = vmatpush.msra.mxu0 %v1779_v32  ;;  %v1774_v47 = vld [vmem:[%s6431_s19 + $0x30] sm:$0xff]  ;;  %v1773_v50 = vld [vmem:[%s6431_s19 + $0x28] sm:$0xff]  ;;  %v1858_v52 = vld [vmem:[%s6430_s25 + $0x20] sm:$0xff] }
 0x149   : > { %1835 = vmatpush.msra.mxu1 %v1822_v33  ;;  %1879 = vmatpush.msra.mxu2 %v1864_v34  ;;  %v1817_v48 = vld [vmem:[%s6432_s6 + $0x30] sm:$0xff]  ;;  %v1816_v51 = vld [vmem:[%s6432_s6 + $0x28] sm:$0xff]  ;;  %v1772_v53 = vld [vmem:[%s6431_s19 + $0x20] sm:$0xff] }
 0x14a   : > { %1793 = vmatpush.msra.mxu0 %v1778_v35  ;;  %v1815_v54 = vld [vmem:[%s6432_s6 + $0x20] sm:$0xff]  ;;  %v1857_v55 = vld [vmem:[%s6430_s25 + $0x18] sm:$0xff]  ;;  %v1856_v58 = vld [vmem:[%s6430_s25 + $0x10] sm:$0xff] }
 0x14b   : > { %1836 = vmatpush.msra.mxu1 %v1821_v36  ;;  %1880 = vmatpush.msra.mxu2 %v1863_v37  ;;  %v1771_v56 = vld [vmem:[%s6431_s19 + $0x18] sm:$0xff]  ;;  %v1770_v59 = vld [vmem:[%s6431_s19 + $0x10] sm:$0xff]  ;;  %v1855_v61 = vld [vmem:[%s6430_s25 + $0x8] sm:$0xff] }
 0x14c   : > { %1794 = vmatpush.msra.mxu0 %v1777_v38  ;;  %v1814_v57 = vld [vmem:[%s6432_s6 + $0x18] sm:$0xff]  ;;  %v1813_v60 = vld [vmem:[%s6432_s6 + $0x10] sm:$0xff]  ;;  %v1769_v62 = vld [vmem:[%s6431_s19 + $0x8] sm:$0xff] }
 0x14d   : > { %1837 = vmatpush.msra.mxu1 %v1820_v39  ;;  %1881 = vmatpush.msra.mxu2 %v1862_v40  ;;  %v1812_v63 = vld [vmem:[%s6432_s6 + $0x8] sm:$0xff]  ;;  %v1854_v0 = vld [vmem:[%s6430_s25] sm:$0xff]  ;;  %s6451_s25 = sld [smem:[#allocation74_spill]] }
 0x14e   : > { %1795 = vmatpush.msra.mxu0 %v1776_v41  ;;  %v1768_v1 = vld [vmem:[%s6431_s19] sm:$0xff]  ;;  %v1698_v34 = vld [vmem:[%s6435_s28 + $0x8] sm:$0xff]  ;;  %s6452_s19 = sld [smem:[#allocation38_spill]] }
 0x14f   : > { %1838 = vmatpush.msra.mxu1 %v1819_v42  ;;  %1882 = vmatpush.msra.mxu2 %v1861_v43  ;;  %v4615_v24 = vld [vmem:[%s1668_s9] ss:$0 sm:$0xff]  ;;  %s6449_s9 = scalar_lea.vmem %s6447_s13, %s5556_s27 }
 0x150   : > { %1796 = vmatpush.msra.mxu0 %v1775_v44  ;;  %v1697_v28 = vld [vmem:[%s6435_s28] sm:$0xff] }
 0x151   : > { %1839 = vmatpush.msra.mxu1 %v1818_v45  ;;  %1883 = vmatpush.msra.mxu2 %v1860_v46  ;;  %v4617_v37 = vld [vmem:[%s6438_s7] ss:$0 sm:$0xff] }
 0x152   : > { %1797 = vmatpush.msra.mxu0 %v1774_v47  ;;  %v4616_v38 = vld [vmem:[%s6439_s30] ss:$0 sm:$0xff]  ;;  %s6465_s30 = sld [smem:[#allocation72_spill]] }
 0x153   : > { %1840 = vmatpush.msra.mxu1 %v1817_v48  ;;  %1884 = vmatpush.msra.mxu2 %v1859_v49 }
 0x154   : > { %1798 = vmatpush.msra.mxu0 %v1773_v50  ;;  %s6454_s24 = scalar_lea.vmem %s6452_s19, %s5556_s27 }
 0x155   : > { %1841 = vmatpush.msra.mxu1 %v1816_v51  ;;  %1885 = vmatpush.msra.mxu2 %v1858_v52 }
 0x156   : > { %1799 = vmatpush.msra.mxu0 %v1772_v53 }
 0x157   : > { %1842 = vmatpush.msra.mxu1 %v1815_v54  ;;  %1886 = vmatpush.msra.mxu2 %v1857_v55  ;;  %v4618_v54 = vld [vmem:[%s6441_s15] ss:$0 sm:$0xff] }
 0x158   : > { %1800 = vmatpush.msra.mxu0 %v1771_v56 }
 0x159   : > { %1843 = vmatpush.msra.mxu1 %v1814_v57  ;;  %1887 = vmatpush.msra.mxu2 %v1856_v58 }
 0x15a   : > { %1801 = vmatpush.msra.mxu0 %v1770_v59 }
 0x15b   : > { %1844 = vmatpush.msra.mxu1 %v1813_v60  ;;  %1888 = vmatpush.msra.mxu2 %v1855_v61 }
 0x15c   : > { %1802 = vmatpush.msra.mxu0 %v1769_v62 }
 0x15d   : > { %1845 = vmatpush.msra.mxu1 %v1812_v63  ;;  %1889 = vmatpush.msra.mxu2 %v1854_v0 }
 0x15e   : > { %1803 = vmatpush.msra.mxu0 %v1768_v1 }
 0x1b1   : > { %v1710_v15 = vpop.xlane.xlu0 %1709 }
 0x1b2   : > { %v1720_v16 = vmul.f32 %v5618_v14, %v1710_v15 }
 0x1b4   : > { %v5621_v17 = vsub.f32 %v1695_v2, %v1720_v16  ;;  %v1811_v2 = vld [vmem:[%s6432_s6] sm:$0xff] }
 0x1b5   : > { %1846 = vmatpush.msra.mxu1 %v1811_v2 }
 0x1b6   : > { %v1724_v18 = vmul.f32 %v5621_v17, %v5621_v17 }
 0x1b8   : > { %1726 = vadd.xlane.f32.xlu1 %v1724_v18 }
 0x1b9   : > { %v1712_v19 = vpop.xlane.xlu0 %1711 }
 0x1ba   : > { %v1721_v20 = vmul.f32 %v5618_v14, %v1712_v19  ;;  %v4614_v19 = vld [vmem:[%s1665_s3] ss:$0 sm:$0xff]  ;;  %s6446_s3 = sld [smem:[#allocation67_spill]] }
 0x1bc   : > { %v5626_v21 = vsub.f32 %v1696_v3, %v1721_v20 }
 0x1be   : > { %v1725_v22 = vmul.f32 %v5626_v21, %v5626_v21 }
 0x1c0   : > { %1728 = vadd.xlane.f32.xlu1 %v1725_v22 }
 0x22b   : > { %v1727_v3 = vpop.xlane.xlu1 %1726 }
 0x22c   : > { %v1730_v4 = vmul.f32 %v1727_v3, %v5618_v14 }
 0x22e   : > { %v1732_v5 = vadd.f32 1e-05, %v1730_v4 }
 0x230   : > { %4631 = vrsqrt.f32 %v1732_v5  ;;  %vm1740_vm2 = vweird.f32 %v1732_v5 }
 0x233   : > { %v1729_v6 = vpop.xlane.xlu1 %1728 }
 0x234   : > { %v1731_v7 = vmul.f32 %v1729_v6, %v5618_v14 }
 0x236   : > { %v4632_v8 = vpop.eup %4631  ;;  %v1733_v9 = vadd.f32 1e-05, %v1731_v7 }
 0x237   : > { %v1735_v10 = vmul.f32 %v4632_v8, %v1732_v5  ;;  %vm1741_vm1 = vweird.f32 %v4632_v8 }
 0x238   : > { %4633 = vrsqrt.f32 %v1733_v9  ;;  %vm1742_vm3 = vmor %vm1740_vm2, %vm1741_vm1  ;;  %vm1750_vm5 = vweird.f32 %v1733_v9 }
 0x239   : > { %v1736_v11 = vmul.f32 %v4632_v8, %v1735_v10 }
 0x23b   : > { %v1737_v12 = vmul.f32 0.5, %v1736_v11 }
 0x23d   : > { %v1738_v13 = vsub.f32 1.5, %v1737_v12 }
 0x23e   : > { %v4634_v15 = vpop.eup %4633 }
 0x23f   : > { %v1739_v16 = vmul.f32 %v4632_v8, %v1738_v13  ;;  %v1745_v18 = vmul.f32 %v4634_v15, %v1733_v9  ;;  %vm1751_vm4 = vweird.f32 %v4634_v15 }
 0x240   : > { %vm1752_vm6 = vmor %vm1750_vm5, %vm1751_vm4 }
 0x241   : > { %v1746_v20 = vmul.f32 %v4634_v15, %v1745_v18  ;;  %v1743_v22 = vsel %vm1742_vm3, %v4632_v8, %v1739_v16 }
 0x242   : > { %v1754_v23 = vmul.f32 %v1743_v22, %v5621_v17 }
 0x243   : > { %v1747_v25 = vmul.f32 0.5, %v1746_v20 }
 0x244   : > { %v1759_v26 = vmul.f32 %v4614_v19, %v1754_v23 }
 0x245   : > { %v1748_v27 = vsub.f32 1.5, %v1747_v25 }
 0x246   : > { %v1764_v29 = vadd.f32 %v4615_v24, %v1759_v26 }
 0x247   : > { %v1749_v30 = vmul.f32 %v4634_v15, %v1748_v27 }
 0x248   : > { %1890 = vmatmul.f32.vlgmr.msra.gmra.mxu2 %v1764_v29  ;;  %v1766_v31 = vadd.f32 %v1764_v29, %v1697_v28 }
 0x249   : > { %v1753_v32 = vsel %vm1752_vm6, %v4634_v15, %v1749_v30 }
 0x24a   : > { %1804 = vmatmul.f32.vlgmr.msra.gmra.mxu0 %v1766_v31  ;;  %1847 = vmatmul.f32.vlgmr.msra.gmra.mxu1 %v1766_v31  ;;  %v1755_v17 = vmul.f32 %v1753_v32, %v5626_v21 }
 0x24c   : > { %v1760_v33 = vmul.f32 %v4614_v19, %v1755_v17 }
 0x24e   : > { %v1765_v35 = vadd.f32 %v4615_v24, %v1760_v33 }
 0x250   : > { %1893 = vmatmul.f32.gmra.mxu2 %v1765_v35  ;;  %v1767_v36 = vadd.f32 %v1765_v35, %v1698_v34 }
 0x252   : > { %1807 = vmatmul.f32.gmra.mxu0 %v1767_v36  ;;  %1850 = vmatmul.f32.gmra.mxu1 %v1767_v36 }
 0x2c7   : > { %v1805_v39 = vpop.f32.mrf.mxu0  ;;  %v1848_v40 = vpop.f32.mrf.mxu1 }
 0x2c8   : > { %v1849_v41 = vadd.f32 %v4617_v37, %v1848_v40  ;;  %v1806_v21 = vadd.f32 %v4616_v38, %v1805_v39 }
 0x2ca   : > { %1913 = vrot.lane.b32.xlu2 %v1849_v41, %s5108_s4  ;;  %4362 = vmatpush.xpose.msk.msra.mxu3 %vm1945_vm7, %v1849_v41 }
 0x2cb   : > { %v1891_v53 = vpop.f32.mrf.mxu2 }
 0x2cc   : > { %v5718_v57 = vadd.f32 %v4618_v54, %v1891_v53 }
 0x2cd   : > { %4363 = vmatmul.msk.f32.vlgmr.msra.gmra.mxu3 %vm1945_vm7, %v1806_v21 }
 0x2cf   : > { %v1808_v42 = vpop.f32.mrf.mxu0  ;;  %v1851_v43 = vpop.f32.mrf.mxu1 }
 0x2d0   : > { %v1809_v44 = vadd.f32 %v4616_v38, %v1808_v42  ;;  %v1852_v45 = vadd.f32 %v4617_v37, %v1851_v43 }
 0x2d2   : > { %1899 = vrot.lane.b32.xlu2 %v1806_v21, %s5108_s4  ;;  %1915 = vrot.lane.b32.xlu0 %v1852_v45, %s5108_s4 }
 0x2d3   : > { %4364 = vmatpush.xpose.msk.msrb.mxu3 %vm1945_vm7, %v1852_v45  ;;  %1901 = vrot.lane.b32.xlu1 %v1809_v44, %s5108_s4  ;;  %v1894_v61 = vpop.f32.mrf.mxu2 }
 0x2d4   : > { %v5725_v63 = vadd.f32 %v4618_v54, %v1894_v61 }
 0x2d6   : > { %4365 = vmatmul.msk.f32.vlgmr.msrb.gmra.mxu3 %vm1945_vm7, %v1809_v44 }
 0x2da   : > { %1917 = vrot.lane.b32.xlu2 %v1849_v41, %s5109_s23  ;;  %1905 = vrot.lane.b32.xlu0 %v1809_v44, %s5109_s23 }
 0x2db   : > { %1907 = vrot.lane.b32.xlu1 %v1806_v21, %s5110_s18 }
 0x2e2   : > { %1903 = vrot.lane.b32.xlu2 %v1806_v21, %s5109_s23  ;;  %1923 = vrot.lane.b32.xlu0 %v1852_v45, %s5110_s18 }
 0x2ea   : > { %1919 = vrot.lane.b32.xlu2 %v1852_v45, %s5109_s23 }
 0x2f2   : > { %1921 = vrot.lane.b32.xlu2 %v1849_v41, %s5110_s18 }
 0x2fa   : > { %1909 = vrot.lane.b32.xlu2 %v1809_v44, %s5110_s18 }
 0x324   : > { %v1914_v46 = vpop.permute.xlu2 %1913 }
 0x325   : > { %4366 = vmatpush.xpose.msk.msra.mxu3 %vm1945_vm7, %v1914_v46 }
 0x32c   : > { %v1900_v47 = vpop.permute.xlu2 %1899 }
 0x32d   : > { %4367 = vmatmul.msk.f32.vlgmr.msra.gmra.mxu3 %vm1945_vm7, %v1900_v47 }
 0x334   : > { %v1918_v48 = vpop.permute.xlu2 %1917 }
 0x33c   : > { %v1904_v49 = vpop.permute.xlu2 %1903 }
 0x344   : > { %v1920_v50 = vpop.permute.xlu2 %1919  ;;  %v1916_v51 = vpop.permute.xlu0 %1915 }
 0x345   : > { %v1902_v52 = vpop.permute.xlu1 %1901  ;;  %4368 = vmatpush.xpose.msk.msrb.mxu3 %vm1945_vm7, %v1916_v51 }
 0x348   : > { %4369 = vmatmul.msk.f32.vlgmr.msrb.gmra.mxu3 %vm1945_vm7, %v1902_v52 }
 0x349   : > { %4370 = vmatpush.xpose.msk.msra.mxu3 %vm1945_vm7, %v1918_v48 }
 0x34c   : > { %v1922_v55 = vpop.permute.xlu2 %1921  ;;  %v1906_v56 = vpop.permute.xlu0 %1905 }
 0x34d   : > { %4372 = vmatpush.xpose.msk.msrb.mxu3 %vm1945_vm7, %v1920_v50  ;;  %4374 = vmatpush.xpose.msk.msrb.mxu0 %vm1945_vm7, %v1922_v55  ;;  %v1908_v58 = vpop.permute.xlu1 %1907 }
 0x350   : > { %v1967_v59 = vpop.f32.mrf.mxu3  ;;  %4371 = vmatmul.msk.f32.vlgmr.msra.gmra.mxu3 %vm1945_vm7, %v1904_v49  ;;  %4375 = vmatmul.msk.f32.vlgmr.msrb.gmra.mxu0 %vm1945_vm7, %v1908_v58 }
 0x351   : > { %2349 = vmatpush.msra.mxu3 %v5718_v57  ;;  %v2139_v60 = vsel %vm2138_vm8, %v1967_v59, -inf }
 0x352   : > { %2140 = vmax.xlane.f32.xlu0 %v2139_v60 }
 0x354   : > { %v1924_v62 = vpop.permute.xlu0 %1923  ;;  %v1910_v0 = vpop.permute.xlu2 %1909 }
 0x355   : > { %4376 = vmatpush.xpose.msk.msrb.mxu1 %vm1945_vm7, %v1924_v62 }
 0x358   : > { %4373 = vmatmul.msk.f32.vlgmr.msrb.gmra.mxu3 %vm1945_vm7, %v1906_v56  ;;  %4377 = vmatmul.msk.f32.vlgmr.msrb.gmra.mxu1 %vm1945_vm7, %v1910_v0 }
 0x359   : > { %v1991_v1 = vpop.f32.mrf.mxu3  ;;  %2372 = vmatpush.msrb.mxu3 %v5725_v63 }
 0x35a   : > { %v2142_v2 = vsel %vm2138_vm8, %v1991_v1, -inf }
 0x35b   : > { %2143 = vmax.xlane.f32.xlu1 %v2142_v2 }
 0x3b0   : > { %v2015_v3 = vpop.f32.mrf.mxu3 }
 0x3b1   : > { %v2145_v4 = vsel %vm2138_vm8, %v2015_v3, -inf }
 0x3b2   : > { %2146 = vmax.xlane.f32.xlu1 %v2145_v4 }
 0x3c5   : > { %v2141_v5 = vpop.xlane.xlu0 %2140 }
 0x3c6   : > { %v2163_v6 = vsub.f32 %v1967_v59, %v2141_v5 }
 0x3c8   : > { %v2171_v7 = vmul.f32 1.442695, %v2163_v6 }
 0x3ca   : > { %4635 = vpow2.f32 %v2171_v7 }
 0x3cb   : > { %v5732_v8 = vpop.f32.mrf.mxu3 }
 0x3cc   : > { %v2148_v26 = vsel %vm2138_vm8, %v5732_v8, -inf }
 0x3cd   : > { %v2111_v9 = vpop.f32.mrf.mxu0 }
 0x3ce   : > { %v2144_v10 = vpop.xlane.xlu1 %2143  ;;  %v2157_v11 = vsel %vm2138_vm8, %v2111_v9, -inf }
 0x3cf   : > { %v2164_v12 = vsub.f32 %v1991_v1, %v2144_v10  ;;  %2158 = vmax.xlane.f32.xlu2 %v2157_v11 }
 0x3d0   : > { %v5735_v13 = vpop.eup %4635 }
 0x3d1   : > { %v2173_v15 = vmul.f32 1.442695, %v2164_v12  ;;  %v2187_v16 = vsel %vm2138_vm8, %v5735_v13, 0.0 }
 0x3d2   : > { %2188 = vadd.xlane.f32.xlu1 %v2187_v16 }
 0x3d3   : > { %v2063_v18 = vpop.f32.mrf.mxu3  ;;  %4637 = vpow2.f32 %v2173_v15 }
 0x3d4   : > { %v2151_v22 = vsel %vm2138_vm8, %v2063_v18, -inf }
 0x3d5   : > { %v2135_v19 = vpop.f32.mrf.mxu1 }
 0x3d6   : > { %v2160_v20 = vsel %vm2138_vm8, %v2135_v19, -inf }
 0x3d7   : > { %2161 = vmax.xlane.f32.xlu0 %v2160_v20  ;;  %2152 = vmax.xlane.f32.xlu2 %v2151_v22 }
 0x3d9   : > { %v5741_v23 = vpop.eup %4637 }
 0x3da   : > { %v2190_v27 = vsel %vm2138_vm8, %v5741_v23, 0.0 }
 0x3db   : > { %v2087_v24 = vpop.f32.mrf.mxu3 }
 0x3dc   : > { %v2154_v25 = vsel %vm2138_vm8, %v2087_v24, -inf }
 0x3dd   : > { %2155 = vmax.xlane.f32.xlu1 %v2154_v25 }
 0x3df   : > { %2149 = vmax.xlane.f32.xlu0 %v2148_v26  ;;  %2191 = vadd.xlane.f32.xlu2 %v2190_v27 }
 0x3f3   : > { %1929 = vrot.lane.b32.xlu0 %v5725_v63, %s5108_s4 }
 0x3f6   : > { %1927 = vrot.lane.b32.xlu1 %v5718_v57, %s5108_s4 }
 0x3f7   : > { %1933 = vrot.lane.b32.xlu2 %v5718_v57, %s5109_s23 }
 0x425   : > { %v2147_v28 = vpop.xlane.xlu1 %2146 }
 0x426   : > { %v2165_v29 = vsub.f32 %v2015_v3, %v2147_v28 }
 0x428   : > { %v2175_v30 = vmul.f32 1.442695, %v2165_v29 }
 0x42a   : > { %4639 = vpow2.f32 %v2175_v30 }
 0x430   : > { %v5754_v31 = vpop.eup %4639 }
 0x431   : > { %v2193_v32 = vsel %vm2138_vm8, %v5754_v31, 0.0 }
 0x432   : > { %2194 = vadd.xlane.f32.xlu2 %v2193_v32 }
 0x442   : > { %v2159_v17 = vpop.xlane.xlu2 %2158 }
 0x443   : > { %v2169_v33 = vsub.f32 %v2111_v9, %v2159_v17 }
 0x445   : > { %v2183_v34 = vmul.f32 1.442695, %v2169_v33  ;;  %v2189_v35 = vpop.xlane.xlu1 %2188 }
 0x446   : > { %4641 = vrcp.f32 %v2189_v35  ;;  %v2222_v45 = vand.u32 2147483648, %v2189_v35  ;;  %v2220_v49 = vand.u32 2147483647, %v2189_v35  ;;  %vm2216_vm10 = vweird.f32 %v2189_v35 }
 0x447   : > { %4643 = vpow2.f32 %v2183_v34 }
 0x448   : > { %v2223_v56 = vor.u32 1.1754944e-38, %v2222_v45  ;;  %vm2221_vm12 = vcmp.eq.f32.partialorder %v2220_v49, 8.507059e+37 }
 0x44a   : > { %v2162_v36 = vpop.xlane.xlu0 %2161  ;;  %v2153_v37 = vpop.xlane.xlu2 %2152 }
 0x44b   : > { %v2170_v38 = vsub.f32 %v2135_v19, %v2162_v36  ;;  %v2167_v40 = vsub.f32 %v2063_v18, %v2153_v37 }
 0x44c   : > { %v4642_v39 = vpop.eup %4641 }
 0x44d   : > { %v5758_v41 = vpop.eup %4643  ;;  %v2212_v21 = vmul.f32 %v4642_v39, %v2189_v35  ;;  %v2185_v42 = vmul.f32 1.442695, %v2170_v38  ;;  %v2179_v46 = vmul.f32 1.442695, %v2167_v40  ;;  %vm2217_vm9 = vweird.f32 %v4642_v39 }
 0x44e   : > { %v2205_v43 = vsel %vm2138_vm8, %v5758_v41, 0.0  ;;  %vm2218_vm11 = vmor %vm2216_vm10, %vm2217_vm9 }
 0x44f   : > { %v2213_v44 = vsub.f32 1.0, %v2212_v21  ;;  %4645 = vpow2.f32 %v2185_v42  ;;  %2206 = vadd.xlane.f32.xlu0 %v2205_v43 }
 0x450   : > { %v2156_v47 = vpop.xlane.xlu1 %2155 }
 0x451   : > { %v2214_v48 = vmul.f32 %v4642_v39, %v2213_v44  ;;  %v2168_v50 = vsub.f32 %v2087_v24, %v2156_v47 }
 0x452   : > { %v2150_v51 = vpop.xlane.xlu0 %2149  ;;  %v2192_v52 = vpop.xlane.xlu2 %2191 }
 0x453   : > { %v2215_v53 = vadd.f32 %v4642_v39, %v2214_v48  ;;  %v2181_v54 = vmul.f32 1.442695, %v2168_v50  ;;  %v2166_v55 = vsub.f32 %v5732_v8, %v2150_v51  ;;  %4647 = vrcp.f32 %v2192_v52 }
 0x454   : > { %4649 = vpow2.f32 %v2179_v46  ;;  %v2234_v8 = vand.u32 2147483647, %v2192_v52  ;;  %v2236_v9 = vand.u32 2147483648, %v2192_v52  ;;  %vm2230_vm14 = vweird.f32 %v2192_v52 }
 0x455   : > { %v5763_v58 = vpop.eup %4645  ;;  %v2219_v59 = vsel %vm2218_vm11, %v4642_v39, %v2215_v53  ;;  %4651 = vpow2.f32 %v2181_v54  ;;  %v2177_v60 = vmul.f32 1.442695, %v2166_v55 }
 0x456   : > { %v2224_v61 = vsel %vm2221_vm12, %v2223_v56, %v2219_v59  ;;  %v2208_v62 = vsel %vm2138_vm8, %v5763_v58, 0.0  ;;  %v2237_v15 = vor.u32 1.1754944e-38, %v2236_v9  ;;  %vm2235_vm0 = vcmp.eq.f32.partialorder %v2234_v8, 8.507059e+37 }
 0x457   : > { %4653 = vpow2.f32 %v2177_v60  ;;  %2209 = vadd.xlane.f32.xlu0 %v2208_v62  ;;  %v2323_v0 = vmul.f32 %v5735_v13, %v2224_v61  ;;  %v2547_v60 = vld [vmem:[%s6446_s3] sm:$0xff] }
 0x459   : > { %v4648_v1 = vpop.eup %4647  ;;  %4378 = vmatmul.msk.f32.vlgmr.msra.gmra.mxu3 %vm2138_vm8, %v2323_v0 }
 0x45a   : > { %v5769_v2 = vpop.eup %4649  ;;  %v2226_v3 = vmul.f32 %v4648_v1, %v2192_v52  ;;  %vm2231_vm13 = vweird.f32 %v4648_v1  ;;  %v1934_v24 = vpop.permute.xlu2 %1933 }
 0x45b   : > { %v5771_v4 = vpop.eup %4651  ;;  %v2199_v11 = vsel %vm2138_vm8, %v5769_v2, 0.0  ;;  %vm2232_vm15 = vmor %vm2230_vm14, %vm2231_vm13 }
 0x45c   : > { %v2227_v5 = vsub.f32 1.0, %v2226_v3  ;;  %v2202_v6 = vsel %vm2138_vm8, %v5771_v4, 0.0 }
 0x45d   : > { %v5775_v7 = vpop.eup %4653  ;;  %2203 = vadd.xlane.f32.xlu2 %v2202_v6 }
 0x45e   : > { %v2228_v10 = vmul.f32 %v4648_v1, %v2227_v5  ;;  %v2196_v12 = vsel %vm2138_vm8, %v5775_v7, 0.0 }
 0x45f   : > { %2200 = vadd.xlane.f32.xlu0 %v2199_v11  ;;  %2197 = vadd.xlane.f32.xlu1 %v2196_v12 }
 0x460   : > { %v2229_v13 = vadd.f32 %v4648_v1, %v2228_v10 }
 0x462   : > { %v2233_v16 = vsel %vm2232_vm15, %v4648_v1, %v2229_v13 }
 0x463   : > { %v2238_v18 = vsel %vm2235_vm0, %v2237_v15, %v2233_v16 }
 0x464   : > { %v2324_v19 = vmul.f32 %v5741_v23, %v2238_v18 }
 0x465   : > { %v1930_v20 = vpop.permute.xlu0 %1929 }
 0x466   : > { %4379 = vmatmul.msk.f32.vlgmr.msrb.gmra.mxu3 %vm2138_vm8, %v2324_v19  ;;  %2418 = vmatpush.msra.mxu1 %v1930_v20 }
 0x468   : > { %v1928_v22 = vpop.permute.xlu1 %1927 }
 0x469   : > { %2395 = vmatpush.msra.mxu0 %v1928_v22 }
 0x46b   : > { %2441 = vmatpush.msrb.mxu0 %v1934_v24 }
 0x473   : > { %1941 = vrot.lane.b32.xlu0 %v5725_v63, %s5110_s18 }
 0x475   : > { %1935 = vrot.lane.b32.xlu2 %v5725_v63, %s5109_s23 }
 0x478   : > { %1939 = vrot.lane.b32.xlu1 %v5718_v57, %s5110_s18 }
 0x4a5   : > { %v2195_v25 = vpop.xlane.xlu2 %2194 }
 0x4a6   : > { %4655 = vrcp.f32 %v2195_v25  ;;  %v2250_v28 = vand.u32 2147483648, %v2195_v25  ;;  %v2248_v30 = vand.u32 2147483647, %v2195_v25  ;;  %vm2244_vm2 = vweird.f32 %v2195_v25 }
 0x4a8   : > { %v2251_v17 = vor.u32 1.1754944e-38, %v2250_v28  ;;  %vm2249_vm4 = vcmp.eq.f32.partialorder %v2248_v30, 8.507059e+37 }
 0x4ac   : > { %v4656_v23 = vpop.eup %4655 }
 0x4ad   : > { %v2240_v26 = vmul.f32 %v4656_v23, %v2195_v25  ;;  %vm2245_vm1 = vweird.f32 %v4656_v23 }
 0x4ae   : > { %vm2246_vm3 = vmor %vm2244_vm2, %vm2245_vm1 }
 0x4af   : > { %v2241_v27 = vsub.f32 1.0, %v2240_v26 }
 0x4b1   : > { %v2242_v29 = vmul.f32 %v4656_v23, %v2241_v27 }
 0x4b3   : > { %v2243_v32 = vadd.f32 %v4656_v23, %v2242_v29 }
 0x4b5   : > { %v2247_v33 = vsel %vm2246_vm3, %v4656_v23, %v2243_v32 }
 0x4b6   : > { %v2252_v34 = vsel %vm2249_vm4, %v2251_v17, %v2247_v33 }
 0x4b7   : > { %v2325_v63 = vmul.f32 %v5754_v31, %v2252_v34 }
 0x4b9   : > { %4380 = vmatmul.msk.f32.vlgmr.msra.gmra.mxu0 %vm2138_vm8, %v2325_v63 }
 0x4c2   : > { %v5791_v57 = vpop.xlane.xlu0 %2206 }
 0x4c3   : > { %4657 = vrcp.f32 %v5791_v57  ;;  %v2304_v49 = vand.u32 2147483647, %v5791_v57  ;;  %vm2300_vm9 = vweird.f32 %v5791_v57  ;;  %v2306_v22 = vand.u32 2147483648, %v5791_v57 }
 0x4c5   : > { %v2307_v33 = vor.u32 1.1754944e-38, %v2306_v22 }
 0x4c9   : > { %v5797_v36 = vpop.eup %4657 }
 0x4ca   : > { %v5794_v35 = vpop.xlane.xlu0 %2209  ;;  %v2296_v40 = vmul.f32 %v5797_v36, %v5791_v57  ;;  %vm2301_vm5 = vweird.f32 %v5797_v36 }
 0x4cb   : > { %4659 = vrcp.f32 %v5794_v35  ;;  %v2320_v28 = vand.u32 2147483648, %v5794_v35 }
 0x4cc   : > { %v2297_v42 = vsub.f32 1.0, %v2296_v40 }
 0x4cd   : > { %v2321_v57 = vor.u32 1.1754944e-38, %v2320_v28  ;;  %v2700_v28 = vld [vmem:[%s6448_s14 + $0x58] sm:$0xff] }
 0x4ce   : > { %v2298_v53 = vmul.f32 %v5797_v36, %v2297_v42 }
 0x4d0   : > { %v2204_v37 = vpop.xlane.xlu2 %2203  ;;  %v2299_v13 = vadd.f32 %v5797_v36, %v2298_v53  ;;  %v2552_v53 = vld [vmem:[%s6446_s3 + $0x28] sm:$0xff] }
 0x4d1   : > { %4661 = vrcp.f32 %v2204_v37  ;;  %v5801_v31 = vpop.eup %4659  ;;  %v2290_v47 = vand.u32 2147483647, %v2204_v37  ;;  %v2292_v48 = vand.u32 2147483648, %v2204_v37  ;;  %vm2286_vm6 = vweird.f32 %v2204_v37 }
 0x4d2   : > { %v2201_v38 = vpop.xlane.xlu0 %2200  ;;  %v2198_v39 = vpop.xlane.xlu1 %2197  ;;  %v2310_v43 = vmul.f32 %v5801_v31, %v5794_v35  ;;  %vm2315_vm3 = vweird.f32 %v5801_v31 }
 0x4d3   : > { %4663 = vrcp.f32 %v2201_v38  ;;  %vm5809_vm11 = vcmp.eq.f32.partialorder %v2290_v47, 8.507059e+37  ;;  %v2293_v61 = vor.u32 1.1754944e-38, %v2292_v48  ;;  %v2276_v62 = vand.u32 2147483647, %v2201_v38  ;;  %v2558_v47 = vld [vmem:[%s6446_s3 + $0x58] sm:$0xff]  ;;  %v2557_v48 = vld [vmem:[%s6446_s3 + $0x50] sm:$0xff] }
 0x4d4   : > { %4665 = vrcp.f32 %v2198_v39  ;;  %v2311_v54 = vsub.f32 1.0, %v2310_v43  ;;  %v2278_v0 = vand.u32 2147483648, %v2201_v38  ;;  %vm2272_vm14 = vweird.f32 %v2201_v38  ;;  %v2562_v43 = vld [vmem:[%s6446_s3 + $0x78] sm:$0xff] }
 0x4d5   : > { %v2262_v8 = vand.u32 2147483647, %v2198_v39  ;;  %v2264_v9 = vand.u32 2147483648, %v2198_v39  ;;  %vm2258_vm1 = vweird.f32 %v2198_v39  ;;  %vm2277_vm2 = vcmp.eq.f32.partialorder %v2276_v62, 8.507059e+37  ;;  %2567 = vmatpush.msrb.mxu2 %v2562_v43  ;;  %v1704_v43 = vld [vmem:[%s6451_s25 + $0x8] sm:$0xff] }
 0x4d6   : > { %v2312_v6 = vmul.f32 %v5801_v31, %v2311_v54  ;;  %v2279_v16 = vor.u32 1.1754944e-38, %v2278_v0  ;;  %v2551_v54 = vld [vmem:[%s6446_s3 + $0x20] sm:$0xff] }
 0x4d7   : > { %v4662_v21 = vpop.eup %4661  ;;  %v2265_v25 = vor.u32 1.1754944e-38, %v2264_v9 }
 0x4d8   : > { %v2282_v44 = vmul.f32 %v4662_v21, %v2204_v37  ;;  %v1936_v45 = vpop.permute.xlu2 %1935  ;;  %vm2287_vm10 = vweird.f32 %v4662_v21  ;;  %v2313_v23 = vadd.f32 %v5801_v31, %v2312_v6 }
 0x4d9   : > { %v4664_v46 = vpop.eup %4663  ;;  %2464 = vmatpush.msra.mxu3 %v1936_v45  ;;  %vm2288_vm13 = vmor %vm2286_vm6, %vm2287_vm10  ;;  %vm2263_vm6 = vcmp.eq.f32.partialorder %v2262_v8, 8.507059e+37  ;;  %v2560_v45 = vld [vmem:[%s6446_s3 + $0x68] sm:$0xff] }
 0x4da   : > { %v2283_v50 = vsub.f32 1.0, %v2282_v44  ;;  %v2268_v51 = vmul.f32 %v4664_v46, %v2201_v38  ;;  %v4666_v52 = vpop.eup %4665  ;;  %vm2273_vm12 = vweird.f32 %v4664_v46  ;;  %vm5828_vm10 = vmor %vm2300_vm9, %vm2301_vm5  ;;  %vm2305_vm9 = vcmp.eq.f32.partialorder %v2304_v49, 8.507059e+37  ;;  %v2561_v44 = vld [vmem:[%s6446_s3 + $0x70] sm:$0xff]  ;;  %v2556_v49 = vld [vmem:[%s6446_s3 + $0x48] sm:$0xff] }
 0x4db   : > { %v2254_v59 = vmul.f32 %v4666_v52, %v2198_v39  ;;  %vm2259_vm15 = vweird.f32 %v4666_v52  ;;  %vm2274_vm0 = vmor %vm2272_vm14, %vm2273_vm12  ;;  %v2303_v32 = vsel %vm5828_vm10, %v5797_v36, %v2299_v13  ;;  %2568 = vmatpush.msrb.mxu2 %v2561_v44  ;;  %v4619_v13 = vld [vmem:[%s6449_s9] ss:$0 sm:$0xff]  ;;  %v1705_v44 = vld [vmem:[%s6451_s25 + $0x10] sm:$0xff] }
 0x4dc   : > { %v2284_v55 = vmul.f32 %v4662_v21, %v2283_v50  ;;  %v2269_v56 = vsub.f32 1.0, %v2268_v51  ;;  %vm2260_vm4 = vmor %vm2258_vm1, %vm2259_vm15  ;;  %v2308_v63 = vsel %vm2305_vm9, %v2307_v33, %v2303_v32  ;;  %v2351_v39 = vpop.f32.mrf.mxu3  ;;  %v2555_v50 = vld [vmem:[%s6446_s3 + $0x40] sm:$0xff]  ;;  %v2554_v51 = vld [vmem:[%s6446_s3 + $0x38] sm:$0xff] }
 0x4dd   : > { %v2255_v5 = vsub.f32 1.0, %v2254_v59  ;;  %2569 = vmatpush.msrb.mxu2 %v2560_v45  ;;  %v2548_v59 = vld [vmem:[%s6446_s3 + $0x8] sm:$0xff]  ;;  %v2697_v32 = vld [vmem:[%s6448_s14 + $0x40] sm:$0xff]  ;;  %v1706_v45 = vld [vmem:[%s6451_s25 + $0x18] sm:$0xff] }
 0x4de   : > { %v2285_v1 = vadd.f32 %v4662_v21, %v2284_v55  ;;  %v2270_v3 = vmul.f32 %v4664_v46, %v2269_v56  ;;  %v2550_v55 = vld [vmem:[%s6446_s3 + $0x18] sm:$0xff]  ;;  %v2549_v56 = vld [vmem:[%s6446_s3 + $0x10] sm:$0xff] }
 0x4df   : > { %v2256_v12 = vmul.f32 %v4666_v52, %v2255_v5 }
 0x4e0   : > { %v2289_v10 = vsel %vm2288_vm13, %v4662_v21, %v2285_v1  ;;  %v2271_v11 = vadd.f32 %v4664_v46, %v2270_v3  ;;  %vm2544_vm13 = vcmask 785408  }
 0x4e1   : > { %v2294_v15 = vsel %vm5809_vm11, %v2293_v61, %v2289_v10  ;;  %v2257_v19 = vadd.f32 %v4666_v52, %v2256_v12  ;;  %vm2314_vm11 = vweird.f32 %v5794_v35 }
 0x4e2   : > { %v2275_v18 = vsel %vm2274_vm0, %v4664_v46, %v2271_v11  ;;  %v2328_v20 = vmul.f32 %v5771_v4, %v2294_v15  ;;  %vm2316_vm5 = vmor %vm2314_vm11, %vm2315_vm3  ;;  %v2559_v46 = vld [vmem:[%s6446_s3 + $0x60] sm:$0xff] }
 0x4e3   : > { %v2280_v24 = vsel %vm2277_vm2, %v2279_v16, %v2275_v18  ;;  %v2261_v26 = vsel %vm2260_vm4, %v4666_v52, %v2257_v19  ;;  %v2317_v34 = vsel %vm2316_vm5, %v5801_v31, %v2313_v23  ;;  %2570 = vmatpush.msrb.mxu2 %v2559_v46  ;;  %v2553_v52 = vld [vmem:[%s6446_s3 + $0x30] sm:$0xff]  ;;  %v4707_v18 = vld [vmem:[#allocation2] sm:$0xff]  ;;  %v2704_v23 = vld [vmem:[%s6448_s14 + $0x78] sm:$0xff]  ;;  %vm3077_vm4 = vcmask 130048  }
 0x4e4   : > { %4383 = vmatmul.msk.f32.vlgmr.msra.gmra.mxu3 %vm2138_vm8, %v2328_v20  ;;  %v2327_v27 = vmul.f32 %v5769_v2, %v2280_v24  ;;  %v2266_v29 = vsel %vm2263_vm6, %v2265_v25, %v2261_v26  ;;  %v2318_v2 = vand.u32 2147483647, %v5794_v35  ;;  %v4708_v24 = vld [vmem:[#allocation2 + $0x8] sm:$0xff]  ;;  %v2703_v26 = vld [vmem:[%s6448_s14 + $0x70] sm:$0xff]  ;;  %v2701_v4 = vld [vmem:[%s6448_s14 + $0x60] sm:$0xff] }
 0x4e5   : > { %v1942_v30 = vpop.permute.xlu0 %1941  ;;  %v2326_v17 = vmul.f32 %v5775_v7, %v2266_v29  ;;  %v2329_v7 = vmul.f32 %v5758_v41, %v2308_v63  ;;  %2571 = vmatpush.msrb.mxu2 %v2558_v47  ;;  %v2699_v29 = vld [vmem:[%s6448_s14 + $0x50] sm:$0xff]  ;;  %v2694_v63 = vld [vmem:[%s6448_s14 + $0x28] sm:$0xff] }
 0x4e6   : > { %4382 = vmatmul.msk.f32.vlgmr.msrb.gmra.mxu0 %vm2138_vm8, %v2327_v27  ;;  %2510 = vmatpush.msrb.mxu1 %v1942_v30  ;;  %vm2319_vm12 = vcmp.eq.f32.partialorder %v2318_v2, 8.507059e+37  ;;  %v2702_v27 = vld [vmem:[%s6448_s14 + $0x68] sm:$0xff]  ;;  %v2696_v2 = vld [vmem:[%s6448_s14 + $0x38] sm:$0xff]  ;;  %v2660_v46 = vld [vmem:[%s6450_s10 + $0x70] sm:$0xff] }
 0x4e7   : > { %4381 = vmatmul.msk.f32.vlgmr.msra.gmra.mxu1 %vm2138_vm8, %v2326_v17  ;;  %v2322_v37 = vsel %vm2319_vm12, %v2321_v57, %v2317_v34  ;;  %2572 = vmatpush.msrb.mxu2 %v2557_v48  ;;  %v2698_v30 = vld [vmem:[%s6448_s14 + $0x48] sm:$0xff]  ;;  %v2695_v17 = vld [vmem:[%s6448_s14 + $0x30] sm:$0xff]  ;;  %v2658_v48 = vld [vmem:[%s6450_s10 + $0x60] sm:$0xff] }
 0x4e8   : > { %v2330_v35 = vmul.f32 %v5763_v58, %v2322_v37  ;;  %v2659_v47 = vld [vmem:[%s6450_s10 + $0x68] sm:$0xff] }
 0x4e9   : > { %v2374_v40 = vpop.f32.mrf.mxu3  ;;  %2573 = vmatpush.msrb.mxu2 %v2556_v49  ;;  %v2657_v49 = vld [vmem:[%s6450_s10 + $0x58] sm:$0xff] }
 0x4ea   : > { %v1940_v36 = vpop.permute.xlu1 %1939 }
 0x4eb   : > { %2487 = vmatpush.msra.mxu0 %v1940_v36  ;;  %2574 = vmatpush.msrb.mxu2 %v2555_v50  ;;  %v2693_v36 = vld [vmem:[%s6448_s14 + $0x20] sm:$0xff]  ;;  %v2656_v50 = vld [vmem:[%s6450_s10 + $0x50] sm:$0xff] }
 0x4ed   : > { %2575 = vmatpush.msrb.mxu2 %v2554_v51  ;;  %2709 = vmatpush.msrb.mxu0 %v2704_v23  ;;  %v2655_v51 = vld [vmem:[%s6450_s10 + $0x48] sm:$0xff]  ;;  %v4620_v23 = vld [vmem:[%s1671_s26] ss:$0 sm:$0xff]  ;;  %s6457_s26 = sld [smem:[#allocation70_spill]] }
 0x4ee   : > { %4384 = vmatmul.msk.f32.vlgmr.msra.gmra.mxu0 %vm2138_vm8, %v2329_v7  ;;  %v2692_v7 = vld [vmem:[%s6448_s14 + $0x18] sm:$0xff] }
 0x4ef   : > { %4385 = vmatmul.msk.f32.vlgmr.msrb.gmra.mxu1 %vm2138_vm8, %v2330_v35  ;;  %2576 = vmatpush.msrb.mxu2 %v2553_v52  ;;  %vm2541_vm8 = vcmask 523264   ;;  %v2691_v35 = vld [vmem:[%s6448_s14 + $0x10] sm:$0xff]  ;;  %v2654_v52 = vld [vmem:[%s6450_s10 + $0x40] sm:$0xff] }
 0x4f0   : > { %2710 = vmatpush.msrb.mxu0 %v2703_v26 }
 0x4f1   : > { %2577 = vmatpush.msrb.mxu2 %v2552_v53  ;;  %v2653_v53 = vld [vmem:[%s6450_s10 + $0x38] sm:$0xff] }
 0x4f2   : > { %2711 = vmatpush.msrb.mxu0 %v2702_v27 }
 0x4f3   : > { %2578 = vmatpush.msrb.mxu2 %v2551_v54  ;;  %v2652_v54 = vld [vmem:[%s6450_s10 + $0x30] sm:$0xff] }
 0x4f4   : > { %2712 = vmatpush.msrb.mxu0 %v2701_v4 }
 0x4f5   : > { %2579 = vmatpush.msrb.mxu2 %v2550_v55  ;;  %v2651_v55 = vld [vmem:[%s6450_s10 + $0x28] sm:$0xff] }
 0x4f6   : > { %2713 = vmatpush.msrb.mxu0 %v2700_v28  ;;  %v4621_v28 = vld [vmem:[%s1674_s1] ss:$0 sm:$0xff]  ;;  %s6456_s1 = sld [smem:[#allocation37_spill]] }
 0x4f7   : > { %2580 = vmatpush.msrb.mxu2 %v2549_v56  ;;  %v2650_v56 = vld [vmem:[%s6450_s10 + $0x20] sm:$0xff] }
 0x4f8   : > { %2714 = vmatpush.msrb.mxu0 %v2699_v29 }
 0x4f9   : > { %2581 = vmatpush.msrb.mxu2 %v2548_v59  ;;  %v2649_v59 = vld [vmem:[%s6450_s10 + $0x18] sm:$0xff] }
 0x4fa   : > { %2715 = vmatpush.msrb.mxu0 %v2698_v30 }
 0x4fb   : > { %2582 = vmatpush.msrb.mxu2 %v2547_v60  ;;  %v2648_v60 = vld [vmem:[%s6450_s10 + $0x10] sm:$0xff] }
 0x4fc   : > { %2716 = vmatpush.msrb.mxu0 %v2697_v32 }
 0x4fe   : > { %2717 = vmatpush.msrb.mxu0 %v2696_v2 }
 0x500   : > { %2718 = vmatpush.msrb.mxu0 %v2695_v17 }
 0x502   : > { %2719 = vmatpush.msrb.mxu0 %v2694_v63  ;;  %v4709_v63 = vld [vmem:[%s6435_s28] sm:$0xff] }
 0x504   : > { %2720 = vmatpush.msrb.mxu0 %v2693_v36 }
 0x506   : > { %2721 = vmatpush.msrb.mxu0 %v2692_v7 }
 0x508   : > { %2722 = vmatpush.msrb.mxu0 %v2691_v35 }
 0x536   : > { %v2397_v38 = vpop.f32.mrf.mxu0 }
 0x537   : > { %2517 = vrot.lane.b32.xlu1 %v2397_v38, %s5110_s18  ;;  %v2661_v38 = vld [vmem:[%s6450_s10 + $0x78] sm:$0xff] }
 0x538   : > { %2666 = vmatpush.msrb.mxu3 %v2661_v38 }
 0x53a   : > { %2667 = vmatpush.msrb.mxu3 %v2660_v46  ;;  %v2753_v46 = vld [vmem:[%s6457_s26 + $0x78] sm:$0xff] }
 0x53b   : > { %2758 = vmatpush.msra.mxu1 %v2753_v46 }
 0x53c   : > { %2668 = vmatpush.msrb.mxu3 %v2659_v47  ;;  %v2752_v47 = vld [vmem:[%s6457_s26 + $0x70] sm:$0xff] }
 0x53d   : > { %2759 = vmatpush.msra.mxu1 %v2752_v47 }
 0x53e   : > { %2669 = vmatpush.msrb.mxu3 %v2658_v48  ;;  %v2751_v48 = vld [vmem:[%s6457_s26 + $0x68] sm:$0xff] }
 0x53f   : > { %2760 = vmatpush.msra.mxu1 %v2751_v48 }
 0x540   : > { %2670 = vmatpush.msrb.mxu3 %v2657_v49 }
 0x542   : > { %2671 = vmatpush.msrb.mxu3 %v2656_v50 }
 0x544   : > { %2672 = vmatpush.msrb.mxu3 %v2655_v51  ;;  %v2750_v51 = vld [vmem:[%s6457_s26 + $0x60] sm:$0xff] }
 0x545   : > { %2761 = vmatpush.msra.mxu1 %v2750_v51 }
 0x546   : > { %2673 = vmatpush.msrb.mxu3 %v2654_v52 }
 0x548   : > { %2674 = vmatpush.msrb.mxu3 %v2653_v53 }
 0x54a   : > { %2675 = vmatpush.msrb.mxu3 %v2652_v54  ;;  %v2749_v54 = vld [vmem:[%s6457_s26 + $0x58] sm:$0xff] }
 0x54b   : > { %2762 = vmatpush.msra.mxu1 %v2749_v54 }
 0x54c   : > { %2676 = vmatpush.msrb.mxu3 %v2651_v55 }
 0x54e   : > { %2677 = vmatpush.msrb.mxu3 %v2650_v56  ;;  %v2748_v56 = vld [vmem:[%s6457_s26 + $0x50] sm:$0xff] }
 0x54f   : > { %2763 = vmatpush.msra.mxu1 %v2748_v56 }
 0x550   : > { %2678 = vmatpush.msrb.mxu3 %v2649_v59  ;;  %v2747_v59 = vld [vmem:[%s6457_s26 + $0x48] sm:$0xff] }
 0x551   : > { %2764 = vmatpush.msra.mxu1 %v2747_v59 }
 0x552   : > { %2679 = vmatpush.msrb.mxu3 %v2648_v60  ;;  %v2746_v60 = vld [vmem:[%s6457_s26 + $0x40] sm:$0xff] }
 0x553   : > { %2765 = vmatpush.msra.mxu1 %v2746_v60 }
 0x563   : > { %v2443_v31 = vpop.f32.mrf.mxu0 }
 0x564   : > { %2525 = vrot.lane.b32.xlu2 %v2443_v31, %s5109_s23  ;;  %v2420_v41 = vpop.f32.mrf.mxu1  ;;  %v2690_v31 = vld [vmem:[%s6448_s14 + $0x8] sm:$0xff] }
 0x565   : > { %2519 = vrot.lane.b32.xlu1 %v2420_v41, %s5110_s18  ;;  %2723 = vmatpush.msrb.mxu0 %v2690_v31 }
 0x567   : > { %v2466_v58 = vpop.f32.mrf.mxu3 }
 0x56b   : > { %v2489_v21 = vpop.f32.mrf.mxu0 }
 0x56c   : > { %2527 = vrot.lane.b32.xlu2 %v2466_v58, %s5109_s23  ;;  %2533 = vrot.lane.b32.xlu0 %v2489_v21, %s5108_s4  ;;  %v2512_v42 = vpop.f32.mrf.mxu1  ;;  %v2689_v58 = vld [vmem:[%s6448_s14] sm:$0xff] }
 0x56d   : > { %v1703_v21 = vld [vmem:[%s6451_s25] sm:$0xff]  ;;  %2724 = vmatpush.msrb.mxu0 %v2689_v58 }
 0x56e   : > { %2725 = vmatmul.f32.vlgmr.msrb.gmra.mxu0 %v1703_v21 }
 0x574   : > { %2535 = vrot.lane.b32.xlu0 %v2512_v42, %s5108_s4 }
 0x576   : > { %2728 = vmatmul.f32.gmra.mxu0 %v1704_v43 }
 0x57e   : > { %2731 = vmatmul.f32.gmra.mxu0 %v1705_v44 }
 0x586   : > { %2734 = vmatmul.f32.gmra.mxu0 %v1706_v45 }
 0x5a9   : > { %v2518_v61 = vpop.permute.xlu1 %2517 }
 0x5aa   : > { %v2539_v0 = vsel %vm1945_vm7, %v2351_v39, %v2518_v61  ;;  %v2647_v61 = vld [vmem:[%s6450_s10 + $0x8] sm:$0xff] }
 0x5ab   : > { %2680 = vmatpush.msrb.mxu3 %v2647_v61 }
 0x5be   : > { %v2526_v62 = vpop.permute.xlu2 %2525 }
 0x5bf   : > { %v2542_v1 = vsel %vm2541_vm8, %v2539_v0, %v2526_v62  ;;  %v2646_v62 = vld [vmem:[%s6450_s10] sm:$0xff] }
 0x5c0   : > { %2681 = vmatpush.msrb.mxu3 %v2646_v62 }
 0x5c6   : > { %v2528_v9 = vpop.permute.xlu2 %2527 }
 0x5d7   : > { %v2520_v6 = vpop.permute.xlu1 %2519 }
 0x5d8   : > { %v2540_v8 = vsel %vm1945_vm7, %v2374_v40, %v2520_v6 }
 0x5d9   : > { %v2543_v11 = vsel %vm2541_vm8, %v2540_v8, %v2528_v9 }
 0x5de   : > { %v2534_v3 = vpop.permute.xlu0 %2533 }
 0x5df   : > { %v2545_v5 = vsel %vm2544_vm13, %v2542_v1, %v2534_v3 }
 0x5e0   : > { %2583 = vmatmul.f32.vlgmr.msrb.gmra.mxu2 %v2545_v5 }
 0x5e6   : > { %v2536_v10 = vpop.permute.xlu0 %2535 }
 0x5e7   : > { %v2546_v12 = vsel %vm2544_vm13, %v2543_v11, %v2536_v10 }
 0x5e8   : > { %2586 = vmatmul.f32.gmra.mxu2 %v2546_v12  ;;  %v4622_v12 = vld [vmem:[%s6454_s24] ss:$0 sm:$0xff] }
 0x663   : > { %v2584_v15 = vpop.f32.mrf.mxu2 }
 0x664   : > { %v2585_v16 = vadd.f32 %v4619_v13, %v2584_v15 }
 0x666   : > { %v5879_v19 = vadd.f32 %v4707_v18, %v2585_v16  ;;  %v2726_v16 = vpop.f32.mrf.mxu0 }
 0x668   : > { %2594 = vadd.xlane.f32.xlu1 %v5879_v19 }
 0x66b   : > { %v2587_v20 = vpop.f32.mrf.mxu2 }
 0x66c   : > { %v2588_v22 = vadd.f32 %v4619_v13, %v2587_v20  ;;  %v5938_v20 = vadd.f32 %v4622_v12, %v2726_v16 }
 0x66e   : > { %v5882_v25 = vadd.f32 %v4708_v24, %v2588_v22  ;;  %v2729_v2 = vpop.f32.mrf.mxu0 }
 0x670   : > { %2596 = vadd.xlane.f32.xlu2 %v5882_v25 }
 0x676   : > { %v2732_v35 = vpop.f32.mrf.mxu0 }
 0x67e   : > { %v2735_v58 = vpop.f32.mrf.mxu0 }
 0x6db   : > { %v2595_v33 = vpop.xlane.xlu1 %2594 }
 0x6dc   : > { %v2598_v34 = vmul.f32 %v2595_v33, %v5618_v14  ;;  %v2730_v33 = vadd.f32 %v4622_v12, %v2729_v2 }
 0x6de   : > { %v5898_v57 = vsub.f32 %v5879_v19, %v2598_v34  ;;  %4386 = vmatpush.xpose.msk.msra.mxu2 %vm1945_vm7, %v2730_v33  ;;  %2807 = vrot.lane.b32.xlu2 %v2730_v33, %s5108_s4 }
 0x6e0   : > { %v2602_v37 = vmul.f32 %v5898_v57, %v5898_v57 }
 0x6e2   : > { %2604 = vadd.xlane.f32.xlu0 %v2602_v37  ;;  %4387 = vmatpush.xpose.msk.msra.mxu2 %vm1945_vm7, %v5938_v20 }
 0x6e3   : > { %v2597_v39 = vpop.xlane.xlu2 %2596 }
 0x6e4   : > { %v2599_v40 = vmul.f32 %v2597_v39, %v5618_v14  ;;  %v2733_v39 = vadd.f32 %v4622_v12, %v2732_v35 }
 0x6e6   : > { %v5909_v41 = vsub.f32 %v5882_v25, %v2599_v40  ;;  %v4710_v40 = vld [vmem:[%s6435_s28 + $0x8] sm:$0xff]  ;;  %2815 = vrot.lane.b32.xlu2 %v2730_v33, %s5109_s23  ;;  %s6458_s28 = scalar_lea.vmem %s6456_s1, %s5556_s27 }
 0x6e7   : > { %v4623_v21 = vld [vmem:[%s6458_s28] ss:$0 sm:$0xff] }
 0x6e8   : > { %v2603_v42 = vmul.f32 %v5909_v41, %v5909_v41 }
 0x6ea   : > { %2606 = vadd.xlane.f32.xlu1 %v2603_v42 }
 0x6f6   : > { %2805 = vrot.lane.b32.xlu0 %v5938_v20, %s5108_s4 }
 0x703   : > { %2809 = vrot.lane.b32.xlu1 %v2733_v39, %s5108_s4 }
 0x738   : > { %v2808_v44 = vpop.permute.xlu2 %2807 }
 0x739   : > { %4392 = vmatpush.xpose.msk.msrb.mxu2 %vm1945_vm7, %v2808_v44 }
 0x740   : > { %v2816_v52 = vpop.permute.xlu2 %2815 }
 0x755   : > { %v2605_v0 = vpop.xlane.xlu0 %2604 }
 0x756   : > { %v2608_v1 = vmul.f32 %v2605_v0, %v5618_v14  ;;  %v2745_v0 = vld [vmem:[%s6457_s26 + $0x38] sm:$0xff] }
 0x757   : > { %2766 = vmatpush.msra.mxu1 %v2745_v0 }
 0x758   : > { %v2610_v3 = vadd.f32 1e-05, %v2608_v1  ;;  %v2744_v1 = vld [vmem:[%s6457_s26 + $0x30] sm:$0xff] }
 0x759   : > { %2767 = vmatpush.msra.mxu1 %v2744_v1 }
 0x75a   : > { %4667 = vrsqrt.f32 %v2610_v3  ;;  %vm2618_vm15 = vweird.f32 %v2610_v3 }
 0x75d   : > { %v2607_v5 = vpop.xlane.xlu1 %2606 }
 0x75e   : > { %v2609_v6 = vmul.f32 %v2607_v5, %v5618_v14  ;;  %v2742_v5 = vld [vmem:[%s6457_s26 + $0x20] sm:$0xff] }
 0x760   : > { %v4668_v8 = vpop.eup %4667  ;;  %v2611_v9 = vadd.f32 1e-05, %v2609_v6  ;;  %v2741_v6 = vld [vmem:[%s6457_s26 + $0x18] sm:$0xff] }
 0x761   : > { %v2613_v10 = vmul.f32 %v4668_v8, %v2610_v3  ;;  %vm2619_vm14 = vweird.f32 %v4668_v8  ;;  %v2743_v3 = vld [vmem:[%s6457_s26 + $0x28] sm:$0xff] }
 0x762   : > { %4669 = vrsqrt.f32 %v2611_v9  ;;  %vm2620_vm0 = vmor %vm2618_vm15, %vm2619_vm14  ;;  %vm2628_vm2 = vweird.f32 %v2611_v9  ;;  %2768 = vmatpush.msra.mxu1 %v2743_v3 }
 0x763   : > { %v2614_v11 = vmul.f32 %v4668_v8, %v2613_v10  ;;  %v2738_v10 = vld [vmem:[%s6457_s26] sm:$0xff] }
 0x764   : > { %2769 = vmatpush.msra.mxu1 %v2742_v5 }
 0x765   : > { %v2615_v13 = vmul.f32 0.5, %v2614_v11  ;;  %v1699_v11 = vld [vmem:[%s6459_s12] sm:$0xff] }
 0x766   : > { %2770 = vmatpush.msra.mxu1 %v2741_v6 }
 0x767   : > { %v2616_v15 = vsub.f32 1.5, %v2615_v13  ;;  %v1701_v13 = vld [vmem:[%s6459_s12 + $0x10] sm:$0xff] }
 0x768   : > { %v4670_v18 = vpop.eup %4669  ;;  %v2806_v45 = vpop.permute.xlu0 %2805 }
 0x769   : > { %v2617_v22 = vmul.f32 %v4668_v8, %v2616_v15  ;;  %v2623_v24 = vmul.f32 %v4670_v18, %v2611_v9  ;;  %vm2629_vm1 = vweird.f32 %v4670_v18  ;;  %4393 = vmatpush.xpose.msk.msrb.mxu2 %vm1945_vm7, %v2806_v45  ;;  %v2739_v9 = vld [vmem:[%s6457_s26 + $0x8] sm:$0xff]  ;;  %v1702_v15 = vld [vmem:[%s6459_s12 + $0x18] sm:$0xff] }
 0x76a   : > { %vm2630_vm3 = vmor %vm2628_vm2, %vm2629_vm1 }
 0x76b   : > { %v2621_v26 = vsel %vm2620_vm0, %v4668_v8, %v2617_v22  ;;  %v2624_v27 = vmul.f32 %v4670_v18, %v2623_v24  ;;  %v2740_v8 = vld [vmem:[%s6457_s26 + $0x10] sm:$0xff] }
 0x76c   : > { %v2632_v4 = vmul.f32 %v2621_v26, %v5898_v57  ;;  %2771 = vmatpush.msra.mxu1 %v2740_v8 }
 0x76d   : > { %v2625_v29 = vmul.f32 0.5, %v2624_v27 }
 0x76e   : > { %v2637_v30 = vmul.f32 %v4620_v23, %v2632_v4  ;;  %2772 = vmatpush.msra.mxu1 %v2739_v9 }
 0x76f   : > { %v2626_v32 = vsub.f32 1.5, %v2625_v29 }
 0x770   : > { %v2642_v17 = vadd.f32 %v4621_v28, %v2637_v30  ;;  %2773 = vmatpush.msra.mxu1 %v2738_v10 }
 0x771   : > { %v2627_v34 = vmul.f32 %v4670_v18, %v2626_v32  ;;  %2774 = vmatmul.f32.vlgmr.msra.gmra.mxu1 %v1699_v11 }
 0x772   : > { %v2644_v36 = vadd.f32 %v4709_v63, %v2642_v17 }
 0x773   : > { %v2631_v57 = vsel %vm2630_vm3, %v4670_v18, %v2627_v34  ;;  %v4624_v34 = vld [vmem:[%s1652_s16] ss:$0 sm:$0xff]  ;;  %s6463_s16 = sld [smem:[#allocation71_spill]] }
 0x774   : > { %2682 = vmatmul.f32.vlgmr.msrb.gmra.mxu3 %v2644_v36  ;;  %v2633_v37 = vmul.f32 %v2631_v57, %v5909_v41  ;;  %v2736_v41 = vadd.f32 %v4622_v12, %v2735_v58  ;;  %v1700_v12 = vld [vmem:[%s6459_s12 + $0x8] sm:$0xff] }
 0x775   : > { %v2810_v55 = vpop.permute.xlu1 %2809 }
 0x776   : > { %v2638_v7 = vmul.f32 %v4620_v23, %v2633_v37  ;;  %2811 = vrot.lane.b32.xlu0 %v2736_v41, %s5108_s4  ;;  %4389 = vmatpush.xpose.msk.msra.mxu3 %vm1945_vm7, %v2736_v41 }
 0x778   : > { %v2643_v38 = vadd.f32 %v4621_v28, %v2638_v7 }
 0x779   : > { %2777 = vmatmul.f32.gmra.mxu1 %v1700_v12 }
 0x77a   : > { %v2645_v31 = vadd.f32 %v4710_v40, %v2643_v38  ;;  %4390 = vmatpush.xpose.msk.msra.mxu3 %vm1945_vm7, %v2733_v39 }
 0x77c   : > { %2685 = vmatmul.f32.gmra.mxu3 %v2645_v31 }
 0x77e   : > { %2813 = vrot.lane.b32.xlu0 %v5938_v20, %s5109_s23 }
 0x781   : > { %2780 = vmatmul.f32.gmra.mxu1 %v1701_v13 }
 0x786   : > { %2819 = vrot.lane.b32.xlu0 %v2736_v41, %s5109_s23 }
 0x789   : > { %2783 = vmatmul.f32.gmra.mxu1 %v1702_v15 }
 0x7e8   : > { %v2812_v53 = vpop.permute.xlu0 %2811 }
 0x7e9   : > { %4395 = vmatpush.xpose.msk.msrb.mxu3 %vm1945_vm7, %v2812_v53 }
 0x7ed   : > { %4396 = vmatpush.xpose.msk.msrb.mxu3 %vm1945_vm7, %v2810_v55 }
 0x7f0   : > { %v2814_v61 = vpop.permute.xlu0 %2813 }
 0x7f7   : > { %v2683_v42 = vpop.f32.mrf.mxu3 }
 0x7f8   : > { %v2684_v43 = vadd.f32 %v4623_v21, %v2683_v42  ;;  %v2820_v62 = vpop.permute.xlu0 %2819 }
 0x7fa   : > { %2789 = vrot.lane.b32.xlu1 %v2684_v43, %s5108_s4  ;;  %4388 = vmatmul.msk.f32.vlgmr.msra.gmra.mxu2 %vm1945_vm7, %v2684_v43 }
 0x7fb   : > { %4398 = vmatpush.xpose.msk.msra.mxu2 %vm1945_vm7, %v2816_v52 }
 0x7ff   : > { %v2686_v49 = vpop.f32.mrf.mxu3  ;;  %4399 = vmatpush.xpose.msk.msra.mxu2 %vm1945_vm7, %v2814_v61 }
 0x800   : > { %v2687_v50 = vadd.f32 %v4623_v21, %v2686_v49 }
 0x802   : > { %2793 = vrot.lane.b32.xlu1 %v2684_v43, %s5109_s23  ;;  %2795 = vrot.lane.b32.xlu0 %v2687_v50, %s5109_s23 }
 0x803   : > { %2791 = vrot.lane.b32.xlu2 %v2687_v50, %s5108_s4  ;;  %4391 = vmatmul.msk.f32.vlgmr.msra.gmra.mxu3 %vm1945_vm7, %v2687_v50 }
 0x804   : > { %4401 = vmatpush.xpose.msk.msra.mxu3 %vm1945_vm7, %v2820_v62 }
 0x80a   : > { %2823 = vrot.lane.b32.xlu1 %v2730_v33, %s5110_s18  ;;  %2827 = vrot.lane.b32.xlu0 %v2736_v41, %s5110_s18  ;;  %v2775_v33 = vpop.f32.mrf.mxu1 }
 0x80b   : > { %2817 = vrot.lane.b32.xlu2 %v2733_v39, %s5109_s23  ;;  %v2776_v36 = vadd.f32 %v4624_v34, %v2775_v33 }
 0x812   : > { %2797 = vrot.lane.b32.xlu1 %v2684_v43, %s5110_s18  ;;  %v2778_v63 = vpop.f32.mrf.mxu1 }
 0x813   : > { %2821 = vrot.lane.b32.xlu2 %v5938_v20, %s5110_s18  ;;  %v2779_v57 = vadd.f32 %v4624_v34, %v2778_v63 }
 0x815   : > { %v6024_v37 = vpack.i.bf16 %v2776_v36, %v2779_v57 }
 0x81a   : > { %2799 = vrot.lane.b32.xlu1 %v2687_v50, %s5110_s18  ;;  %v2781_v7 = vpop.f32.mrf.mxu1 }
 0x81b   : > { %2825 = vrot.lane.b32.xlu2 %v2733_v39, %s5110_s18  ;;  %v2782_v38 = vadd.f32 %v4624_v34, %v2781_v7 }
 0x822   : > { %v2784_v35 = vpop.f32.mrf.mxu1 }
 0x823   : > { %v2785_v39 = vadd.f32 %v4624_v34, %v2784_v35 }
 0x825   : > { %v6026_v40 = vpack.i.bf16 %v2782_v38, %v2785_v39 }
 0x85d   : > { %v2792_v16 = vpop.permute.xlu2 %2791 }
 0x85e   : > { %4397 = vmatmul.msk.f32.vlgmr.msrb.gmra.mxu3 %vm1945_vm7, %v2792_v16 }
 0x865   : > { %v2818_v18 = vpop.permute.xlu2 %2817 }
 0x866   : > { %4402 = vmatpush.xpose.msk.msra.mxu3 %vm1945_vm7, %v2818_v18 }
 0x86a   : > { %3310 = vmatpush.msrb.mxu3 %v2785_v39 }
 0x86c   : > { %v2790_v20 = vpop.permute.xlu1 %2789  ;;  %3311 = vmatpush.msrb.mxu3 %v2782_v38 }
 0x86d   : > { %4394 = vmatmul.msk.f32.vlgmr.msrb.gmra.mxu2 %vm1945_vm7, %v2790_v20  ;;  %v2822_v23 = vpop.permute.xlu2 %2821 }
 0x86e   : > { %3287 = vmatpush.msrb.mxu2 %v2779_v57 }
 0x870   : > { %3288 = vmatpush.msrb.mxu2 %v2776_v36 }
 0x874   : > { %v2796_v22 = vpop.permute.xlu0 %2795  ;;  %v2794_v24 = vpop.permute.xlu1 %2793 }
 0x875   : > { %4400 = vmatmul.msk.f32.vlgmr.msra.gmra.mxu2 %vm1945_vm7, %v2794_v24  ;;  %4403 = vmatmul.msk.f32.vlgmr.msra.gmra.mxu3 %vm1945_vm7, %v2796_v22  ;;  %v2826_v29 = vpop.permute.xlu2 %2825 }
 0x87c   : > { %v2828_v26 = vpop.permute.xlu0 %2827  ;;  %v2824_v27 = vpop.permute.xlu1 %2823 }
 0x87d   : > { %v2892_v4 = vpop.f32.mrf.mxu2  ;;  %4404 = vmatpush.xpose.msk.msra.mxu0 %vm1945_vm7, %v2824_v27  ;;  %4407 = vmatpush.xpose.msk.msrb.mxu1 %vm1945_vm7, %v2828_v26 }
 0x87e   : > { %v3078_v28 = vsel %vm3077_vm4, %v2892_v4, -inf }
 0x87f   : > { %3079 = vmax.xlane.f32.xlu0 %v3078_v28 }
 0x881   : > { %4405 = vmatpush.xpose.msk.msra.mxu0 %vm1945_vm7, %v2822_v23  ;;  %4408 = vmatpush.xpose.msk.msrb.mxu1 %vm1945_vm7, %v2826_v29 }
 0x884   : > { %v2798_v30 = vpop.permute.xlu1 %2797 }
 0x885   : > { %4406 = vmatmul.msk.f32.vlgmr.msra.gmra.mxu0 %vm1945_vm7, %v2798_v30 }
 0x886   : > { %v2918_v32 = vpop.f32.mrf.mxu3 }
 0x887   : > { %v3081_v2 = vsel %vm3077_vm4, %v2918_v32, -inf }
 0x888   : > { %3082 = vmax.xlane.f32.xlu1 %v3081_v2 }
 0x88c   : > { %v2800_v17 = vpop.permute.xlu1 %2799 }
 0x88d   : > { %4409 = vmatmul.msk.f32.vlgmr.msrb.gmra.mxu1 %vm1945_vm7, %v2800_v17 }
 0x8e1   : > { %v6029_v41 = vpop.f32.mrf.mxu3 }
 0x8e2   : > { %v3087_v49 = vsel %vm3077_vm4, %v6029_v41, -inf }
 0x8f0   : > { %v2944_v31 = vpop.f32.mrf.mxu2 }
 0x8f1   : > { %v3084_v58 = vsel %vm3077_vm4, %v2944_v31, -inf }
 0x8f2   : > { %3085 = vmax.xlane.f32.xlu2 %v3084_v58  ;;  %v3080_v50 = vpop.xlane.xlu0 %3079 }
 0x8f3   : > { %v3102_v51 = vsub.f32 %v2892_v4, %v3080_v50 }
 0x8f5   : > { %v3110_v52 = vmul.f32 1.442695, %v3102_v51 }
 0x8f7   : > { %4671 = vpow2.f32 %v3110_v52 }
 0x8f8   : > { %v2996_v21 = vpop.f32.mrf.mxu2  ;;  %v3022_v43 = vpop.f32.mrf.mxu3 }
 0x8f9   : > { %v3090_v42 = vsel %vm3077_vm4, %v2996_v21, -inf  ;;  %v3093_v44 = vsel %vm3077_vm4, %v3022_v43, -inf }
 0x8fa   : > { %3091 = vmax.xlane.f32.xlu0 %v3090_v42 }
 0x8fb   : > { %v3083_v53 = vpop.xlane.xlu1 %3082 }
 0x8fc   : > { %v3103_v55 = vsub.f32 %v2918_v32, %v3083_v53 }
 0x8fd   : > { %v6043_v54 = vpop.eup %4671 }
 0x8fe   : > { %v3126_v56 = vsel %vm3077_vm4, %v6043_v54, 0.0  ;;  %v3112_v59 = vmul.f32 1.442695, %v3103_v55 }
 0x900   : > { %4673 = vpow2.f32 %v3112_v59 }
 0x902   : > { %3094 = vmax.xlane.f32.xlu0 %v3093_v44  ;;  %v3048_v45 = vpop.f32.mrf.mxu0 }
 0x903   : > { %v3096_v46 = vsel %vm3077_vm4, %v3048_v45, -inf }
 0x904   : > { %3097 = vmax.xlane.f32.xlu1 %v3096_v46 }
 0x906   : > { %v6047_v60 = vpop.eup %4673 }
 0x907   : > { %v3129_v61 = vsel %vm3077_vm4, %v6047_v60, 0.0 }
 0x90a   : > { %v3074_v47 = vpop.f32.mrf.mxu1 }
 0x90b   : > { %v3099_v48 = vsel %vm3077_vm4, %v3074_v47, -inf }
 0x90c   : > { %3100 = vmax.xlane.f32.xlu2 %v3099_v48 }
 0x914   : > { %3088 = vmax.xlane.f32.xlu2 %v3087_v49 }
 0x916   : > { %4595 = vrot.lane.b32.xlu0 %v6026_v40, %s5108_s4 }
 0x91d   : > { %4590 = vrot.lane.b32.xlu1 %v6024_v37, %s5109_s23 }
 0x92c   : > { %4585 = vrot.lane.b32.xlu2 %v6024_v37, %s5108_s4 }
 0x947   : > { %3127 = vadd.xlane.f32.xlu1 %v3126_v56 }
 0x955   : > { %3130 = vadd.xlane.f32.xlu2 %v3129_v61 }
 0x965   : > { %v3086_v62 = vpop.xlane.xlu2 %3085 }
 0x966   : > { %v3104_v0 = vsub.f32 %v2944_v31, %v3086_v62 }
 0x968   : > { %v3114_v1 = vmul.f32 1.442695, %v3104_v0 }
 0x96a   : > { %4675 = vpow2.f32 %v3114_v1 }
 0x96d   : > { %v3092_v3 = vpop.xlane.xlu0 %3091 }
 0x96e   : > { %v3106_v5 = vsub.f32 %v2996_v21, %v3092_v3 }
 0x970   : > { %v6051_v6 = vpop.eup %4675  ;;  %v3118_v8 = vmul.f32 1.442695, %v3106_v5 }
 0x971   : > { %v3132_v9 = vsel %vm3077_vm4, %v6051_v6, 0.0 }
 0x972   : > { %4677 = vpow2.f32 %v3118_v8  ;;  %3133 = vadd.xlane.f32.xlu0 %v3132_v9 }
 0x975   : > { %v3095_v10 = vpop.xlane.xlu0 %3094 }
 0x976   : > { %v3107_v11 = vsub.f32 %v3022_v43, %v3095_v10 }
 0x977   : > { %v3098_v12 = vpop.xlane.xlu1 %3097 }
 0x978   : > { %v6055_v13 = vpop.eup %4677  ;;  %v3120_v15 = vmul.f32 1.442695, %v3107_v11  ;;  %v3108_v16 = vsub.f32 %v3048_v45, %v3098_v12 }
 0x979   : > { %v3138_v18 = vsel %vm3077_vm4, %v6055_v13, 0.0 }
 0x97a   : > { %4679 = vpow2.f32 %v3120_v15  ;;  %v3122_v20 = vmul.f32 1.442695, %v3108_v16  ;;  %3139 = vadd.xlane.f32.xlu1 %v3138_v18 }
 0x97c   : > { %4681 = vpow2.f32 %v3122_v20 }
 0x97f   : > { %v3101_v22 = vpop.xlane.xlu2 %3100 }
 0x980   : > { %v6059_v24 = vpop.eup %4679  ;;  %v3109_v23 = vsub.f32 %v3074_v47, %v3101_v22 }
 0x981   : > { %v3141_v26 = vsel %vm3077_vm4, %v6059_v24, 0.0 }
 0x982   : > { %v6063_v27 = vpop.eup %4681  ;;  %v3124_v4 = vmul.f32 1.442695, %v3109_v23  ;;  %3142 = vadd.xlane.f32.xlu1 %v3141_v26 }
 0x983   : > { %v3144_v28 = vsel %vm3077_vm4, %v6063_v27, 0.0 }
 0x984   : > { %4683 = vpow2.f32 %v3124_v4  ;;  %3145 = vadd.xlane.f32.xlu2 %v3144_v28 }
 0x987   : > { %v3089_v29 = vpop.xlane.xlu2 %3088 }
 0x988   : > { %v3105_v30 = vsub.f32 %v6029_v41, %v3089_v29  ;;  %v4596_v32 = vpop.permute.xlu0 %4595 }
 0x989   : > { %v4597_v2 = vunpack.i.l.bf16 %v4596_v32  ;;  %v4598_v34 = vunpack.i.h.bf16 %v4596_v32 }
 0x98a   : > { %v6068_v17 = vpop.eup %4683  ;;  %v3116_v33 = vmul.f32 1.442695, %v3105_v30 }
 0x98b   : > { %3356 = vmatpush.msra.mxu1 %v4597_v2  ;;  %v3147_v63 = vsel %vm3077_vm4, %v6068_v17, 0.0 }
 0x98c   : > { %4685 = vpow2.f32 %v3116_v33  ;;  %3148 = vadd.xlane.f32.xlu0 %v3147_v63 }
 0x98d   : > { %3357 = vmatpush.msra.mxu1 %v4598_v34 }
 0x98f   : > { %v4586_v36 = vpop.permute.xlu2 %4585  ;;  %v4591_v57 = vpop.permute.xlu1 %4590 }
 0x990   : > { %v4587_v7 = vunpack.i.l.bf16 %v4586_v36  ;;  %v4592_v35 = vunpack.i.l.bf16 %v4591_v57  ;;  %v4588_v39 = vunpack.i.h.bf16 %v4586_v36  ;;  %v4593_v31 = vunpack.i.h.bf16 %v4591_v57 }
 0x992   : > { %v6072_v38 = vpop.eup %4685  ;;  %3333 = vmatpush.msrb.mxu0 %v4587_v7  ;;  %3379 = vmatpush.msra.mxu2 %v4592_v35 }
 0x993   : > { %v3135_v58 = vsel %vm3077_vm4, %v6072_v38, 0.0 }
 0x994   : > { %3136 = vadd.xlane.f32.xlu0 %v3135_v58  ;;  %3334 = vmatpush.msrb.mxu0 %v4588_v39 }
 0x995   : > { %3380 = vmatpush.msra.mxu2 %v4593_v31 }
 0x99b   : > { %4610 = vrot.lane.b32.xlu1 %v6026_v40, %s5110_s18 }
 0x99c   : > { %4600 = vrot.lane.b32.xlu2 %v6024_v37, %s5110_s18 }
 0x9a8   : > { %4605 = vrot.lane.b32.xlu0 %v6026_v40, %s5109_s23 }
 0x9ba   : > { %v3128_v41 = vpop.xlane.xlu1 %3127 }
 0x9bb   : > { %4687 = vrcp.f32 %v3128_v41  ;;  %v3161_v44 = vand.u32 2147483648, %v3128_v41  ;;  %v3159_v46 = vand.u32 2147483647, %v3128_v41  ;;  %vm3155_vm10 = vweird.f32 %v3128_v41 }
 0x9bd   : > { %v3162_v49 = vor.u32 1.1754944e-38, %v3161_v44  ;;  %vm3160_vm5 = vcmp.eq.f32.partialorder %v3159_v46, 8.507059e+37 }
 0x9c1   : > { %v4688_v21 = vpop.eup %4687 }
 0x9c2   : > { %v3151_v42 = vmul.f32 %v4688_v21, %v3128_v41  ;;  %vm3156_vm6 = vweird.f32 %v4688_v21 }
 0x9c3   : > { %vm3157_vm11 = vmor %vm3155_vm10, %vm3156_vm6 }
 0x9c4   : > { %v3152_v43 = vsub.f32 1.0, %v3151_v42 }
 0x9c6   : > { %v3153_v45 = vmul.f32 %v4688_v21, %v3152_v43 }
 0x9c8   : > { %v3154_v47 = vadd.f32 %v4688_v21, %v3153_v45  ;;  %v3131_v48 = vpop.xlane.xlu2 %3130 }
 0x9c9   : > { %4689 = vrcp.f32 %v3131_v48  ;;  %v3175_v55 = vand.u32 2147483648, %v3131_v48  ;;  %v3173_v59 = vand.u32 2147483647, %v3131_v48  ;;  %vm3169_vm12 = vweird.f32 %v3131_v48 }
 0x9ca   : > { %v3158_v50 = vsel %vm3157_vm11, %v4688_v21, %v3154_v47 }
 0x9cb   : > { %v3163_v37 = vsel %vm3160_vm5, %v3162_v49, %v3158_v50  ;;  %v3176_v62 = vor.u32 1.1754944e-38, %v3175_v55  ;;  %vm3174_vm15 = vcmp.eq.f32.partialorder %v3173_v59, 8.507059e+37 }
 0x9cc   : > { %v3262_v40 = vmul.f32 %v6043_v54, %v3163_v37 }
 0x9ce   : > { %4410 = vmatmul.msk.f32.vlgmr.msrb.gmra.mxu2 %vm3077_vm4, %v3262_v40 }
 0x9cf   : > { %v4690_v51 = vpop.eup %4689 }
 0x9d0   : > { %v3165_v52 = vmul.f32 %v4690_v51, %v3131_v48  ;;  %vm3170_vm9 = vweird.f32 %v4690_v51 }
 0x9d1   : > { %vm3171_vm14 = vmor %vm3169_vm12, %vm3170_vm9 }
 0x9d2   : > { %v3166_v53 = vsub.f32 1.0, %v3165_v52 }
 0x9d4   : > { %v3167_v56 = vmul.f32 %v4690_v51, %v3166_v53 }
 0x9d6   : > { %v3168_v61 = vadd.f32 %v4690_v51, %v3167_v56 }
 0x9d8   : > { %v3172_v0 = vsel %vm3171_vm14, %v4690_v51, %v3168_v61 }
 0x9d9   : > { %v3177_v1 = vsel %vm3174_vm15, %v3176_v62, %v3172_v0 }
 0x9da   : > { %v3263_v3 = vmul.f32 %v6047_v60, %v3177_v1 }
 0x9dc   : > { %4411 = vmatmul.msk.f32.vlgmr.msrb.gmra.mxu3 %vm3077_vm4, %v3263_v3 }
 0x9e5   : > { %v3134_v54 = vpop.xlane.xlu0 %3133 }
 0x9e6   : > { %4691 = vrcp.f32 %v3134_v54  ;;  %v3189_v11 = vand.u32 2147483648, %v3134_v54  ;;  %v3187_v15 = vand.u32 2147483647, %v3134_v54  ;;  %vm3183_vm1 = vweird.f32 %v3134_v54 }
 0x9e8   : > { %v3190_v20 = vor.u32 1.1754944e-38, %v3189_v11  ;;  %vm3188_vm3 = vcmp.eq.f32.partialorder %v3187_v15, 8.507059e+37 }
 0x9ec   : > { %v4692_v5 = vpop.eup %4691 }
 0x9ed   : > { %v3179_v8 = vmul.f32 %v4692_v5, %v3134_v54  ;;  %v3140_v9 = vpop.xlane.xlu1 %3139  ;;  %vm3184_vm0 = vweird.f32 %v4692_v5 }
 0x9ee   : > { %4693 = vrcp.f32 %v3140_v9  ;;  %vm3185_vm2 = vmor %vm3183_vm1, %vm3184_vm0  ;;  %v3217_v29 = vand.u32 2147483648, %v3140_v9  ;;  %v3215_v32 = vand.u32 2147483647, %v3140_v9  ;;  %vm3211_vm10 = vweird.f32 %v3140_v9 }
 0x9ef   : > { %v3180_v10 = vsub.f32 1.0, %v3179_v8 }
 0x9f0   : > { %v3218_v33 = vor.u32 1.1754944e-38, %v3217_v29  ;;  %vm3216_vm5 = vcmp.eq.f32.partialorder %v3215_v32, 8.507059e+37 }
 0x9f1   : > { %v3181_v12 = vmul.f32 %v4692_v5, %v3180_v10 }
 0x9f3   : > { %v3182_v16 = vadd.f32 %v4692_v5, %v3181_v12 }
 0x9f4   : > { %v4694_v18 = vpop.eup %4693 }
 0x9f5   : > { %v3186_v22 = vsel %vm3185_vm2, %v4692_v5, %v3182_v16  ;;  %v3207_v60 = vmul.f32 %v4694_v18, %v3140_v9  ;;  %vm3212_vm6 = vweird.f32 %v4694_v18  ;;  %v6088_v34 = vpop.xlane.xlu1 %3142 }
 0x9f6   : > { %v3191_v23 = vsel %vm3188_vm3, %v3190_v20, %v3186_v22  ;;  %vm3213_vm11 = vmor %vm3211_vm10, %vm3212_vm6  ;;  %v3231_v8 = vand.u32 2147483648, %v6088_v34  ;;  %vm3225_vm3 = vweird.f32 %v6088_v34  ;;  %v3229_v10 = vand.u32 2147483647, %v6088_v34 }
 0x9f7   : > { %v3208_v26 = vsub.f32 1.0, %v3207_v60  ;;  %v3146_v4 = vpop.xlane.xlu2 %3145  ;;  %v3264_v28 = vmul.f32 %v6051_v6, %v3191_v23 }
 0x9f8   : > { %4695 = vrcp.f32 %v3146_v4  ;;  %v3245_v41 = vand.u32 2147483648, %v3146_v4  ;;  %v3243_v42 = vand.u32 2147483647, %v3146_v4  ;;  %vm3239_vm12 = vweird.f32 %v3146_v4 }
 0x9f9   : > { %v3209_v30 = vmul.f32 %v4694_v18, %v3208_v26  ;;  %4412 = vmatmul.msk.f32.vlgmr.msrb.gmra.mxu0 %vm3077_vm4, %v3264_v28  ;;  %4697 = vrcp.f32 %v6088_v34  ;;  %v3232_v60 = vor.u32 1.1754944e-38, %v3231_v8 }
 0x9fa   : > { %v3246_v46 = vor.u32 1.1754944e-38, %v3245_v41  ;;  %vm3244_vm15 = vcmp.eq.f32.partialorder %v3243_v42, 8.507059e+37  ;;  %v3496_v41 = vld [vmem:[%s6463_s16 + $0x60] sm:$0xff]  ;;  %v3494_v42 = vld [vmem:[%s6463_s16 + $0x50] sm:$0xff] }
 0x9fb   : > { %v3210_v2 = vadd.f32 %v4694_v18, %v3209_v30 }
 0x9fd   : > { %v3214_v63 = vsel %vm3213_vm11, %v4694_v18, %v3210_v2 }
 0x9fe   : > { %v4696_v36 = vpop.eup %4695  ;;  %v3219_v57 = vsel %vm3216_vm5, %v3218_v33, %v3214_v63 }
 0x9ff   : > { %v3235_v6 = vmul.f32 %v4696_v36, %v3146_v4  ;;  %v6091_v7 = vpop.xlane.xlu0 %3148  ;;  %v4601_v35 = vpop.permute.xlu2 %4600  ;;  %v3266_v39 = vmul.f32 %v6055_v13, %v3219_v57  ;;  %vm3240_vm9 = vweird.f32 %v4696_v36 }
 0xa00   : > { %v4602_v58 = vunpack.i.l.bf16 %v4601_v35  ;;  %4699 = vrcp.f32 %v6091_v7  ;;  %v4603_v43 = vunpack.i.h.bf16 %v4601_v35  ;;  %v4698_v44 = vpop.eup %4697  ;;  %vm3241_vm14 = vmor %vm3239_vm12, %vm3240_vm9  ;;  %v3259_v20 = vand.u32 2147483648, %v6091_v7 }
 0xa01   : > { %v3236_v31 = vsub.f32 1.0, %v3235_v6  ;;  %4414 = vmatmul.msk.f32.vlgmr.msra.gmra.mxu2 %vm3077_vm4, %v3266_v39  ;;  %v3221_v49 = vmul.f32 %v4698_v44, %v6088_v34  ;;  %vm3226_vm1 = vweird.f32 %v4698_v44  ;;  %vm3253_vm9 = vweird.f32 %v6091_v7  ;;  %v3499_v39 = vld [vmem:[%s6463_s16 + $0x78] sm:$0xff] }
 0xa02   : > { %3425 = vmatpush.msra.mxu0 %v4602_v58  ;;  %vm6103_vm10 = vmor %vm3225_vm3, %vm3226_vm1  ;;  %v3257_v23 = vand.u32 2147483647, %v6091_v7  ;;  %vm3230_vm12 = vcmp.eq.f32.partialorder %v3229_v10, 8.507059e+37  ;;  %v3260_v32 = vor.u32 1.1754944e-38, %v3259_v20  ;;  %3504 = vmatpush.msrb.mxu2 %v3499_v39  ;;  %v3497_v58 = vld [vmem:[%s6463_s16 + $0x68] sm:$0xff]  ;;  %v3609_v20 = vld [vmem:[%s6465_s30 + $0xe0] sm:$0xff] }
 0xa03   : > { %v3237_v21 = vmul.f32 %v4696_v36, %v3236_v31  ;;  %v3222_v51 = vsub.f32 1.0, %v3221_v49  ;;  %v3498_v31 = vld [vmem:[%s6463_s16 + $0x70] sm:$0xff] }
 0xa04   : > { %3426 = vmatpush.msra.mxu0 %v4603_v43  ;;  %3505 = vmatpush.msrb.mxu2 %v3498_v31  ;;  %v3493_v43 = vld [vmem:[%s6463_s16 + $0x48] sm:$0xff]  ;;  %v3486_v49 = vld [vmem:[%s6463_s16 + $0x10] sm:$0xff]  ;;  %v3592_v31 = vld [vmem:[%s6465_s30 + $0x58] sm:$0xff] }
 0xa05   : > { %v3238_v45 = vadd.f32 %v4696_v36, %v3237_v21  ;;  %v3223_v61 = vmul.f32 %v4698_v44, %v3222_v51  ;;  %v3495_v21 = vld [vmem:[%s6463_s16 + $0x58] sm:$0xff]  ;;  %v3591_v39 = vld [vmem:[%s6465_s30 + $0x50] sm:$0xff] }
 0xa06   : > { %v4700_v48 = vpop.eup %4699  ;;  %3506 = vmatpush.msrb.mxu2 %v3497_v58  ;;  %v3589_v58 = vld [vmem:[%s6465_s30 + $0x40] sm:$0xff] }
 0xa07   : > { %v3242_v47 = vsel %vm3241_vm14, %v4696_v36, %v3238_v45  ;;  %v3137_v13 = vpop.xlane.xlu0 %3136  ;;  %v3249_v40 = vmul.f32 %v4700_v48, %v6091_v7  ;;  %v3224_v5 = vadd.f32 %v4698_v44, %v3223_v61  ;;  %vm3254_vm11 = vweird.f32 %v4700_v48  ;;  %v3491_v45 = vld [vmem:[%s6463_s16 + $0x38] sm:$0xff] }
 0xa08   : > { %v3247_v50 = vsel %vm3244_vm15, %v3246_v46, %v3242_v47  ;;  %4701 = vrcp.f32 %v3137_v13  ;;  %v3203_v1 = vand.u32 2147483648, %v3137_v13  ;;  %vm3197_vm2 = vweird.f32 %v3137_v13  ;;  %vm3255_vm14 = vmor %vm3253_vm9, %vm3254_vm11  ;;  %3507 = vmatpush.msrb.mxu2 %v3496_v41  ;;  %v3490_v46 = vld [vmem:[%s6463_s16 + $0x30] sm:$0xff]  ;;  %v3489_v47 = vld [vmem:[%s6463_s16 + $0x28] sm:$0xff] }
 0xa09   : > { %v3268_v37 = vmul.f32 %v6063_v27, %v3247_v50  ;;  %v3250_v56 = vsub.f32 1.0, %v3249_v40  ;;  %v3201_v27 = vand.u32 2147483647, %v3137_v13  ;;  %v3228_v18 = vsel %vm6103_vm10, %v4698_v44, %v3224_v5  ;;  %v3492_v44 = vld [vmem:[%s6463_s16 + $0x40] sm:$0xff]  ;;  %v3485_v50 = vld [vmem:[%s6463_s16 + $0x8] sm:$0xff] }
 0xa0a   : > { %v3204_v11 = vor.u32 1.1754944e-38, %v3203_v1  ;;  %v3233_v28 = vsel %vm3230_vm12, %v3232_v60, %v3228_v18  ;;  %vm3258_vm15 = vcmp.eq.f32.partialorder %v3257_v23, 8.507059e+37  ;;  %3508 = vmatpush.msrb.mxu2 %v3495_v21  ;;  %v3611_v18 = vld [vmem:[%s6465_s30 + $0xf0] sm:$0xff]  ;;  %v3590_v41 = vld [vmem:[%s6465_s30 + $0x48] sm:$0xff] }
 0xa0b   : > { %4416 = vmatmul.msk.f32.vlgmr.msra.gmra.mxu0 %vm3077_vm4, %v3268_v37  ;;  %v3251_v3 = vmul.f32 %v4700_v48, %v3250_v56  ;;  %vm3202_vm5 = vcmp.eq.f32.partialorder %v3201_v27, 8.507059e+37  ;;  %v3267_v34 = vmul.f32 %v6059_v24, %v3233_v28  ;;  %v3484_v37 = vld [vmem:[%s6463_s16] sm:$0xff]  ;;  %v3607_v28 = vld [vmem:[%s6465_s30 + $0xd0] sm:$0xff] }
 0xa0c   : > { %3509 = vmatpush.msrb.mxu2 %v3494_v42  ;;  %v3587_v21 = vld [vmem:[%s6465_s30 + $0x30] sm:$0xff]  ;;  %v3588_v42 = vld [vmem:[%s6465_s30 + $0x38] sm:$0xff] }
 0xa0d   : > { %v4611_v52 = vpop.permute.xlu1 %4610  ;;  %v3252_v15 = vadd.f32 %v4700_v48, %v3251_v3 }
 0xa0e   : > { %v4702_v53 = vpop.eup %4701  ;;  %v4612_v55 = vunpack.i.l.bf16 %v4611_v52  ;;  %v4613_v62 = vunpack.i.h.bf16 %v4611_v52  ;;  %3510 = vmatpush.msrb.mxu2 %v3493_v43  ;;  %v3585_v43 = vld [vmem:[%s6465_s30 + $0x20] sm:$0xff] }
 0xa0f   : > { %v3193_v59 = vmul.f32 %v4702_v53, %v3137_v13  ;;  %vm3198_vm0 = vweird.f32 %v4702_v53  ;;  %v3256_v29 = vsel %vm3255_vm14, %v4700_v48, %v3252_v15  ;;  %v3488_v13 = vld [vmem:[%s6463_s16 + $0x20] sm:$0xff]  ;;  %v3487_v48 = vld [vmem:[%s6463_s16 + $0x18] sm:$0xff] }
 0xa10   : > { %3448 = vmatpush.msrb.mxu1 %v4612_v55  ;;  %vm3199_vm6 = vmor %vm3197_vm2, %vm3198_vm0  ;;  %v3261_v33 = vsel %vm3258_vm15, %v3260_v32, %v3256_v29  ;;  %3511 = vmatpush.msrb.mxu2 %v3492_v44  ;;  %v3608_v29 = vld [vmem:[%s6465_s30 + $0xd8] sm:$0xff]  ;;  %v3606_v32 = vld [vmem:[%s6465_s30 + $0xc8] sm:$0xff] }
 0xa11   : > { %v3194_v0 = vsub.f32 1.0, %v3193_v59  ;;  %v3586_v44 = vld [vmem:[%s6465_s30 + $0x28] sm:$0xff] }
 0xa12   : > { %3449 = vmatpush.msrb.mxu1 %v4613_v62  ;;  %3512 = vmatpush.msrb.mxu2 %v3491_v45  ;;  %v3583_v45 = vld [vmem:[%s6465_s30 + $0x10] sm:$0xff] }
 0xa13   : > { %v3195_v54 = vmul.f32 %v4702_v53, %v3194_v0 }
 0xa14   : > { %3513 = vmatpush.msrb.mxu2 %v3490_v46  ;;  %v3584_v46 = vld [vmem:[%s6465_s30 + $0x18] sm:$0xff] }
 0xa15   : > { %v3196_v9 = vadd.f32 %v4702_v53, %v3195_v54  ;;  %v4625_v54 = vld [vmem:[%s1655_s20] ss:$0 sm:$0xff] }
 0xa16   : > { %3514 = vmatpush.msrb.mxu2 %v3489_v47  ;;  %v3581_v47 = vld [vmem:[%s6465_s30] sm:$0xff] }
 0xa17   : > { %v3200_v16 = vsel %vm3199_vm6, %v4702_v53, %v3196_v9 }
 0xa18   : > { %v3205_v22 = vsel %vm3202_vm5, %v3204_v11, %v3200_v16  ;;  %3515 = vmatpush.msrb.mxu2 %v3488_v13  ;;  %v3582_v13 = vld [vmem:[%s6465_s30 + $0x8] sm:$0xff] }
 0xa19   : > { %v3265_v26 = vmul.f32 %v6072_v38, %v3205_v22  ;;  %v3269_v38 = vmul.f32 %v6068_v17, %v3261_v33  ;;  %v3610_v22 = vld [vmem:[%s6465_s30 + $0xe8] sm:$0xff]  ;;  %v3604_v33 = vld [vmem:[%s6465_s30 + $0xb8] sm:$0xff] }
 0xa1a   : > { %v4606_v4 = vpop.permute.xlu0 %4605  ;;  %3516 = vmatpush.msrb.mxu2 %v3487_v48 }
 0xa1b   : > { %v4607_v30 = vunpack.i.l.bf16 %v4606_v4  ;;  %4413 = vmatmul.msk.f32.vlgmr.msra.gmra.mxu1 %vm3077_vm4, %v3265_v26  ;;  %v4608_v2 = vunpack.i.h.bf16 %v4606_v4 }
 0xa1c   : > { %3517 = vmatpush.msrb.mxu2 %v3486_v49 }
 0xa1d   : > { %3402 = vmatpush.msra.mxu3 %v4607_v30  ;;  %v3605_v30 = vld [vmem:[%s6465_s30 + $0xc0] sm:$0xff] }
 0xa1e   : > { %3518 = vmatpush.msrb.mxu2 %v3485_v50 }
 0xa1f   : > { %3403 = vmatpush.msra.mxu3 %v4608_v2  ;;  %v3603_v2 = vld [vmem:[%s6465_s30 + $0xb0] sm:$0xff] }
 0xa20   : > { %4415 = vmatmul.msk.f32.vlgmr.msra.gmra.mxu3 %vm3077_vm4, %v3267_v34  ;;  %3519 = vmatpush.msrb.mxu2 %v3484_v37  ;;  %v3601_v34 = vld [vmem:[%s6465_s30 + $0xa0] sm:$0xff] }
 0xa21   : > { %3619 = vmatpush.msrb.mxu3 %v3611_v18 }
 0xa23   : > { %4417 = vmatmul.msk.f32.vlgmr.msrb.gmra.mxu1 %vm3077_vm4, %v3269_v38  ;;  %3620 = vmatpush.msrb.mxu3 %v3609_v20  ;;  %v3602_v38 = vld [vmem:[%s6465_s30 + $0xa8] sm:$0xff]  ;;  %v3681_v20 = vld [vmem:[%s5611_s21 + $0x60] sm:$0xff] }
 0xa25   : > { %3621 = vmatpush.msrb.mxu3 %v3607_v28  ;;  %v3678_v28 = vld [vmem:[%s5611_s21 + $0x48] sm:$0xff] }
 0xa27   : > { %3622 = vmatpush.msrb.mxu3 %v3605_v30  ;;  %v3692_v30 = vld [vmem:[%s5611_s21 + $0xb8] sm:$0xff] }
 0xa29   : > { %3623 = vmatpush.msrb.mxu3 %v3603_v2 }
 0xa2b   : > { %3624 = vmatpush.msrb.mxu3 %v3601_v34  ;;  %v3676_v34 = vld [vmem:[%s5611_s21 + $0x38] sm:$0xff] }
 0xa51   : > { %v3290_v36 = vpop.f32.mrf.mxu2 }
 0xa5f   : > { %v3313_v17 = vpop.f32.mrf.mxu3 }
 0xa76   : > { %v3336_v63 = vpop.f32.mrf.mxu0 }
 0xa77   : > { %3456 = vrot.lane.b32.xlu2 %v3336_v63, %s5110_s18  ;;  %v3599_v63 = vld [vmem:[%s6465_s30 + $0x90] sm:$0xff] }
 0xa78   : > { %3625 = vmatpush.msrb.mxu3 %v3599_v63  ;;  %v3690_v63 = vld [vmem:[%s5611_s21 + $0xa8] sm:$0xff] }
 0xa84   : > { %v3382_v57 = vpop.f32.mrf.mxu2 }
 0xa85   : > { %3464 = vrot.lane.b32.xlu0 %v3382_v57, %s5109_s23  ;;  %v3597_v57 = vld [vmem:[%s6465_s30 + $0x80] sm:$0xff] }
 0xa86   : > { %3626 = vmatpush.msrb.mxu3 %v3597_v57 }
 0xa88   : > { %v3428_v6 = vpop.f32.mrf.mxu0 }
 0xa89   : > { %3472 = vrot.lane.b32.xlu1 %v3428_v6, %s5108_s4  ;;  %v3598_v6 = vld [vmem:[%s6465_s30 + $0x88] sm:$0xff] }
 0xa98   : > { %v3359_v24 = vpop.f32.mrf.mxu1 }
 0xa99   : > { %3458 = vrot.lane.b32.xlu2 %v3359_v24, %s5110_s18  ;;  %v3595_v24 = vld [vmem:[%s6465_s30 + $0x70] sm:$0xff] }
 0xa9a   : > { %3627 = vmatpush.msrb.mxu3 %v3595_v24 }
 0xaa0   : > { %v3451_v7 = vpop.f32.mrf.mxu1 }
 0xaa1   : > { %3474 = vrot.lane.b32.xlu1 %v3451_v7, %s5108_s4  ;;  %v3593_v7 = vld [vmem:[%s6465_s30 + $0x60] sm:$0xff] }
 0xaa2   : > { %3628 = vmatpush.msrb.mxu3 %v3593_v7 }
 0xaa3   : > { %v3405_v35 = vpop.f32.mrf.mxu3 }
 0xaa4   : > { %3466 = vrot.lane.b32.xlu0 %v3405_v35, %s5109_s23  ;;  %v3594_v35 = vld [vmem:[%s6465_s30 + $0x68] sm:$0xff]  ;;  %3629 = vmatpush.msrb.mxu3 %v3591_v39 }
 0xaa6   : > { %3630 = vmatpush.msrb.mxu3 %v3589_v58 }
 0xaa8   : > { %3631 = vmatpush.msrb.mxu3 %v3587_v21  ;;  %v3687_v21 = vld [vmem:[%s5611_s21 + $0x90] sm:$0xff] }
 0xaaa   : > { %3632 = vmatpush.msrb.mxu3 %v3585_v43  ;;  %v3686_v43 = vld [vmem:[%s5611_s21 + $0x88] sm:$0xff] }
 0xaac   : > { %3633 = vmatpush.msrb.mxu3 %v3583_v45  ;;  %v3671_v45 = vld [vmem:[%s5611_s21 + $0x10] sm:$0xff] }
 0xaae   : > { %3634 = vmatpush.msrb.mxu3 %v3581_v47  ;;  %v3669_v47 = vld [vmem:[%s5611_s21] sm:$0xff] }
 0xad1   : > { %v3457_v40 = vpop.permute.xlu2 %3456 }
 0xad2   : > { %v3478_v52 = vsel %vm1945_vm7, %v3290_v36, %v3457_v40  ;;  %v3600_v36 = vld [vmem:[%s6465_s30 + $0x98] sm:$0xff] }
 0xaf3   : > { %v3459_v59 = vpop.permute.xlu2 %3458 }
 0xaf4   : > { %v3479_v61 = vsel %vm1945_vm7, %v3313_v17, %v3459_v59  ;;  %v3596_v17 = vld [vmem:[%s6465_s30 + $0x78] sm:$0xff] }
 0xaf7   : > { %v3465_v51 = vpop.permute.xlu0 %3464 }
 0xaf8   : > { %v3480_v53 = vsel %vm2541_vm8, %v3478_v52, %v3465_v51 }
 0xafb   : > { %v3473_v55 = vpop.permute.xlu1 %3472 }
 0xafc   : > { %v3482_v56 = vsel %vm2544_vm13, %v3480_v53, %v3473_v55 }
 0xafd   : > { %3520 = vmatmul.f32.vlgmr.msrb.gmra.mxu2 %v3482_v56  ;;  %v6205_v56 = vld [vmem:[%s1677_s5] ss:$0 sm:$0xff] }
 0xb13   : > { %v3475_v0 = vpop.permute.xlu1 %3474 }
 0xb16   : > { %v3467_v62 = vpop.permute.xlu0 %3466 }
 0xb17   : > { %v3481_v1 = vsel %vm2541_vm8, %v3479_v61, %v3467_v62  ;;  %v6211_v62 = vld [vmem:[%s1680_s8] ss:$0 sm:$0xff] }
 0xb18   : > { %v3483_v3 = vsel %vm2544_vm13, %v3481_v1, %v3475_v0  ;;  %v3700_v1 = vld [vmem:[%s5611_s21 + $0xf8] sm:$0xff] }
 0xb19   : > { %3523 = vmatmul.f32.gmra.mxu2 %v3483_v3  ;;  %v3699_v3 = vld [vmem:[%s5611_s21 + $0xf0] sm:$0xff] }
 0xb1a   : > { %3724 = vmatpush.msra.mxu2 %v3700_v1 }
 0xb1c   : > { %3725 = vmatpush.msra.mxu2 %v3699_v3 }
 0xb80   : > { %v3521_v27 = vpop.f32.mrf.mxu2 }
 0xb81   : > { %v3522_v5 = vadd.f32 %v4625_v54, %v3521_v27 }
 0xb83   : > { %v6150_v8 = vadd.f32 %v3522_v5, %v5879_v19  ;;  %v3612_v19 = vld [vmem:[%s6465_s30 + $0xf8] sm:$0xff] }
 0xb84   : > { %3642 = vmatpush.msrb.mxu0 %v3612_v19  ;;  %v3698_v5 = vld [vmem:[%s5611_s21 + $0xe8] sm:$0xff]  ;;  %v3696_v19 = vld [vmem:[%s5611_s21 + $0xd8] sm:$0xff] }
 0xb85   : > { %3531 = vadd.xlane.f32.xlu2 %v6150_v8  ;;  %3726 = vmatpush.msra.mxu2 %v3698_v5 }
 0xb86   : > { %3643 = vmatpush.msrb.mxu0 %v3610_v22  ;;  %v3695_v22 = vld [vmem:[%s5611_s21 + $0xd0] sm:$0xff] }
 0xb88   : > { %3644 = vmatpush.msrb.mxu0 %v3608_v29 }
 0xb8a   : > { %3645 = vmatpush.msrb.mxu0 %v3606_v32  ;;  %v3677_v32 = vld [vmem:[%s5611_s21 + $0x40] sm:$0xff] }
 0xb8c   : > { %3646 = vmatpush.msrb.mxu0 %v3604_v33  ;;  %v3691_v33 = vld [vmem:[%s5611_s21 + $0xb0] sm:$0xff] }
 0xb8e   : > { %3647 = vmatpush.msrb.mxu0 %v3602_v38 }
 0xb90   : > { %3648 = vmatpush.msrb.mxu0 %v3600_v36  ;;  %v3675_v36 = vld [vmem:[%s5611_s21 + $0x30] sm:$0xff] }
 0xb92   : > { %3649 = vmatpush.msrb.mxu0 %v3598_v6  ;;  %v3689_v6 = vld [vmem:[%s5611_s21 + $0xa0] sm:$0xff] }
 0xb94   : > { %3650 = vmatpush.msrb.mxu0 %v3596_v17  ;;  %v3688_v17 = vld [vmem:[%s5611_s21 + $0x98] sm:$0xff] }
 0xb96   : > { %3651 = vmatpush.msrb.mxu0 %v3594_v35 }
 0xb98   : > { %3652 = vmatpush.msrb.mxu0 %v3592_v31 }
 0xb9a   : > { %3653 = vmatpush.msrb.mxu0 %v3590_v41  ;;  %v3674_v41 = vld [vmem:[%s5611_s21 + $0x28] sm:$0xff] }
 0xb9c   : > { %v3524_v9 = vpop.f32.mrf.mxu2  ;;  %3654 = vmatpush.msrb.mxu0 %v3588_v42  ;;  %v3673_v42 = vld [vmem:[%s5611_s21 + $0x20] sm:$0xff] }
 0xb9d   : > { %v3525_v10 = vadd.f32 %v4625_v54, %v3524_v9  ;;  %v3684_v54 = vld [vmem:[%s5611_s21 + $0x78] sm:$0xff]  ;;  %v3683_v9 = vld [vmem:[%s5611_s21 + $0x70] sm:$0xff] }
 0xb9e   : > { %3655 = vmatpush.msrb.mxu0 %v3586_v44  ;;  %3701 = vmatpush.msra.mxu1 %v3684_v54  ;;  %v3672_v44 = vld [vmem:[%s5611_s21 + $0x18] sm:$0xff] }
 0xb9f   : > { %v6154_v11 = vadd.f32 %v3525_v10, %v5882_v25 }
 0xba0   : > { %3656 = vmatpush.msrb.mxu0 %v3584_v46  ;;  %3702 = vmatpush.msra.mxu1 %v3683_v9  ;;  %v3670_v46 = vld [vmem:[%s5611_s21 + $0x8] sm:$0xff] }
 0xba1   : > { %3533 = vadd.xlane.f32.xlu0 %v6154_v11 }
 0xba2   : > { %3657 = vmatpush.msrb.mxu0 %v3582_v13  ;;  %v3613_v13 = vld [vmem:[%s5592_s2] sm:$0x3] }
 0xbf8   : > { %v3532_v12 = vpop.xlane.xlu2 %3531 }
 0xbf9   : > { %v3535_v15 = vmul.f32 %v3532_v12, %v5618_v14 }
 0xbfb   : > { %v6159_v16 = vsub.f32 %v6150_v8, %v3535_v15  ;;  %v3697_v15 = vld [vmem:[%s5611_s21 + $0xe0] sm:$0xff] }
 0xbfc   : > { %3727 = vmatpush.msra.mxu2 %v3697_v15 }
 0xbfd   : > { %v3539_v25 = vmul.f32 %v6159_v16, %v6159_v16 }
 0xbfe   : > { %3728 = vmatpush.msra.mxu2 %v3696_v19 }
 0xbff   : > { %3541 = vadd.xlane.f32.xlu1 %v3539_v25  ;;  %v3680_v25 = vld [vmem:[%s5611_s21 + $0x58] sm:$0xff] }
 0xc00   : > { %3729 = vmatpush.msra.mxu2 %v3695_v22 }
 0xc14   : > { %v3534_v60 = vpop.xlane.xlu0 %3533 }
 0xc15   : > { %v3536_v23 = vmul.f32 %v3534_v60, %v5618_v14  ;;  %v3694_v60 = vld [vmem:[%s5611_s21 + $0xc8] sm:$0xff] }
 0xc16   : > { %3730 = vmatpush.msra.mxu2 %v3694_v60 }
 0xc17   : > { %v6169_v26 = vsub.f32 %v6154_v11, %v3536_v23  ;;  %v3679_v23 = vld [vmem:[%s5611_s21 + $0x50] sm:$0xff] }
 0xc19   : > { %v3540_v4 = vmul.f32 %v6169_v26, %v6169_v26 }
 0xc1b   : > { %3543 = vadd.xlane.f32.xlu2 %v3540_v4  ;;  %v3693_v4 = vld [vmem:[%s5611_s21 + $0xc0] sm:$0xff] }
 0xc1c   : > { %3731 = vmatpush.msra.mxu2 %v3693_v4 }
 0xc1e   : > { %3732 = vmatpush.msra.mxu2 %v3692_v30 }
 0xc20   : > { %3733 = vmatpush.msra.mxu2 %v3691_v33 }
 0xc22   : > { %3734 = vmatpush.msra.mxu2 %v3690_v63 }
 0xc24   : > { %3735 = vmatpush.msra.mxu2 %v3689_v6 }
 0xc26   : > { %3736 = vmatpush.msra.mxu2 %v3688_v17 }
 0xc28   : > { %3737 = vmatpush.msra.mxu2 %v3687_v21 }
 0xc2a   : > { %3738 = vmatpush.msra.mxu2 %v3686_v43 }
 0xc72   : > { %v3542_v48 = vpop.xlane.xlu1 %3541 }
 0xc73   : > { %v3545_v49 = vmul.f32 %v3542_v48, %v5618_v14  ;;  %v3616_v48 = vperm.slane %v3613_v13, 1 }
 0xc75   : > { %v3547_v50 = vadd.f32 1e-05, %v3545_v49 }
 0xc77   : > { %4703 = vrsqrt.f32 %v3547_v50  ;;  %vm3555_vm8 = vweird.f32 %v3547_v50 }
 0xc7d   : > { %v4704_v37 = vpop.eup %4703 }
 0xc7e   : > { %v3550_v40 = vmul.f32 %v4704_v37, %v3547_v50  ;;  %vm3556_vm7 = vweird.f32 %v4704_v37 }
 0xc7f   : > { %vm3557_vm13 = vmor %vm3555_vm8, %vm3556_vm7 }
 0xc80   : > { %v3551_v51 = vmul.f32 %v4704_v37, %v3550_v40  ;;  %v3615_v40 = vperm.slane %v3613_v13, 0 }
 0xc82   : > { %v3552_v52 = vmul.f32 0.5, %v3551_v51 }
 0xc84   : > { %v3553_v53 = vsub.f32 1.5, %v3552_v52 }
 0xc86   : > { %v3554_v55 = vmul.f32 %v4704_v37, %v3553_v53 }
 0xc88   : > { %v3558_v59 = vsel %vm3557_vm13, %v4704_v37, %v3554_v55 }
 0xc89   : > { %v3569_v61 = vmul.f32 %v3558_v59, %v6159_v16  ;;  %v3682_v16 = vld [vmem:[%s5611_s21 + $0x68] sm:$0xff] }
 0xc8a   : > { %3703 = vmatpush.msra.mxu1 %v3682_v16 }
 0xc8b   : > { %v3574_v0 = vmul.f32 %v6205_v56, %v3569_v61 }
 0xc8c   : > { %3704 = vmatpush.msra.mxu1 %v3681_v20 }
 0xc8d   : > { %v3579_v27 = vadd.f32 %v6211_v62, %v3574_v0 }
 0xc8e   : > { %v3544_v10 = vpop.xlane.xlu2 %3543  ;;  %3705 = vmatpush.msra.mxu1 %v3680_v25 }
 0xc8f   : > { %v3546_v12 = vmul.f32 %v3544_v10, %v5618_v14  ;;  %3635 = vmatmul.f32.vlgmr.msrb.gmra.mxu3 %v3579_v27  ;;  %3658 = vmatmul.f32.vlgmr.msrb.gmra.mxu0 %v3579_v27  ;;  %v4628_v27 = vld [vmem:[%s1662_s0] ss:$0 sm:$0xff] }
 0xc90   : > { %3706 = vmatpush.msra.mxu1 %v3679_v23 }
 0xc91   : > { %v3548_v18 = vadd.f32 1e-05, %v3546_v12 }
 0xc92   : > { %3707 = vmatpush.msra.mxu1 %v3678_v28 }
 0xc93   : > { %4705 = vrsqrt.f32 %v3548_v18  ;;  %vm3565_vm0 = vweird.f32 %v3548_v18 }
 0xc94   : > { %3708 = vmatpush.msra.mxu1 %v3677_v32 }
 0xc96   : > { %3709 = vmatpush.msra.mxu1 %v3676_v34 }
 0xc98   : > { %3710 = vmatpush.msra.mxu1 %v3675_v36 }
 0xc99   : > { %v4706_v29 = vpop.eup %4705 }
 0xc9a   : > { %v3560_v2 = vmul.f32 %v4706_v29, %v3548_v18  ;;  %vm3566_vm4 = vweird.f32 %v4706_v29  ;;  %3711 = vmatpush.msra.mxu1 %v3674_v41 }
 0xc9b   : > { %vm3567_vm1 = vmor %vm3565_vm0, %vm3566_vm4 }
 0xc9c   : > { %v3561_v38 = vmul.f32 %v4706_v29, %v3560_v2  ;;  %3712 = vmatpush.msra.mxu1 %v3673_v42 }
 0xc9e   : > { %v3562_v57 = vmul.f32 0.5, %v3561_v38  ;;  %3713 = vmatpush.msra.mxu1 %v3672_v44 }
 0xca0   : > { %v3563_v24 = vsub.f32 1.5, %v3562_v57  ;;  %3714 = vmatpush.msra.mxu1 %v3671_v45 }
 0xca2   : > { %v3564_v7 = vmul.f32 %v4706_v29, %v3563_v24  ;;  %3715 = vmatpush.msra.mxu1 %v3670_v46 }
 0xca4   : > { %v3568_v35 = vsel %vm3567_vm1, %v4706_v29, %v3564_v7  ;;  %3716 = vmatpush.msra.mxu1 %v3669_v47 }
 0xca5   : > { %v3570_v39 = vmul.f32 %v3568_v35, %v6169_v26  ;;  %v3685_v26 = vld [vmem:[%s5611_s21 + $0x80] sm:$0xff]  ;;  %s6469_s21 = sld [smem:[#allocation57_spill]] }
 0xca6   : > { %3739 = vmatpush.msra.mxu2 %v3685_v26 }
 0xca7   : > { %v3575_v31 = vmul.f32 %v6205_v56, %v3570_v39 }
 0xca9   : > { %v3580_v58 = vadd.f32 %v6211_v62, %v3575_v31 }
 0xcab   : > { %3638 = vmatmul.f32.gmra.mxu3 %v3580_v58  ;;  %3661 = vmatmul.f32.gmra.mxu0 %v3580_v58  ;;  %p4418_p7 = scmp.ne.s32.totalorder %s6469_s21, 1 }
 0xcac   : > { %s6470_s27 = sld [smem:[#allocation52_spill]] (!%p4418_p7) }
 0xcad   : > { %s6471_s0 = sld [smem:[#allocation53_spill]] (!%p4418_p7) }
 0xd0c   : > { %v3659_v49 = vpop.f32.mrf.mxu0 }
 0xd0d   : > { %v3660_v50 = vadd.f32 %v3659_v49, %v3616_v48 }
 0xd0f   : > { %v3666_v37 = vmax.f32 %v3660_v50, 0.0 }
 0xd11   : > { %3740 = vmatmul.f32.vlgmr.msra.gmra.mxu2 %v3666_v37 }
 0xd12   : > { %v3636_v51 = vpop.f32.mrf.mxu3 }
 0xd13   : > { %v3637_v52 = vadd.f32 %v3636_v51, %v3615_v40 }
 0xd15   : > { %v3665_v53 = vmax.f32 %v3637_v52, 0.0 }
 0xd17   : > { %3717 = vmatmul.f32.vlgmr.msra.gmra.mxu1 %v3665_v53 }
 0xd28   : > { %v3662_v55 = vpop.f32.mrf.mxu0 }
 0xd29   : > { %v3663_v56 = vadd.f32 %v3662_v55, %v3616_v48 }
 0xd2b   : > { %v3668_v59 = vmax.f32 %v3663_v56, 0.0 }
 0xd2d   : > { %3743 = vmatmul.f32.gmra.mxu2 %v3668_v59 }
 0xd2e   : > { %v3639_v61 = vpop.f32.mrf.mxu3 }
 0xd2f   : > { %v3640_v62 = vadd.f32 %v3639_v61, %v3615_v40 }
 0xd31   : > { %v3667_v0 = vmax.f32 %v3640_v62, 0.0 }
 0xd33   : > { %3720 = vmatmul.f32.gmra.mxu1 %v3667_v0 }
 0xd94   : > { %v3718_v1 = vpop.f32.mrf.mxu1  ;;  %v3741_v3 = vpop.f32.mrf.mxu2 }
 0xd95   : > { %v3742_v54 = vadd.f32 %v3741_v3, %v3718_v1 }
 0xd97   : > { %v3747_v5 = vadd.f32 %v3742_v54, %v6150_v8 }
 0xd99   : > { %v3753_v9 = vadd.f32 %v4628_v27, %v3747_v5 }
 0xd9b   : > { %3755 = vst [vmem:[#allocation2] sm:$0xff] %v3753_v9 }
 0xdb0   : > { %v3721_v10 = vpop.f32.mrf.mxu1  ;;  %v3744_v12 = vpop.f32.mrf.mxu2 }
 0xdb1   : > { %v3745_v15 = vadd.f32 %v3744_v12, %v3721_v10 }
 0xdb3   : > { %v3748_v16 = vadd.f32 %v3745_v15, %v6154_v11  ;;  %3760 = sbr.rel (%p4418_p7) target bundleno = 3787 (0xecb), region = 192 }
 0xdb5   : > { %v3754_v18 = vadd.f32 %v4628_v27, %v3748_v16 }
 0xdb7   : > { %3756 = vst [vmem:[#allocation2 + $0x8] sm:$0xff] %v3754_v18 }
 0xdb8   : > { %3763 = vadd.xlane.f32.xlu0 %v3753_v9  ;;  %v4711_v17 = vld [vmem:[%s6470_s27] ss:$0 sm:$0xff] }
 0xdb9   : > { %v4712_v39 = vld [vmem:[%s6471_s0] ss:$0 sm:$0xff] }
 0xdc0   : > { %3765 = vadd.xlane.f32.xlu0 %v3754_v18 }
 0xe2b   : > { %v3764_v19 = vpop.xlane.xlu0 %3763 }
 0xe2c   : > { %v3767_v20 = vmul.f32 %v3764_v19, %v5618_v14 }
 0xe2e   : > { %v3769_v22 = vsub.f32 %v3753_v9, %v3767_v20 }
 0xe30   : > { %v3771_v25 = vmul.f32 %v3769_v22, %v3769_v22 }
 0xe32   : > { %3773 = vadd.xlane.f32.xlu1 %v3771_v25 }
 0xe33   : > { %v3766_v8 = vpop.xlane.xlu0 %3765 }
 0xe34   : > { %v3768_v60 = vmul.f32 %v3766_v8, %v5618_v14 }
 0xe36   : > { %v3770_v23 = vsub.f32 %v3754_v18, %v3768_v60 }
 0xe38   : > { %v3772_v4 = vmul.f32 %v3770_v23, %v3770_v23 }
 0xe3a   : > { %3775 = vadd.xlane.f32.xlu1 %v3772_v4 }
 0xea5   : > { %v3774_v11 = vpop.xlane.xlu1 %3773 }
 0xea6   : > { %v3777_v28 = vmul.f32 %v3774_v11, %v5618_v14 }
 0xea8   : > { %v3779_v29 = vadd.f32 1e-05, %v3777_v28 }
 0xeaa   : > { %4713 = vrsqrt.f32 %v3779_v29  ;;  %vm3787_vm3 = vweird.f32 %v3779_v29 }
 0xead   : > { %v3776_v30 = vpop.xlane.xlu1 %3775 }
 0xeae   : > { %v3778_v32 = vmul.f32 %v3776_v30, %v5618_v14 }
 0xeb0   : > { %v4714_v2 = vpop.eup %4713  ;;  %v3780_v33 = vadd.f32 1e-05, %v3778_v32 }
 0xeb1   : > { %v3782_v34 = vmul.f32 %v4714_v2, %v3779_v29  ;;  %vm3788_vm2 = vweird.f32 %v4714_v2 }
 0xeb2   : > { %4715 = vrsqrt.f32 %v3780_v33  ;;  %vm3789_vm6 = vmor %vm3787_vm3, %vm3788_vm2  ;;  %vm3797_vm11 = vweird.f32 %v3780_v33 }
 0xeb3   : > { %v3783_v38 = vmul.f32 %v4714_v2, %v3782_v34 }
 0xeb5   : > { %v3784_v63 = vmul.f32 0.5, %v3783_v38 }
 0xeb7   : > { %v3785_v36 = vsub.f32 1.5, %v3784_v63 }
 0xeb8   : > { %v4716_v57 = vpop.eup %4715 }
 0xeb9   : > { %v3786_v6 = vmul.f32 %v4714_v2, %v3785_v36  ;;  %v3792_v24 = vmul.f32 %v4716_v57, %v3780_v33  ;;  %vm3798_vm10 = vweird.f32 %v4716_v57 }
 0xeba   : > { %vm3799_vm5 = vmor %vm3797_vm11, %vm3798_vm10 }
 0xebb   : > { %v3790_v7 = vsel %vm3789_vm6, %v4714_v2, %v3786_v6  ;;  %v3793_v35 = vmul.f32 %v4716_v57, %v3792_v24 }
 0xebc   : > { %v3801_v14 = vmul.f32 %v3790_v7, %v3769_v22 }
 0xebd   : > { %v3794_v31 = vmul.f32 0.5, %v3793_v35 }
 0xebe   : > { %v3806_v58 = vmul.f32 %v4711_v17, %v3801_v14 }
 0xebf   : > { %v3795_v41 = vsub.f32 1.5, %v3794_v31 }
 0xec0   : > { %v3811_v21 = vadd.f32 %v4712_v39, %v3806_v58 }
 0xec1   : > { %v3796_v42 = vmul.f32 %v4716_v57, %v3795_v41 }
 0xec2   : > { %3813 = vst [vmem:[%s5607_s22] sm:$0xff] %v3811_v21 }
 0xec3   : > { %v3800_v43 = vsel %vm3799_vm5, %v4716_v57, %v3796_v42 }
 0xec4   : > { %v3802_v44 = vmul.f32 %v3800_v43, %v3770_v23 }
 0xec6   : > { %v3807_v26 = vmul.f32 %v4711_v17, %v3802_v44 }
 0xec8   : > { %v3812_v45 = vadd.f32 %v4712_v39, %v3807_v26 }
 0xeca   : > { %3814 = vst [vmem:[%s5607_s22 + $0x8] sm:$0xff] %v3812_v45 }
 0xecb PF: > { %s6472_s2 = sld [smem:[#allocation61_spill]] }
 0xecc   : > { %s6473_s28 = sld [smem:[#allocation55_spill]] }
 0xecd   : > { %s6474_s1 = sld [smem:[#allocation56_spill]] }
 0xece   : > { %s6476_s7 = sld [smem:[#allocation59_spill]] }
 0xecf   : > { %s6477_s0 = sld [smem:[#allocation60_spill]] }
 0xed0   : > { %s6478_s10 = sld [smem:[#allocation62_spill]] }
 0xed1   : > { %s90_s15 = sadd.s32 1, %s6472_s2   ;;  %s6475_s2 = sld [smem:[#allocation64_spill]] }
 0xed2   : > { %p87_p3 = scmp.ge.s32.totalorder %s90_s15, 6   ;;  %s6479_s11 = sld [smem:[#allocation63_spill]] }
 0xed4   :  { %89 = sbr.rel (!%p87_p3) target bundleno = 83 (0x53), region = 387 }
 0xed9   :  { %3837 = vsyncpa [#allocation4], 1 }
 0xeda   :  { %3839 = vsyncpa [#allocation4 + $0x1], 1 }
 0xedb   :  { %3840 = vsyncpa [#allocation6], 1 }
 0xedc   :  { %3842 = vsyncpa [#allocation6 + $0x1], 1 }
 0xedd   :  { %3843 = vsyncpa [#allocation9], 1 }
 0xede   :  { %3845 = vsyncpa [#allocation9 + $0x1], 1 }
 0xedf   :  { %3846 = vsyncpa [#allocation12], 1 }
 0xee0   :  { %3848 = vsyncpa [#allocation12 + $0x1], 1 }
 0xee1   :  { %3849 = vsyncpa [#allocation15], 1 }
 0xee2   :  { %3851 = vsyncpa [#allocation15 + $0x1], 1 }

</bundles_post_ra>
